<compile_context>
chip_gen: v7x
topology: tpu7x:2x2x1
jax: 0.10.0
libtpu: 0.0.40
codegen_flags: <defaults>
</compile_context>

<pallas_src>
import functools

import jax
import jax.numpy as jnp
from jax.experimental import pallas as pl
from jax.experimental.pallas import tpu as pltpu

KSIZE = 7
PAD = 3
LEAK = 0.2
BN_EPS = 1e-5


def _round_up_128(c):
    return ((c + 127) // 128) * 128


# ---------------------------------------------------------------------------
# Fused kernel: conv x3 (+BN+LeakyReLU) -> mean over time -> linear
# ---------------------------------------------------------------------------
def _speaker_embed_kernel(
    x_ref,
    w1_ref, s1_ref, t1_ref,
    w2_ref, s2_ref, t2_ref,
    w3_ref, s3_ref, t3_ref,
    lw_ref, lb_ref,
    o_ref,
    pad1_ref, pad2_ref, pad3_ref,
    *, T, Bt,
):
    """Whole Speaker_embed forward pass for Bt batch elements.

    x_ref   : (Bt, T, 128)  bf16 input tile (time on sublanes, channels lanes)
    wN_ref  : (KSIZE, CinPad, Cout) bf16 per-tap conv weights
    sN/tN   : (1, Cout) f32 folded BN scale / shift (conv bias folded in)
    lw/lb   : (256, 512) bf16 / (1, 512) f32 final linear
    o_ref   : (Bt, 1, 512) f32
    padN_ref: (Bt, T + 2*PAD, CinPad) bf16 zero-halo activation scratch
    """

    def zero_halo(pad_ref):
        # Interior rows are fully overwritten each step; only the halo rows
        # need zeros (O(1) stores instead of O(T)).
        cp = pad_ref.shape[-1]
        z = jnp.zeros((Bt, PAD, cp), pad_ref.dtype)
        pad_ref[:, 0:PAD, :] = z
        pad_ref[:, PAD + T:PAD + T + PAD, :] = z

    def conv_bn_lrelu(pad_ref, w_ref, scale_ref, shift_ref):
        # 7 per-tap MXU matmuls accumulated in f32 (no im2col concat copy).
        cin_p = pad_ref.shape[-1]
        cout = w_ref.shape[-1]
        acc = jnp.zeros((Bt * T, cout), jnp.float32)
        for k in range(KSIZE):                       # unrolled at trace time
            win = pad_ref[:, k:k + T, :].reshape(Bt * T, cin_p)   # bf16
            acc = acc + jnp.dot(win, w_ref[k],
                                preferred_element_type=jnp.float32)
        y = acc * scale_ref[...] + shift_ref[...]    # folded BN (f32)
        return jnp.where(y > 0, y, LEAK * y)         # LeakyReLU(0.2), f32

    zero_halo(pad1_ref)
    zero_halo(pad2_ref)
    zero_halo(pad3_ref)

    # Layer 1: input already bf16 and lane-padded to 128 by the wrapper.
    pad1_ref[:, PAD:PAD + T, :] = x_ref[...]
    h1 = conv_bn_lrelu(pad1_ref, w1_ref, s1_ref, t1_ref)   # (Bt*T, 128) f32

    # Layer 2.
    pad2_ref[:, PAD:PAD + T, :] = h1.astype(jnp.bfloat16).reshape(Bt, T, -1)
    h2 = conv_bn_lrelu(pad2_ref, w2_ref, s2_ref, t2_ref)   # (Bt*T, 256) f32

    # Layer 3 (output kept in f32 for the mean).
    pad3_ref[:, PAD:PAD + T, :] = h2.astype(jnp.bfloat16).reshape(Bt, T, -1)
    h3 = conv_bn_lrelu(pad3_ref, w3_ref, s3_ref, t3_ref)   # (Bt*T, 256) f32

    # Mean over time fused with Linear(256 -> 512).
    m = jnp.mean(h3.reshape(Bt, T, -1), axis=1)            # (Bt, 256) f32
    out = jnp.dot(m.astype(jnp.bfloat16), lw_ref[...],
                  preferred_element_type=jnp.float32) + lb_ref[...]
    o_ref[...] = out.reshape(o_ref.shape)


# ---------------------------------------------------------------------------
# Wrapper
# ---------------------------------------------------------------------------
def speaker_embed_forward(x, params, block_batch=None):
    """x: (B, 1, 80, T) float32 -> (B, 512) float32."""
    x = jnp.squeeze(x, axis=1)                # (B, 80, T)
    h = jnp.transpose(x, (0, 2, 1))           # (B, T, 80) kernel layout
    B, T, cin = h.shape

    (w1, s1, t1), (w2, s2, t2), (w3, s3, t3) = params["convs"]
    lw, lb = params["lin_w"], params["lin_b"]
    D = lw.shape[1]

    c1p = w1.shape[1]                         # 128 (layer-1 Cin lane-padded)
    c2p = w2.shape[1]                         # 128
    c3p = w3.shape[1]                         # 256

    # Lane-pad channels 80 -> 128 and pre-cast to bf16 (lane-dense DMA; zero
    # padded weight rows keep the math identical).
    if cin != c1p:
        h = jnp.pad(h, ((0, 0), (0, 0), (0, c1p - cin)))
    h = h.astype(jnp.bfloat16)

    # Batch tile: largest divisor of B with a bounded row count per matmul;
    # if the tile is already >=128 rows, prefer >=2 grid steps for megacore.
    if block_batch is None:
        bt = 1
        for d in range(1, B + 1):
            if B % d == 0 and d * T <= 2048:
                bt = d
        if B // bt < 2:
            for d in range(bt - 1, 0, -1):
                if B % d == 0 and d * T >= 128:
                    bt = d
                    break
    else:
        bt = block_batch
    assert B % bt == 0

    # Generation-aware-ish VMEM budget: estimate the working set, cap at
    # 48 MB so the request is valid on v7x (64 MiB physical) as well.
    bytes_w = sum(int(a.size) * a.dtype.itemsize
                  for a in (w1, s1, t1, w2, s2, t2, w3, s3, t3, lw, lb))
    bytes_in = bt * T * c1p * 2 * 2                       # bf16, double-buffered
    bytes_out = bt * D * 4 * 2
    bytes_scr = bt * (T + 2 * PAD) * (c1p + c2p + c3p) * 2
    bytes_work = bt * T * (c1p + 3 * c3p) * 4 * 4         # f32 temps, margin
    est = 2 * bytes_w + bytes_in + bytes_out + bytes_scr + bytes_work
    vmem_limit = int(min(max(est + (8 << 20), 32 << 20), 48 << 20))

    full2 = lambda b: (0, 0)
    full3 = lambda b: (0, 0, 0)
    kernel = functools.partial(_speaker_embed_kernel, T=T, Bt=bt)
    out = pl.pallas_call(
        kernel,
        out_shape=jax.ShapeDtypeStruct((B, 1, D), jnp.float32),
        grid=(B // bt,),
        in_specs=[
            pl.BlockSpec((bt, T, c1p), lambda b: (b, 0, 0)),
            pl.BlockSpec(w1.shape, full3), pl.BlockSpec(s1.shape, full2),
            pl.BlockSpec(t1.shape, full2),
            pl.BlockSpec(w2.shape, full3), pl.BlockSpec(s2.shape, full2),
            pl.BlockSpec(t2.shape, full2),
            pl.BlockSpec(w3.shape, full3), pl.BlockSpec(s3.shape, full2),
            pl.BlockSpec(t3.shape, full2),
            pl.BlockSpec(lw.shape, full2), pl.BlockSpec(lb.shape, full2),
        ],
        out_specs=pl.BlockSpec((bt, 1, D), lambda b: (b, 0, 0)),
        scratch_shapes=[
            pltpu.VMEM((bt, T + 2 * PAD, c1p), jnp.bfloat16),
            pltpu.VMEM((bt, T + 2 * PAD, c2p), jnp.bfloat16),
            pltpu.VMEM((bt, T + 2 * PAD, c3p), jnp.bfloat16),
        ],
        compiler_params=pltpu.CompilerParams(
            dimension_semantics=("parallel",),
            vmem_limit_bytes=vmem_limit),
    )(h, w1, s1, t1, w2, s2, t2, w3, s3, t3, lw, lb)
    return out[:, 0, :]


# ---------------------------------------------------------------------------
# Parameter construction (deterministic, synthetic)
# ---------------------------------------------------------------------------
def init_params(key):
    channels = [(80, 128), (128, 256), (256, 256)]
    keys = jax.random.split(key, 6 * len(channels) + 2)
    convs = []
    ki = 0
    for cin, cout in channels:
        kw, kb, kg, kbe, km, kv = keys[ki:ki + 6]
        ki += 6
        # Conv1d weight stored tap-major (KSIZE, Cin, Cout); bias (Cout,)
        w = jax.random.normal(kw, (KSIZE, cin, cout), jnp.float32) * 0.05
        b = jax.random.normal(kb, (cout,), jnp.float32) * 0.05
        # BatchNorm1d inference-mode fold (randomized running stats).
        gamma = 1.0 + 0.1 * jax.random.normal(kg, (cout,), jnp.float32)
        beta = 0.1 * jax.random.normal(kbe, (cout,), jnp.float32)
        run_mean = 0.1 * jax.random.normal(km, (cout,), jnp.float32)
        run_var = jax.random.uniform(kv, (cout,), jnp.float32, 0.5, 1.5)
        scale = gamma / jnp.sqrt(run_var + BN_EPS)
        shift = (b - run_mean) * scale + beta          # conv bias folded in
        # Lane-pad Cin to a multiple of 128 (zero rows), keep tap-major layout.
        cin_p = _round_up_128(cin)
        if cin_p != cin:
            w = jnp.pad(w, ((0, 0), (0, cin_p - cin), (0, 0)))
        convs.append((w.astype(jnp.bfloat16),
                      scale.reshape(1, cout), shift.reshape(1, cout)))
    lin_w = (jax.random.normal(keys[-2], (256, 512), jnp.float32) * 0.05
             ).astype(jnp.bfloat16)
    lin_b = (jax.random.normal(keys[-1], (512,), jnp.float32) * 0.05
             ).reshape(1, 512)
    return {"convs": convs, "lin_w": lin_w, "lin_b": lin_b}


# ---------------------------------------------------------------------------
# Pure-JAX reference with identical math (same bf16 cast points)
# ---------------------------------------------------------------------------
def reference_forward(x, params):
    x = jnp.squeeze(x, axis=1)
    h = jnp.transpose(x, (0, 2, 1))                    # (B, T, 80)
    B, T, _ = h.shape
    h = h.astype(jnp.bfloat16)
    n_layers = len(params["convs"])
    for li, (w, scale, shift) in enumerate(params["convs"]):
        cin_p = w.shape[1]
        if h.shape[2] != cin_p:
            h = jnp.pad(h, ((0, 0), (0, 0), (0, cin_p - h.shape[2])))
        xp = jnp.pad(h, ((0, 0), (PAD, PAD), (0, 0)))
        acc = jnp.zeros((B, T, w.shape[2]), jnp.float32)
        for k in range(KSIZE):
            acc = acc + jnp.einsum("btc,cd->btd", xp[:, k:k + T, :], w[k],
                                   preferred_element_type=jnp.float32)
        y = acc * scale + shift
        y = jnp.where(y > 0, y, LEAK * y)
        h = y if li == n_layers - 1 else y.astype(jnp.bfloat16)
    m = jnp.mean(h, axis=1)                            # (B, 256) f32
    return (jnp.dot(m.astype(jnp.bfloat16), params["lin_w"],
                    preferred_element_type=jnp.float32) + params["lin_b"])


# ---------------------------------------------------------------------------
if __name__ == "__main__":
    key = jax.random.PRNGKey(0)
    pkey, xkey = jax.random.split(key)
    params = init_params(pkey)

    B, T = 2, 16
    x = jax.random.normal(xkey, (B, 1, 80, T), jnp.float32)

    out = jax.block_until_ready(speaker_embed_forward(x, params))
    assert out.shape == (B, 512), out.shape

    ref = jax.block_until_ready(reference_forward(x, params))
    assert jnp.allclose(out, ref, atol=2e-3, rtol=2e-3), (
        float(jnp.max(jnp.abs(out - ref))))

    print("KERNEL_OK")
</pallas_src>

<mosaic_0001>
module attributes {stable_mosaic.version = 11 : i64} {
  func.func @_speaker_embed_kernel(%arg0: i32, %arg1: memref<2x16x128xbf16, #tpu.memory_space<vmem>>, %arg2: memref<7x128x128xbf16, #tpu.memory_space<vmem>>, %arg3: memref<1x128xf32, #tpu.memory_space<vmem>>, %arg4: memref<1x128xf32, #tpu.memory_space<vmem>>, %arg5: memref<7x128x256xbf16, #tpu.memory_space<vmem>>, %arg6: memref<1x256xf32, #tpu.memory_space<vmem>>, %arg7: memref<1x256xf32, #tpu.memory_space<vmem>>, %arg8: memref<7x256x256xbf16, #tpu.memory_space<vmem>>, %arg9: memref<1x256xf32, #tpu.memory_space<vmem>>, %arg10: memref<1x256xf32, #tpu.memory_space<vmem>>, %arg11: memref<256x512xbf16, #tpu.memory_space<vmem>>, %arg12: memref<1x512xf32, #tpu.memory_space<vmem>>, %arg13: memref<2x1x512xf32, #tpu.memory_space<vmem>>, %arg14: memref<2x22x128xbf16, #tpu.memory_space<vmem>>, %arg15: memref<2x22x128xbf16, #tpu.memory_space<vmem>>, %arg16: memref<2x22x256xbf16, #tpu.memory_space<vmem>>) attributes {dimension_semantics = [#tpu.dimension_semantics<parallel>], iteration_bounds = array<i64: 1>, scalar_prefetch = 0 : i64, scratch_operands = 3 : i64, tpu.core_type = #tpu.core_type<tc>, window_params = [{transform_indices = @transform_0, window_bounds = array<i64: 2, 16, 128>}, {pipeline_mode = #tpu.pipeline_mode<synchronous>, transform_indices = @transform_1, window_bounds = array<i64: 7, 128, 128>}, {pipeline_mode = #tpu.pipeline_mode<synchronous>, transform_indices = @transform_2, window_bounds = array<i64: 1, 128>}, {pipeline_mode = #tpu.pipeline_mode<synchronous>, transform_indices = @transform_3, window_bounds = array<i64: 1, 128>}, {pipeline_mode = #tpu.pipeline_mode<synchronous>, transform_indices = @transform_4, window_bounds = array<i64: 7, 128, 256>}, {pipeline_mode = #tpu.pipeline_mode<synchronous>, transform_indices = @transform_5, window_bounds = array<i64: 1, 256>}, {pipeline_mode = #tpu.pipeline_mode<synchronous>, transform_indices = @transform_6, window_bounds = array<i64: 1, 256>}, {pipeline_mode = #tpu.pipeline_mode<synchronous>, transform_indices = @transform_7, window_bounds = array<i64: 7, 256, 256>}, {pipeline_mode = #tpu.pipeline_mode<synchronous>, transform_indices = @transform_8, window_bounds = array<i64: 1, 256>}, {pipeline_mode = #tpu.pipeline_mode<synchronous>, transform_indices = @transform_9, window_bounds = array<i64: 1, 256>}, {pipeline_mode = #tpu.pipeline_mode<synchronous>, transform_indices = @transform_10, window_bounds = array<i64: 256, 512>}, {pipeline_mode = #tpu.pipeline_mode<synchronous>, transform_indices = @transform_11, window_bounds = array<i64: 1, 512>}, {transform_indices = @transform_12, window_bounds = array<i64: 2, 1, 512>}]} {
    %cst = arith.constant 0.000000e+00 : bf16
    %0 = vector.broadcast %cst : bf16 to vector<2x3x128xbf16>
    %c0 = arith.constant 0 : index
    %c0_0 = arith.constant 0 : index
    %c0_1 = arith.constant 0 : index
    %1 = vector.load %arg14[%c0, %c0_0, %c0_1] : memref<2x22x128xbf16, #tpu.memory_space<vmem>>, vector<2x3x128xbf16>
    tpu.vector_store %arg14[%c0, %c0_0, %c0_1], %0 {strides = array<i32>} : memref<2x22x128xbf16, #tpu.memory_space<vmem>>, vector<2x3x128xbf16>,
    %c0_2 = arith.constant 0 : index
    %c19 = arith.constant 19 : index
    %c0_3 = arith.constant 0 : index
    %2 = vector.load %arg14[%c0_2, %c19, %c0_3] : memref<2x22x128xbf16, #tpu.memory_space<vmem>>, vector<2x3x128xbf16>
    tpu.vector_store %arg14[%c0_2, %c19, %c0_3], %0 {strides = array<i32>} : memref<2x22x128xbf16, #tpu.memory_space<vmem>>, vector<2x3x128xbf16>,
    %cst_4 = arith.constant 0.000000e+00 : bf16
    %3 = vector.broadcast %cst_4 : bf16 to vector<2x3x128xbf16>
    %c0_5 = arith.constant 0 : index
    %c0_6 = arith.constant 0 : index
    %c0_7 = arith.constant 0 : index
    %4 = vector.load %arg15[%c0_5, %c0_6, %c0_7] : memref<2x22x128xbf16, #tpu.memory_space<vmem>>, vector<2x3x128xbf16>
    tpu.vector_store %arg15[%c0_5, %c0_6, %c0_7], %3 {strides = array<i32>} : memref<2x22x128xbf16, #tpu.memory_space<vmem>>, vector<2x3x128xbf16>,
    %c0_8 = arith.constant 0 : index
    %c19_9 = arith.constant 19 : index
    %c0_10 = arith.constant 0 : index
    %5 = vector.load %arg15[%c0_8, %c19_9, %c0_10] : memref<2x22x128xbf16, #tpu.memory_space<vmem>>, vector<2x3x128xbf16>
    tpu.vector_store %arg15[%c0_8, %c19_9, %c0_10], %3 {strides = array<i32>} : memref<2x22x128xbf16, #tpu.memory_space<vmem>>, vector<2x3x128xbf16>,
    %cst_11 = arith.constant 0.000000e+00 : bf16
    %6 = vector.broadcast %cst_11 : bf16 to vector<2x3x256xbf16>
    %c0_12 = arith.constant 0 : index
    %c0_13 = arith.constant 0 : index
    %c0_14 = arith.constant 0 : index
    %7 = vector.load %arg16[%c0_12, %c0_13, %c0_14] : memref<2x22x256xbf16, #tpu.memory_space<vmem>>, vector<2x3x256xbf16>
    tpu.vector_store %arg16[%c0_12, %c0_13, %c0_14], %6 {strides = array<i32>} : memref<2x22x256xbf16, #tpu.memory_space<vmem>>, vector<2x3x256xbf16>,
    %c0_15 = arith.constant 0 : index
    %c19_16 = arith.constant 19 : index
    %c0_17 = arith.constant 0 : index
    %8 = vector.load %arg16[%c0_15, %c19_16, %c0_17] : memref<2x22x256xbf16, #tpu.memory_space<vmem>>, vector<2x3x256xbf16>
    tpu.vector_store %arg16[%c0_15, %c19_16, %c0_17], %6 {strides = array<i32>} : memref<2x22x256xbf16, #tpu.memory_space<vmem>>, vector<2x3x256xbf16>,
    %c0_18 = arith.constant 0 : index
    %c0_19 = arith.constant 0 : index
    %c0_20 = arith.constant 0 : index
    %9 = vector.load %arg1[%c0_18, %c0_19, %c0_20] : memref<2x16x128xbf16, #tpu.memory_space<vmem>>, vector<2x16x128xbf16>
    %c0_21 = arith.constant 0 : index
    %c3 = arith.constant 3 : index
    %c0_22 = arith.constant 0 : index
    %10 = vector.load %arg14[%c0_21, %c3, %c0_22] : memref<2x22x128xbf16, #tpu.memory_space<vmem>>, vector<2x16x128xbf16>
    tpu.vector_store %arg14[%c0_21, %c3, %c0_22], %9 {strides = array<i32>} : memref<2x22x128xbf16, #tpu.memory_space<vmem>>, vector<2x16x128xbf16>,
    %cst_23 = arith.constant 0.000000e+00 : f32
    %11 = vector.broadcast %cst_23 : f32 to vector<32x128xf32>
    %c0_24 = arith.constant 0 : index
    %c0_25 = arith.constant 0 : index
    %c0_26 = arith.constant 0 : index
    %12 = vector.load %arg14[%c0_24, %c0_25, %c0_26] : memref<2x22x128xbf16, #tpu.memory_space<vmem>>, vector<2x16x128xbf16>
    %13 = vector.shape_cast %12 : vector<2x16x128xbf16> to vector<32x128xbf16>
    %c0_27 = arith.constant 0 : index
    %c0_28 = arith.constant 0 : index
    %c0_29 = arith.constant 0 : index
    %14 = vector.load %arg2[%c0_27, %c0_28, %c0_29] : memref<7x128x128xbf16, #tpu.memory_space<vmem>>, vector<1x128x128xbf16>
    %15 = vector.shape_cast %14 : vector<1x128x128xbf16> to vector<128x128xbf16>
    %cst_30 = arith.constant dense<0.000000e+00> : vector<32x128xf32>
    %16 = tpu.matmul %13, %15, %cst_30 {dimension_numbers = #tpu.dot_dimension_numbers<[1], [0], [0], [1], [0, 0, 1, 1], [], []>} : vector<32x128xbf16>, vector<128x128xbf16>, vector<32x128xf32> -> vector<32x128xf32>
    %17 = arith.addf %11, %16 : vector<32x128xf32>
    %c0_31 = arith.constant 0 : index
    %c1 = arith.constant 1 : index
    %c0_32 = arith.constant 0 : index
    %18 = vector.load %arg14[%c0_31, %c1, %c0_32] : memref<2x22x128xbf16, #tpu.memory_space<vmem>>, vector<2x16x128xbf16>
    %19 = vector.shape_cast %18 : vector<2x16x128xbf16> to vector<32x128xbf16>
    %c1_33 = arith.constant 1 : index
    %c0_34 = arith.constant 0 : index
    %c0_35 = arith.constant 0 : index
    %20 = vector.load %arg2[%c1_33, %c0_34, %c0_35] : memref<7x128x128xbf16, #tpu.memory_space<vmem>>, vector<1x128x128xbf16>
    %21 = vector.shape_cast %20 : vector<1x128x128xbf16> to vector<128x128xbf16>
    %cst_36 = arith.constant dense<0.000000e+00> : vector<32x128xf32>
    %22 = tpu.matmul %19, %21, %cst_36 {dimension_numbers = #tpu.dot_dimension_numbers<[1], [0], [0], [1], [0, 0, 1, 1], [], []>} : vector<32x128xbf16>, vector<128x128xbf16>, vector<32x128xf32> -> vector<32x128xf32>
    %23 = arith.addf %17, %22 : vector<32x128xf32>
    %c0_37 = arith.constant 0 : index
    %c2 = arith.constant 2 : index
    %c0_38 = arith.constant 0 : index
    %24 = vector.load %arg14[%c0_37, %c2, %c0_38] : memref<2x22x128xbf16, #tpu.memory_space<vmem>>, vector<2x16x128xbf16>
    %25 = vector.shape_cast %24 : vector<2x16x128xbf16> to vector<32x128xbf16>
    %c2_39 = arith.constant 2 : index
    %c0_40 = arith.constant 0 : index
    %c0_41 = arith.constant 0 : index
    %26 = vector.load %arg2[%c2_39, %c0_40, %c0_41] : memref<7x128x128xbf16, #tpu.memory_space<vmem>>, vector<1x128x128xbf16>
    %27 = vector.shape_cast %26 : vector<1x128x128xbf16> to vector<128x128xbf16>
    %cst_42 = arith.constant dense<0.000000e+00> : vector<32x128xf32>
    %28 = tpu.matmul %25, %27, %cst_42 {dimension_numbers = #tpu.dot_dimension_numbers<[1], [0], [0], [1], [0, 0, 1, 1], [], []>} : vector<32x128xbf16>, vector<128x128xbf16>, vector<32x128xf32> -> vector<32x128xf32>
    %29 = arith.addf %23, %28 : vector<32x128xf32>
    %c0_43 = arith.constant 0 : index
    %c3_44 = arith.constant 3 : index
    %c0_45 = arith.constant 0 : index
    %30 = vector.load %arg14[%c0_43, %c3_44, %c0_45] : memref<2x22x128xbf16, #tpu.memory_space<vmem>>, vector<2x16x128xbf16>
    %31 = vector.shape_cast %30 : vector<2x16x128xbf16> to vector<32x128xbf16>
    %c3_46 = arith.constant 3 : index
    %c0_47 = arith.constant 0 : index
    %c0_48 = arith.constant 0 : index
    %32 = vector.load %arg2[%c3_46, %c0_47, %c0_48] : memref<7x128x128xbf16, #tpu.memory_space<vmem>>, vector<1x128x128xbf16>
    %33 = vector.shape_cast %32 : vector<1x128x128xbf16> to vector<128x128xbf16>
    %cst_49 = arith.constant dense<0.000000e+00> : vector<32x128xf32>
    %34 = tpu.matmul %31, %33, %cst_49 {dimension_numbers = #tpu.dot_dimension_numbers<[1], [0], [0], [1], [0, 0, 1, 1], [], []>} : vector<32x128xbf16>, vector<128x128xbf16>, vector<32x128xf32> -> vector<32x128xf32>
    %35 = arith.addf %29, %34 : vector<32x128xf32>
    %c0_50 = arith.constant 0 : index
    %c4 = arith.constant 4 : index
    %c0_51 = arith.constant 0 : index
    %36 = vector.load %arg14[%c0_50, %c4, %c0_51] : memref<2x22x128xbf16, #tpu.memory_space<vmem>>, vector<2x16x128xbf16>
    %37 = vector.shape_cast %36 : vector<2x16x128xbf16> to vector<32x128xbf16>
    %c4_52 = arith.constant 4 : index
    %c0_53 = arith.constant 0 : index
    %c0_54 = arith.constant 0 : index
    %38 = vector.load %arg2[%c4_52, %c0_53, %c0_54] : memref<7x128x128xbf16, #tpu.memory_space<vmem>>, vector<1x128x128xbf16>
    %39 = vector.shape_cast %38 : vector<1x128x128xbf16> to vector<128x128xbf16>
    %cst_55 = arith.constant dense<0.000000e+00> : vector<32x128xf32>
    %40 = tpu.matmul %37, %39, %cst_55 {dimension_numbers = #tpu.dot_dimension_numbers<[1], [0], [0], [1], [0, 0, 1, 1], [], []>} : vector<32x128xbf16>, vector<128x128xbf16>, vector<32x128xf32> -> vector<32x128xf32>
    %41 = arith.addf %35, %40 : vector<32x128xf32>
    %c0_56 = arith.constant 0 : index
    %c5 = arith.constant 5 : index
    %c0_57 = arith.constant 0 : index
    %42 = vector.load %arg14[%c0_56, %c5, %c0_57] : memref<2x22x128xbf16, #tpu.memory_space<vmem>>, vector<2x16x128xbf16>
    %43 = vector.shape_cast %42 : vector<2x16x128xbf16> to vector<32x128xbf16>
    %c5_58 = arith.constant 5 : index
    %c0_59 = arith.constant 0 : index
    %c0_60 = arith.constant 0 : index
    %44 = vector.load %arg2[%c5_58, %c0_59, %c0_60] : memref<7x128x128xbf16, #tpu.memory_space<vmem>>, vector<1x128x128xbf16>
    %45 = vector.shape_cast %44 : vector<1x128x128xbf16> to vector<128x128xbf16>
    %cst_61 = arith.constant dense<0.000000e+00> : vector<32x128xf32>
    %46 = tpu.matmul %43, %45, %cst_61 {dimension_numbers = #tpu.dot_dimension_numbers<[1], [0], [0], [1], [0, 0, 1, 1], [], []>} : vector<32x128xbf16>, vector<128x128xbf16>, vector<32x128xf32> -> vector<32x128xf32>
    %47 = arith.addf %41, %46 : vector<32x128xf32>
    %c0_62 = arith.constant 0 : index
    %c6 = arith.constant 6 : index
    %c0_63 = arith.constant 0 : index
    %48 = vector.load %arg14[%c0_62, %c6, %c0_63] : memref<2x22x128xbf16, #tpu.memory_space<vmem>>, vector<2x16x128xbf16>
    %49 = vector.shape_cast %48 : vector<2x16x128xbf16> to vector<32x128xbf16>
    %c6_64 = arith.constant 6 : index
    %c0_65 = arith.constant 0 : index
    %c0_66 = arith.constant 0 : index
    %50 = vector.load %arg2[%c6_64, %c0_65, %c0_66] : memref<7x128x128xbf16, #tpu.memory_space<vmem>>, vector<1x128x128xbf16>
    %51 = vector.shape_cast %50 : vector<1x128x128xbf16> to vector<128x128xbf16>
    %cst_67 = arith.constant dense<0.000000e+00> : vector<32x128xf32>
    %52 = tpu.matmul %49, %51, %cst_67 {dimension_numbers = #tpu.dot_dimension_numbers<[1], [0], [0], [1], [0, 0, 1, 1], [], []>} : vector<32x128xbf16>, vector<128x128xbf16>, vector<32x128xf32> -> vector<32x128xf32>
    %53 = arith.addf %47, %52 : vector<32x128xf32>
    %c0_68 = arith.constant 0 : index
    %c0_69 = arith.constant 0 : index
    %54 = vector.load %arg3[%c0_68, %c0_69] : memref<1x128xf32, #tpu.memory_space<vmem>>, vector<1x128xf32>
    %55 = vector.broadcast %54 : vector<1x128xf32> to vector<32x128xf32>
    %56 = arith.mulf %53, %55 : vector<32x128xf32>
    %c0_70 = arith.constant 0 : index
    %c0_71 = arith.constant 0 : index
    %57 = vector.load %arg4[%c0_70, %c0_71] : memref<1x128xf32, #tpu.memory_space<vmem>>, vector<1x128xf32>
    %58 = vector.broadcast %57 : vector<1x128xf32> to vector<32x128xf32>
    %59 = arith.addf %56, %58 : vector<32x128xf32>
    %cst_72 = arith.constant 0.000000e+00 : f32
    %60 = vector.broadcast %cst_72 : f32 to vector<32x128xf32>
    %61 = arith.cmpf ogt, %59, %60 : vector<32x128xf32>
    %cst_73 = arith.constant 2.000000e-01 : f32
    %62 = vector.broadcast %cst_73 : f32 to vector<32x128xf32>
    %63 = arith.mulf %62, %59 : vector<32x128xf32>
    %64 = arith.select %61, %59, %63 : vector<32x128xi1>, vector<32x128xf32>
    %65 = arith.truncf %64 : vector<32x128xf32> to vector<32x128xbf16>
    %66 = vector.shape_cast %65 : vector<32x128xbf16> to vector<2x16x128xbf16>
    %c0_74 = arith.constant 0 : index
    %c3_75 = arith.constant 3 : index
    %c0_76 = arith.constant 0 : index
    %67 = vector.load %arg15[%c0_74, %c3_75, %c0_76] : memref<2x22x128xbf16, #tpu.memory_space<vmem>>, vector<2x16x128xbf16>
    tpu.vector_store %arg15[%c0_74, %c3_75, %c0_76], %66 {strides = array<i32>} : memref<2x22x128xbf16, #tpu.memory_space<vmem>>, vector<2x16x128xbf16>,
    %cst_77 = arith.constant 0.000000e+00 : f32
    %68 = vector.broadcast %cst_77 : f32 to vector<32x256xf32>
    %c0_78 = arith.constant 0 : index
    %c0_79 = arith.constant 0 : index
    %c0_80 = arith.constant 0 : index
    %69 = vector.load %arg15[%c0_78, %c0_79, %c0_80] : memref<2x22x128xbf16, #tpu.memory_space<vmem>>, vector<2x16x128xbf16>
    %70 = vector.shape_cast %69 : vector<2x16x128xbf16> to vector<32x128xbf16>
    %c0_81 = arith.constant 0 : index
    %c0_82 = arith.constant 0 : index
    %c0_83 = arith.constant 0 : index
    %71 = vector.load %arg5[%c0_81, %c0_82, %c0_83] : memref<7x128x256xbf16, #tpu.memory_space<vmem>>, vector<1x128x256xbf16>
    %72 = vector.shape_cast %71 : vector<1x128x256xbf16> to vector<128x256xbf16>
    %cst_84 = arith.constant dense<0.000000e+00> : vector<32x256xf32>
    %73 = tpu.matmul %70, %72, %cst_84 {dimension_numbers = #tpu.dot_dimension_numbers<[1], [0], [0], [1], [0, 0, 1, 1], [], []>} : vector<32x128xbf16>, vector<128x256xbf16>, vector<32x256xf32> -> vector<32x256xf32>
    %74 = arith.addf %68, %73 : vector<32x256xf32>
    %c0_85 = arith.constant 0 : index
    %c1_86 = arith.constant 1 : index
    %c0_87 = arith.constant 0 : index
    %75 = vector.load %arg15[%c0_85, %c1_86, %c0_87] : memref<2x22x128xbf16, #tpu.memory_space<vmem>>, vector<2x16x128xbf16>
    %76 = vector.shape_cast %75 : vector<2x16x128xbf16> to vector<32x128xbf16>
    %c1_88 = arith.constant 1 : index
    %c0_89 = arith.constant 0 : index
    %c0_90 = arith.constant 0 : index
    %77 = vector.load %arg5[%c1_88, %c0_89, %c0_90] : memref<7x128x256xbf16, #tpu.memory_space<vmem>>, vector<1x128x256xbf16>
    %78 = vector.shape_cast %77 : vector<1x128x256xbf16> to vector<128x256xbf16>
    %cst_91 = arith.constant dense<0.000000e+00> : vector<32x256xf32>
    %79 = tpu.matmul %76, %78, %cst_91 {dimension_numbers = #tpu.dot_dimension_numbers<[1], [0], [0], [1], [0, 0, 1, 1], [], []>} : vector<32x128xbf16>, vector<128x256xbf16>, vector<32x256xf32> -> vector<32x256xf32>
    %80 = arith.addf %74, %79 : vector<32x256xf32>
    %c0_92 = arith.constant 0 : index
    %c2_93 = arith.constant 2 : index
    %c0_94 = arith.constant 0 : index
    %81 = vector.load %arg15[%c0_92, %c2_93, %c0_94] : memref<2x22x128xbf16, #tpu.memory_space<vmem>>, vector<2x16x128xbf16>
    %82 = vector.shape_cast %81 : vector<2x16x128xbf16> to vector<32x128xbf16>
    %c2_95 = arith.constant 2 : index
    %c0_96 = arith.constant 0 : index
    %c0_97 = arith.constant 0 : index
    %83 = vector.load %arg5[%c2_95, %c0_96, %c0_97] : memref<7x128x256xbf16, #tpu.memory_space<vmem>>, vector<1x128x256xbf16>
    %84 = vector.shape_cast %83 : vector<1x128x256xbf16> to vector<128x256xbf16>
    %cst_98 = arith.constant dense<0.000000e+00> : vector<32x256xf32>
    %85 = tpu.matmul %82, %84, %cst_98 {dimension_numbers = #tpu.dot_dimension_numbers<[1], [0], [0], [1], [0, 0, 1, 1], [], []>} : vector<32x128xbf16>, vector<128x256xbf16>, vector<32x256xf32> -> vector<32x256xf32>
    %86 = arith.addf %80, %85 : vector<32x256xf32>
    %c0_99 = arith.constant 0 : index
    %c3_100 = arith.constant 3 : index
    %c0_101 = arith.constant 0 : index
    %87 = vector.load %arg15[%c0_99, %c3_100, %c0_101] : memref<2x22x128xbf16, #tpu.memory_space<vmem>>, vector<2x16x128xbf16>
    %88 = vector.shape_cast %87 : vector<2x16x128xbf16> to vector<32x128xbf16>
    %c3_102 = arith.constant 3 : index
    %c0_103 = arith.constant 0 : index
    %c0_104 = arith.constant 0 : index
    %89 = vector.load %arg5[%c3_102, %c0_103, %c0_104] : memref<7x128x256xbf16, #tpu.memory_space<vmem>>, vector<1x128x256xbf16>
    %90 = vector.shape_cast %89 : vector<1x128x256xbf16> to vector<128x256xbf16>
    %cst_105 = arith.constant dense<0.000000e+00> : vector<32x256xf32>
    %91 = tpu.matmul %88, %90, %cst_105 {dimension_numbers = #tpu.dot_dimension_numbers<[1], [0], [0], [1], [0, 0, 1, 1], [], []>} : vector<32x128xbf16>, vector<128x256xbf16>, vector<32x256xf32> -> vector<32x256xf32>
    %92 = arith.addf %86, %91 : vector<32x256xf32>
    %c0_106 = arith.constant 0 : index
    %c4_107 = arith.constant 4 : index
    %c0_108 = arith.constant 0 : index
    %93 = vector.load %arg15[%c0_106, %c4_107, %c0_108] : memref<2x22x128xbf16, #tpu.memory_space<vmem>>, vector<2x16x128xbf16>
    %94 = vector.shape_cast %93 : vector<2x16x128xbf16> to vector<32x128xbf16>
    %c4_109 = arith.constant 4 : index
    %c0_110 = arith.constant 0 : index
    %c0_111 = arith.constant 0 : index
    %95 = vector.load %arg5[%c4_109, %c0_110, %c0_111] : memref<7x128x256xbf16, #tpu.memory_space<vmem>>, vector<1x128x256xbf16>
    %96 = vector.shape_cast %95 : vector<1x128x256xbf16> to vector<128x256xbf16>
    %cst_112 = arith.constant dense<0.000000e+00> : vector<32x256xf32>
    %97 = tpu.matmul %94, %96, %cst_112 {dimension_numbers = #tpu.dot_dimension_numbers<[1], [0], [0], [1], [0, 0, 1, 1], [], []>} : vector<32x128xbf16>, vector<128x256xbf16>, vector<32x256xf32> -> vector<32x256xf32>
    %98 = arith.addf %92, %97 : vector<32x256xf32>
    %c0_113 = arith.constant 0 : index
    %c5_114 = arith.constant 5 : index
    %c0_115 = arith.constant 0 : index
    %99 = vector.load %arg15[%c0_113, %c5_114, %c0_115] : memref<2x22x128xbf16, #tpu.memory_space<vmem>>, vector<2x16x128xbf16>
    %100 = vector.shape_cast %99 : vector<2x16x128xbf16> to vector<32x128xbf16>
    %c5_116 = arith.constant 5 : index
    %c0_117 = arith.constant 0 : index
    %c0_118 = arith.constant 0 : index
    %101 = vector.load %arg5[%c5_116, %c0_117, %c0_118] : memref<7x128x256xbf16, #tpu.memory_space<vmem>>, vector<1x128x256xbf16>
    %102 = vector.shape_cast %101 : vector<1x128x256xbf16> to vector<128x256xbf16>
    %cst_119 = arith.constant dense<0.000000e+00> : vector<32x256xf32>
    %103 = tpu.matmul %100, %102, %cst_119 {dimension_numbers = #tpu.dot_dimension_numbers<[1], [0], [0], [1], [0, 0, 1, 1], [], []>} : vector<32x128xbf16>, vector<128x256xbf16>, vector<32x256xf32> -> vector<32x256xf32>
    %104 = arith.addf %98, %103 : vector<32x256xf32>
    %c0_120 = arith.constant 0 : index
    %c6_121 = arith.constant 6 : index
    %c0_122 = arith.constant 0 : index
    %105 = vector.load %arg15[%c0_120, %c6_121, %c0_122] : memref<2x22x128xbf16, #tpu.memory_space<vmem>>, vector<2x16x128xbf16>
    %106 = vector.shape_cast %105 : vector<2x16x128xbf16> to vector<32x128xbf16>
    %c6_123 = arith.constant 6 : index
    %c0_124 = arith.constant 0 : index
    %c0_125 = arith.constant 0 : index
    %107 = vector.load %arg5[%c6_123, %c0_124, %c0_125] : memref<7x128x256xbf16, #tpu.memory_space<vmem>>, vector<1x128x256xbf16>
    %108 = vector.shape_cast %107 : vector<1x128x256xbf16> to vector<128x256xbf16>
    %cst_126 = arith.constant dense<0.000000e+00> : vector<32x256xf32>
    %109 = tpu.matmul %106, %108, %cst_126 {dimension_numbers = #tpu.dot_dimension_numbers<[1], [0], [0], [1], [0, 0, 1, 1], [], []>} : vector<32x128xbf16>, vector<128x256xbf16>, vector<32x256xf32> -> vector<32x256xf32>
    %110 = arith.addf %104, %109 : vector<32x256xf32>
    %c0_127 = arith.constant 0 : index
    %c0_128 = arith.constant 0 : index
    %111 = vector.load %arg6[%c0_127, %c0_128] : memref<1x256xf32, #tpu.memory_space<vmem>>, vector<1x256xf32>
    %112 = vector.broadcast %111 : vector<1x256xf32> to vector<32x256xf32>
    %113 = arith.mulf %110, %112 : vector<32x256xf32>
    %c0_129 = arith.constant 0 : index
    %c0_130 = arith.constant 0 : index
    %114 = vector.load %arg7[%c0_129, %c0_130] : memref<1x256xf32, #tpu.memory_space<vmem>>, vector<1x256xf32>
    %115 = vector.broadcast %114 : vector<1x256xf32> to vector<32x256xf32>
    %116 = arith.addf %113, %115 : vector<32x256xf32>
    %cst_131 = arith.constant 0.000000e+00 : f32
    %117 = vector.broadcast %cst_131 : f32 to vector<32x256xf32>
    %118 = arith.cmpf ogt, %116, %117 : vector<32x256xf32>
    %cst_132 = arith.constant 2.000000e-01 : f32
    %119 = vector.broadcast %cst_132 : f32 to vector<32x256xf32>
    %120 = arith.mulf %119, %116 : vector<32x256xf32>
    %121 = arith.select %118, %116, %120 : vector<32x256xi1>, vector<32x256xf32>
    %122 = arith.truncf %121 : vector<32x256xf32> to vector<32x256xbf16>
    %123 = vector.shape_cast %122 : vector<32x256xbf16> to vector<2x16x256xbf16>
    %c0_133 = arith.constant 0 : index
    %c3_134 = arith.constant 3 : index
    %c0_135 = arith.constant 0 : index
    %124 = vector.load %arg16[%c0_133, %c3_134, %c0_135] : memref<2x22x256xbf16, #tpu.memory_space<vmem>>, vector<2x16x256xbf16>
    tpu.vector_store %arg16[%c0_133, %c3_134, %c0_135], %123 {strides = array<i32>} : memref<2x22x256xbf16, #tpu.memory_space<vmem>>, vector<2x16x256xbf16>,
    %cst_136 = arith.constant 0.000000e+00 : f32
    %125 = vector.broadcast %cst_136 : f32 to vector<32x256xf32>
    %c0_137 = arith.constant 0 : index
    %c0_138 = arith.constant 0 : index
    %c0_139 = arith.constant 0 : index
    %126 = vector.load %arg16[%c0_137, %c0_138, %c0_139] : memref<2x22x256xbf16, #tpu.memory_space<vmem>>, vector<2x16x256xbf16>
    %127 = vector.shape_cast %126 : vector<2x16x256xbf16> to vector<32x256xbf16>
    %c0_140 = arith.constant 0 : index
    %c0_141 = arith.constant 0 : index
    %c0_142 = arith.constant 0 : index
    %128 = vector.load %arg8[%c0_140, %c0_141, %c0_142] : memref<7x256x256xbf16, #tpu.memory_space<vmem>>, vector<1x256x256xbf16>
    %129 = vector.shape_cast %128 : vector<1x256x256xbf16> to vector<256x256xbf16>
    %cst_143 = arith.constant dense<0.000000e+00> : vector<32x256xf32>
    %130 = tpu.matmul %127, %129, %cst_143 {dimension_numbers = #tpu.dot_dimension_numbers<[1], [0], [0], [1], [0, 0, 1, 1], [], []>} : vector<32x256xbf16>, vector<256x256xbf16>, vector<32x256xf32> -> vector<32x256xf32>
    %131 = arith.addf %125, %130 : vector<32x256xf32>
    %c0_144 = arith.constant 0 : index
    %c1_145 = arith.constant 1 : index
    %c0_146 = arith.constant 0 : index
    %132 = vector.load %arg16[%c0_144, %c1_145, %c0_146] : memref<2x22x256xbf16, #tpu.memory_space<vmem>>, vector<2x16x256xbf16>
    %133 = vector.shape_cast %132 : vector<2x16x256xbf16> to vector<32x256xbf16>
    %c1_147 = arith.constant 1 : index
    %c0_148 = arith.constant 0 : index
    %c0_149 = arith.constant 0 : index
    %134 = vector.load %arg8[%c1_147, %c0_148, %c0_149] : memref<7x256x256xbf16, #tpu.memory_space<vmem>>, vector<1x256x256xbf16>
    %135 = vector.shape_cast %134 : vector<1x256x256xbf16> to vector<256x256xbf16>
    %cst_150 = arith.constant dense<0.000000e+00> : vector<32x256xf32>
    %136 = tpu.matmul %133, %135, %cst_150 {dimension_numbers = #tpu.dot_dimension_numbers<[1], [0], [0], [1], [0, 0, 1, 1], [], []>} : vector<32x256xbf16>, vector<256x256xbf16>, vector<32x256xf32> -> vector<32x256xf32>
    %137 = arith.addf %131, %136 : vector<32x256xf32>
    %c0_151 = arith.constant 0 : index
    %c2_152 = arith.constant 2 : index
    %c0_153 = arith.constant 0 : index
    %138 = vector.load %arg16[%c0_151, %c2_152, %c0_153] : memref<2x22x256xbf16, #tpu.memory_space<vmem>>, vector<2x16x256xbf16>
    %139 = vector.shape_cast %138 : vector<2x16x256xbf16> to vector<32x256xbf16>
    %c2_154 = arith.constant 2 : index
    %c0_155 = arith.constant 0 : index
    %c0_156 = arith.constant 0 : index
    %140 = vector.load %arg8[%c2_154, %c0_155, %c0_156] : memref<7x256x256xbf16, #tpu.memory_space<vmem>>, vector<1x256x256xbf16>
    %141 = vector.shape_cast %140 : vector<1x256x256xbf16> to vector<256x256xbf16>
    %cst_157 = arith.constant dense<0.000000e+00> : vector<32x256xf32>
    %142 = tpu.matmul %139, %141, %cst_157 {dimension_numbers = #tpu.dot_dimension_numbers<[1], [0], [0], [1], [0, 0, 1, 1], [], []>} : vector<32x256xbf16>, vector<256x256xbf16>, vector<32x256xf32> -> vector<32x256xf32>
    %143 = arith.addf %137, %142 : vector<32x256xf32>
    %c0_158 = arith.constant 0 : index
    %c3_159 = arith.constant 3 : index
    %c0_160 = arith.constant 0 : index
    %144 = vector.load %arg16[%c0_158, %c3_159, %c0_160] : memref<2x22x256xbf16, #tpu.memory_space<vmem>>, vector<2x16x256xbf16>
    %145 = vector.shape_cast %144 : vector<2x16x256xbf16> to vector<32x256xbf16>
    %c3_161 = arith.constant 3 : index
    %c0_162 = arith.constant 0 : index
    %c0_163 = arith.constant 0 : index
    %146 = vector.load %arg8[%c3_161, %c0_162, %c0_163] : memref<7x256x256xbf16, #tpu.memory_space<vmem>>, vector<1x256x256xbf16>
    %147 = vector.shape_cast %146 : vector<1x256x256xbf16> to vector<256x256xbf16>
    %cst_164 = arith.constant dense<0.000000e+00> : vector<32x256xf32>
    %148 = tpu.matmul %145, %147, %cst_164 {dimension_numbers = #tpu.dot_dimension_numbers<[1], [0], [0], [1], [0, 0, 1, 1], [], []>} : vector<32x256xbf16>, vector<256x256xbf16>, vector<32x256xf32> -> vector<32x256xf32>
    %149 = arith.addf %143, %148 : vector<32x256xf32>
    %c0_165 = arith.constant 0 : index
    %c4_166 = arith.constant 4 : index
    %c0_167 = arith.constant 0 : index
    %150 = vector.load %arg16[%c0_165, %c4_166, %c0_167] : memref<2x22x256xbf16, #tpu.memory_space<vmem>>, vector<2x16x256xbf16>
    %151 = vector.shape_cast %150 : vector<2x16x256xbf16> to vector<32x256xbf16>
    %c4_168 = arith.constant 4 : index
    %c0_169 = arith.constant 0 : index
    %c0_170 = arith.constant 0 : index
    %152 = vector.load %arg8[%c4_168, %c0_169, %c0_170] : memref<7x256x256xbf16, #tpu.memory_space<vmem>>, vector<1x256x256xbf16>
    %153 = vector.shape_cast %152 : vector<1x256x256xbf16> to vector<256x256xbf16>
    %cst_171 = arith.constant dense<0.000000e+00> : vector<32x256xf32>
    %154 = tpu.matmul %151, %153, %cst_171 {dimension_numbers = #tpu.dot_dimension_numbers<[1], [0], [0], [1], [0, 0, 1, 1], [], []>} : vector<32x256xbf16>, vector<256x256xbf16>, vector<32x256xf32> -> vector<32x256xf32>
    %155 = arith.addf %149, %154 : vector<32x256xf32>
    %c0_172 = arith.constant 0 : index
    %c5_173 = arith.constant 5 : index
    %c0_174 = arith.constant 0 : index
    %156 = vector.load %arg16[%c0_172, %c5_173, %c0_174] : memref<2x22x256xbf16, #tpu.memory_space<vmem>>, vector<2x16x256xbf16>
    %157 = vector.shape_cast %156 : vector<2x16x256xbf16> to vector<32x256xbf16>
    %c5_175 = arith.constant 5 : index
    %c0_176 = arith.constant 0 : index
    %c0_177 = arith.constant 0 : index
    %158 = vector.load %arg8[%c5_175, %c0_176, %c0_177] : memref<7x256x256xbf16, #tpu.memory_space<vmem>>, vector<1x256x256xbf16>
    %159 = vector.shape_cast %158 : vector<1x256x256xbf16> to vector<256x256xbf16>
    %cst_178 = arith.constant dense<0.000000e+00> : vector<32x256xf32>
    %160 = tpu.matmul %157, %159, %cst_178 {dimension_numbers = #tpu.dot_dimension_numbers<[1], [0], [0], [1], [0, 0, 1, 1], [], []>} : vector<32x256xbf16>, vector<256x256xbf16>, vector<32x256xf32> -> vector<32x256xf32>
    %161 = arith.addf %155, %160 : vector<32x256xf32>
    %c0_179 = arith.constant 0 : index
    %c6_180 = arith.constant 6 : index
    %c0_181 = arith.constant 0 : index
    %162 = vector.load %arg16[%c0_179, %c6_180, %c0_181] : memref<2x22x256xbf16, #tpu.memory_space<vmem>>, vector<2x16x256xbf16>
    %163 = vector.shape_cast %162 : vector<2x16x256xbf16> to vector<32x256xbf16>
    %c6_182 = arith.constant 6 : index
    %c0_183 = arith.constant 0 : index
    %c0_184 = arith.constant 0 : index
    %164 = vector.load %arg8[%c6_182, %c0_183, %c0_184] : memref<7x256x256xbf16, #tpu.memory_space<vmem>>, vector<1x256x256xbf16>
    %165 = vector.shape_cast %164 : vector<1x256x256xbf16> to vector<256x256xbf16>
    %cst_185 = arith.constant dense<0.000000e+00> : vector<32x256xf32>
    %166 = tpu.matmul %163, %165, %cst_185 {dimension_numbers = #tpu.dot_dimension_numbers<[1], [0], [0], [1], [0, 0, 1, 1], [], []>} : vector<32x256xbf16>, vector<256x256xbf16>, vector<32x256xf32> -> vector<32x256xf32>
    %167 = arith.addf %161, %166 : vector<32x256xf32>
    %c0_186 = arith.constant 0 : index
    %c0_187 = arith.constant 0 : index
    %168 = vector.load %arg9[%c0_186, %c0_187] : memref<1x256xf32, #tpu.memory_space<vmem>>, vector<1x256xf32>
    %169 = vector.broadcast %168 : vector<1x256xf32> to vector<32x256xf32>
    %170 = arith.mulf %167, %169 : vector<32x256xf32>
    %c0_188 = arith.constant 0 : index
    %c0_189 = arith.constant 0 : index
    %171 = vector.load %arg10[%c0_188, %c0_189] : memref<1x256xf32, #tpu.memory_space<vmem>>, vector<1x256xf32>
    %172 = vector.broadcast %171 : vector<1x256xf32> to vector<32x256xf32>
    %173 = arith.addf %170, %172 : vector<32x256xf32>
    %cst_190 = arith.constant 0.000000e+00 : f32
    %174 = vector.broadcast %cst_190 : f32 to vector<32x256xf32>
    %175 = arith.cmpf ogt, %173, %174 : vector<32x256xf32>
    %cst_191 = arith.constant 2.000000e-01 : f32
    %176 = vector.broadcast %cst_191 : f32 to vector<32x256xf32>
    %177 = arith.mulf %176, %173 : vector<32x256xf32>
    %178 = arith.select %175, %173, %177 : vector<32x256xi1>, vector<32x256xf32>
    %179 = vector.shape_cast %178 : vector<32x256xf32> to vector<2x16x256xf32>
    %cst_192 = arith.constant dense<0.000000e+00> : vector<2x256xf32>
    %180 = vector.multi_reduction <add>, %179, %cst_192 [1] : vector<2x16x256xf32> to vector<2x256xf32>
    %cst_193 = arith.constant 1.600000e+01 : f32
    %181 = vector.broadcast %cst_193 : f32 to vector<2x256xf32>
    %182 = arith.divf %180, %181 : vector<2x256xf32>
    %183 = arith.truncf %182 : vector<2x256xf32> to vector<2x256xbf16>
    %c0_194 = arith.constant 0 : index
    %c0_195 = arith.constant 0 : index
    %184 = vector.load %arg11[%c0_194, %c0_195] : memref<256x512xbf16, #tpu.memory_space<vmem>>, vector<256x512xbf16>
    %cst_196 = arith.constant dense<0.000000e+00> : vector<2x512xf32>
    %185 = tpu.matmul %183, %184, %cst_196 {dimension_numbers = #tpu.dot_dimension_numbers<[1], [0], [0], [1], [0, 0, 1, 1], [], []>} : vector<2x256xbf16>, vector<256x512xbf16>, vector<2x512xf32> -> vector<2x512xf32>
    %c0_197 = arith.constant 0 : index
    %c0_198 = arith.constant 0 : index
    %186 = vector.load %arg12[%c0_197, %c0_198] : memref<1x512xf32, #tpu.memory_space<vmem>>, vector<1x512xf32>
    %187 = vector.broadcast %186 : vector<1x512xf32> to vector<2x512xf32>
    %188 = arith.addf %185, %187 : vector<2x512xf32>
    %189 = vector.shape_cast %188 : vector<2x512xf32> to vector<2x1x512xf32>
    %c0_199 = arith.constant 0 : index
    %c0_200 = arith.constant 0 : index
    %c0_201 = arith.constant 0 : index
    %190 = vector.load %arg13[%c0_199, %c0_200, %c0_201] : memref<2x1x512xf32, #tpu.memory_space<vmem>>, vector<2x1x512xf32>
    tpu.vector_store %arg13[%c0_199, %c0_200, %c0_201], %189 {strides = array<i32>} : memref<2x1x512xf32, #tpu.memory_space<vmem>>, vector<2x1x512xf32>,
    return
  }
  func.func @transform_0(%arg0: i32) -> (i32, i32, i32) {
    %c0_i32 = arith.constant 0 : i32
    %c0_i32_0 = arith.constant 0 : i32
    %c0_i32_1 = arith.constant 0 : i32
    return %arg0, %c0_i32, %c0_i32_0 : i32, i32, i32
  }
  func.func @transform_1(%arg0: i32) -> (i32, i32, i32) {
    %c0_i32 = arith.constant 0 : i32
    %c0_i32_0 = arith.constant 0 : i32
    %c0_i32_1 = arith.constant 0 : i32
    %c0_i32_2 = arith.constant 0 : i32
    return %c0_i32, %c0_i32_0, %c0_i32_1 : i32, i32, i32
  }
  func.func @transform_2(%arg0: i32) -> (i32, i32) {
    %c0_i32 = arith.constant 0 : i32
    %c0_i32_0 = arith.constant 0 : i32
    %c0_i32_1 = arith.constant 0 : i32
    return %c0_i32, %c0_i32_0 : i32, i32
  }
  func.func @transform_3(%arg0: i32) -> (i32, i32) {
    %c0_i32 = arith.constant 0 : i32
    %c0_i32_0 = arith.constant 0 : i32
    %c0_i32_1 = arith.constant 0 : i32
    return %c0_i32, %c0_i32_0 : i32, i32
  }
  func.func @transform_4(%arg0: i32) -> (i32, i32, i32) {
    %c0_i32 = arith.constant 0 : i32
    %c0_i32_0 = arith.constant 0 : i32
    %c0_i32_1 = arith.constant 0 : i32
    %c0_i32_2 = arith.constant 0 : i32
    return %c0_i32, %c0_i32_0, %c0_i32_1 : i32, i32, i32
  }
  func.func @transform_5(%arg0: i32) -> (i32, i32) {
    %c0_i32 = arith.constant 0 : i32
    %c0_i32_0 = arith.constant 0 : i32
    %c0_i32_1 = arith.constant 0 : i32
    return %c0_i32, %c0_i32_0 : i32, i32
  }
  func.func @transform_6(%arg0: i32) -> (i32, i32) {
    %c0_i32 = arith.constant 0 : i32
    %c0_i32_0 = arith.constant 0 : i32
    %c0_i32_1 = arith.constant 0 : i32
    return %c0_i32, %c0_i32_0 : i32, i32
  }
  func.func @transform_7(%arg0: i32) -> (i32, i32, i32) {
    %c0_i32 = arith.constant 0 : i32
    %c0_i32_0 = arith.constant 0 : i32
    %c0_i32_1 = arith.constant 0 : i32
    %c0_i32_2 = arith.constant 0 : i32
    return %c0_i32, %c0_i32_0, %c0_i32_1 : i32, i32, i32
  }
  func.func @transform_8(%arg0: i32) -> (i32, i32) {
    %c0_i32 = arith.constant 0 : i32
    %c0_i32_0 = arith.constant 0 : i32
    %c0_i32_1 = arith.constant 0 : i32
    return %c0_i32, %c0_i32_0 : i32, i32
  }
  func.func @transform_9(%arg0: i32) -> (i32, i32) {
    %c0_i32 = arith.constant 0 : i32
    %c0_i32_0 = arith.constant 0 : i32
    %c0_i32_1 = arith.constant 0 : i32
    return %c0_i32, %c0_i32_0 : i32, i32
  }
  func.func @transform_10(%arg0: i32) -> (i32, i32) {
    %c0_i32 = arith.constant 0 : i32
    %c0_i32_0 = arith.constant 0 : i32
    %c0_i32_1 = arith.constant 0 : i32
    return %c0_i32, %c0_i32_0 : i32, i32
  }
  func.func @transform_11(%arg0: i32) -> (i32, i32) {
    %c0_i32 = arith.constant 0 : i32
    %c0_i32_0 = arith.constant 0 : i32
    %c0_i32_1 = arith.constant 0 : i32
    return %c0_i32, %c0_i32_0 : i32, i32
  }
  func.func @transform_12(%arg0: i32) -> (i32, i32, i32) {
    %c0_i32 = arith.constant 0 : i32
    %c0_i32_0 = arith.constant 0 : i32
    %c0_i32_1 = arith.constant 0 : i32
    return %arg0, %c0_i32, %c0_i32_0 : i32, i32, i32
  }
}

</mosaic_0001>

<bundles_post_ra>
// kernel: tpu_custom_call.1
= control target key start
LH: loop header
LB: loop body
LE: loop exit
PB: predicated region body
PF: predicated region fallthrough
CT: control target
= control target key end

     0   :  { %17 = vsyncpa [#allocation6], 0  ;;  %s8335_s0 = inlined_call_operand.hbm [shape: bf16[2,16,128], index: 0, kind: input, shape index: {}]   ;;  %s8336_s1 = inlined_call_operand.hbm [shape: bf16[7,128,128], index: 1, kind: input, shape index: {}]   ;;  %s8337_s2 = inlined_call_operand.vmem [shape: f32[1,128], index: 2, kind: input, shape index: {}]   ;;  %s8338_s3 = inlined_call_operand.hbm [shape: f32[1,128], index: 3, kind: input, shape index: {}]   ;;  %s8339_s4 = inlined_call_operand.hbm [shape: bf16[7,128,256], index: 4, kind: input, shape index: {}]   ;;  %s8340_s5 = inlined_call_operand.vmem [shape: f32[1,256], index: 5, kind: input, shape index: {}]   ;;  %s8341_s6 = inlined_call_operand.vmem [shape: f32[1,256], index: 6, kind: input, shape index: {}]   ;;  %s8342_s7 = inlined_call_operand.hbm [shape: bf16[7,256,256], index: 7, kind: input, shape index: {}]   ;;  %s8343_s8 = inlined_call_operand.vmem [shape: f32[1,256], index: 8, kind: input, shape index: {}]   ;;  %s8344_s9 = inlined_call_operand.vmem [shape: f32[1,256], index: 9, kind: input, shape index: {}]   ;;  %s8345_s10 = inlined_call_operand.hbm [shape: bf16[256,512], index: 10, kind: input, shape index: {}]   ;;  %s8346_s11 = inlined_call_operand.vmem [shape: f32[1,512], index: 11, kind: input, shape index: {}]   ;;  %s8347_s12 = inlined_call_operand.hbm [shape: f32[2,1,512], index: 12, kind: output, shape index: {}]  }
   0x1   :  { %18 = vsyncpa [#allocation9], 0 }
   0x2   :  { %19 = vsyncpa [#allocation12], 0 }
   0x3   :  { %20 = vsyncpa [#allocation15], 0 }
   0x4   :  { %21 = vsyncpa [#allocation7], 0  ;;  %s7421_s21 = smov [#allocation8]   ;;  %s7422_s23 = smov [#allocation11]  }
   0x5   :  { %s39_s22 = sshll.u32 %s7421_s21, 4  ;;  %s63_s24 = sshll.u32 %s7422_s23, 4  ;;  %s40_s22 = int_to_ptr.vmem [resolvable:$true] %s39_s22  ;;  %s7501_s24 = int_to_ptr.vmem [resolvable:$true] %s63_s24 }
   0x6   :  { %s7257_s27 = scalar_lea.hbm %s8336_s1, 7168 }
   0x7   :  { %p7258_p0 = scmp.ne.s32.totalorder %s8336_s1, %s7257_s27  ;;  %p7261_p1 = scmp.lt.u32.totalorder %s7257_s27, %s8336_s1 }
   0x9   :  { %p7263_p2 = pnand %p7261_p1, %p7258_p0 }
   0xb   :  { %7266 = shalt.err (!%p7263_p2)
}
   0xc   :  { %s7267_s14 = scalar_lea.vmem %s40_s22, 7168  ;;  %p7272_p4 = scmp.lt.s32.totalorder %s40_s22, %s40_s22 }
   0xd   :  { %p7268_p3 = scmp.ne.s32.totalorder %s40_s22, %s7267_s14  ;;  %p7273_p5 = scmp.lt.s32.totalorder %s7267_s14, %s7267_s14 }
   0xf   :  { %p7274_p6 = por %p7273_p5, %p7272_p4 }
  0x11   :  { %p7275_p7 = pnand %p7274_p6, %p7268_p3 }
  0x13   :  { %7278 = shalt.err (!%p7275_p7)
}
  0x14   :  { %s7423_s15 = smov 64   ;;  %s7424_s16 = smov 4  }
  0x15   :  { %45 = dma.hbm_to_vmem [thread:$0]  %s8336_s1, 7168, %s40_s22, [#allocation9], %s7423_s15, %s7423_s15, %s7424_s16  }
  0x16   :  { %s7279_s21 = scalar_lea.hbm %s8339_s4, 14336 }
  0x17   :  { %p7280_p8 = scmp.ne.s32.totalorder %s8339_s4, %s7279_s21  ;;  %p7283_p9 = scmp.lt.u32.totalorder %s7279_s21, %s8339_s4 }
  0x19   :  { %p7285_p10 = pnand %p7283_p9, %p7280_p8 }
  0x1b   :  { %7288 = shalt.err (!%p7285_p10)
}
  0x1c   :  { %s7289_s28 = scalar_lea.vmem %s7501_s24, 14336  ;;  %p7294_p12 = scmp.lt.s32.totalorder %s7501_s24, %s7501_s24 }
  0x1d   :  { %p7290_p11 = scmp.ne.s32.totalorder %s7501_s24, %s7289_s28  ;;  %p7295_p13 = scmp.lt.s32.totalorder %s7289_s28, %s7289_s28 }
  0x1f   :  { %p7296_p0 = por %p7295_p13, %p7294_p12 }
  0x21   :  { %p7297_p1 = pnand %p7296_p0, %p7290_p11 }
  0x23   :  { %7300 = shalt.err (!%p7297_p1)
}
  0x24   :  { %s7425_s1 = smov 128   ;;  %s7426_s22 = smov 8  }
  0x25   :  { %69 = dma.hbm_to_vmem [thread:$0]  %s8339_s4, 14336, %s7501_s24, [#allocation12], %s7425_s1, %s7425_s1, %s7426_s22  }
  0x26   :  { %s7427_s13 = smov [#allocation5]   ;;  %s7428_s17 = smov [#allocation10]  }
  0x27   :  { %s27_s14 = sshll.u32 %s7427_s13, 4  ;;  %s54_s18 = sshll.u32 %s7428_s17, 4  ;;  %s28_s14 = int_to_ptr.vmem [resolvable:$true] %s27_s14  ;;  %s55_s18 = int_to_ptr.vmem [resolvable:$true] %s54_s18 }
  0x28   :  { %s7301_s21 = scalar_lea.hbm %s8335_s0, 256 }
  0x29   :  { %p7302_p2 = scmp.ne.s32.totalorder %s8335_s0, %s7301_s21  ;;  %p7305_p3 = scmp.lt.u32.totalorder %s7301_s21, %s8335_s0 }
  0x2b   :  { %p7307_p4 = pnand %p7305_p3, %p7302_p2 }
  0x2d   :  { %7310 = shalt.err (!%p7307_p4)
}
  0x2e   :  { %s7311_s4 = scalar_lea.vmem %s28_s14, 256  ;;  %p7316_p6 = scmp.lt.s32.totalorder %s28_s14, %s28_s14 }
  0x2f   :  { %p7312_p5 = scmp.ne.s32.totalorder %s28_s14, %s7311_s4  ;;  %p7317_p7 = scmp.lt.s32.totalorder %s7311_s4, %s7311_s4 }
  0x31   :  { %p7318_p8 = por %p7317_p7, %p7316_p6 }
  0x33   :  { %p7319_p9 = pnand %p7318_p8, %p7312_p5 }
  0x35   :  { %7322 = shalt.err (!%p7319_p9)
}
  0x36   :  { %33 = dma.hbm_to_vmem [thread:$0]  %s8335_s0, 256, %s28_s14, [#allocation6], %s7423_s15, %s7423_s15, %s7424_s16  }
  0x37   :  { %s7323_s13 = scalar_lea.hbm %s8338_s3, 16 }
  0x38   :  { %p7324_p10 = scmp.ne.s32.totalorder %s8338_s3, %s7323_s13  ;;  %p7327_p11 = scmp.lt.u32.totalorder %s7323_s13, %s8338_s3 }
  0x3a   :  { %p7329_p12 = pnand %p7327_p11, %p7324_p10 }
  0x3c   :  { %7332 = shalt.err (!%p7329_p12)
}
  0x3d   :  { %s7333_s23 = scalar_lea.vmem %s55_s18, 16  ;;  %s7337_s25 = scalar_lea.vmem %s55_s18, 32 }
  0x3e   :  { %p7334_p13 = scmp.ne.s32.totalorder %s55_s18, %s7333_s23  ;;  %p7338_p0 = scmp.lt.s32.totalorder %s55_s18, %s55_s18 }
  0x3f   :  { %p7339_p1 = scmp.lt.s32.totalorder %s7337_s25, %s7333_s23 }
  0x41   :  { %p7340_p2 = por %p7339_p1, %p7338_p0 }
  0x43   :  { %p7341_p3 = pnand %p7340_p2, %p7334_p13 }
  0x45   :  { %7344 = shalt.err (!%p7341_p3)
}
  0x46   :  { %57 = dma.hbm_to_vmem [thread:$0]  %s8338_s3, 16, %s55_s18, [#allocation9]  }
  0x47   :  { %s7429_s26 = smov [#allocation13]   ;;  %s7430_s4 = smov [#allocation14]  }
  0x48   :  { %s79_s27 = sshll.u32 %s7429_s26, 4  ;;  %s95_s24 = sshll.u32 %s7430_s4, 4  ;;  %s80_s27 = int_to_ptr.vmem [resolvable:$true] %s79_s27  ;;  %s7565_s24 = int_to_ptr.vmem [resolvable:$true] %s95_s24 }
  0x49   :  { %s7345_s30 = scalar_lea.hbm %s8342_s7, 28672 }
  0x4a   :  { %p7346_p4 = scmp.ne.s32.totalorder %s8342_s7, %s7345_s30  ;;  %p7349_p5 = scmp.lt.u32.totalorder %s7345_s30, %s8342_s7 }
  0x4c   :  { %p7351_p6 = pnand %p7349_p5, %p7346_p4 }
  0x4e   :  { %7354 = shalt.err (!%p7351_p6)
}
  0x4f   :  { %s7355_s3 = scalar_lea.vmem %s80_s27, 28672  ;;  %p7360_p8 = scmp.lt.s32.totalorder %s80_s27, %s80_s27 }
  0x50   :  { %p7356_p7 = scmp.ne.s32.totalorder %s80_s27, %s7355_s3  ;;  %p7361_p9 = scmp.lt.s32.totalorder %s7355_s3, %s7355_s3 }
  0x52   :  { %p7362_p10 = por %p7361_p9, %p7360_p8 }
  0x54   :  { %p7363_p11 = pnand %p7362_p10, %p7356_p7 }
  0x56   :  { %7366 = shalt.err (!%p7363_p11)
}
  0x57   :  { %85 = dma.hbm_to_vmem [thread:$0]  %s8342_s7, 28672, %s80_s27, [#allocation12], %s7425_s1, %s7425_s1, %s7426_s22  }
  0x58   :  { %s7367_s0 = scalar_lea.hbm %s8345_s10, 8192 }
  0x59   :  { %p7368_p12 = scmp.ne.s32.totalorder %s8345_s10, %s7367_s0  ;;  %p7371_p13 = scmp.lt.u32.totalorder %s7367_s0, %s8345_s10 }
  0x5b   :  { %p7373_p0 = pnand %p7371_p13, %p7368_p12 }
  0x5d   :  { %7376 = shalt.err (!%p7373_p0)
}
  0x5e   :  { %s7377_s29 = scalar_lea.vmem %s7565_s24, 8192  ;;  %p7382_p2 = scmp.lt.s32.totalorder %s7565_s24, %s7565_s24 }
  0x5f   :  { %p7378_p1 = scmp.ne.s32.totalorder %s7565_s24, %s7377_s29  ;;  %p7383_p3 = scmp.lt.s32.totalorder %s7377_s29, %s7377_s29 }
  0x61   :  { %p7384_p4 = por %p7383_p3, %p7382_p2 }
  0x63   :  { %p7385_p5 = pnand %p7384_p4, %p7378_p1 }
  0x65   :  { %7388 = shalt.err (!%p7385_p5)
}
  0x66   :  { %s7431_s7 = smov 256   ;;  %s7432_s1 = smov 16  }
  0x67   :  { %101 = dma.hbm_to_vmem [thread:$0]  %s8345_s10, 8192, %s7565_s24, [#allocation15], %s7431_s7, %s7431_s7, %s7432_s1  }
  0x68   :  { %7411 = dma.done.wait [#allocation6], 256  }
  0x69   :  { %7412 = vsyncadd [#allocation6], 4294967040 }
  0x6a   :  { %7413 = dma.done.wait [#allocation9], 7184  }
  0x6b   :  { %7414 = vsyncadd [#allocation9], 4294960112 }
  0x6c   :  { %7415 = dma.done.wait [#allocation12], 43008  }
  0x6d   :  { %7416 = vsyncadd [#allocation12], 4294924288 }
  0x6e   :  { %7417 = dma.done.wait [#allocation15], 8192  }
  0x6f   :  { %7418 = vsyncadd [#allocation15], 4294959104  ;;  %v6595_v0 = vld [vmem:[#allocation8] sm:$0xff]   ;;  %v6596_v1 = vld [vmem:[#allocation8 + $0x8] sm:$0xff]   ;;  %vm123_vm0 = vcmask 1041408   ;;  %vm223_vm5 = vcmask 1043457  }
  0x70   :  { %6340 = vmatprep.subr.bf16.mxu0 %v6595_v0  ;;  %vm124_vm1 = vsmask.f32 1280  ;;  %v6597_v2 = vld [vmem:[#allocation8 + $0x10] sm:$0xff]   ;;  %vm133_vm2 = vsmask.f32 7942  ;;  %v6598_v4 = vld [vmem:[#allocation8 + $0x18] sm:$0xff]  }
  0x71   :  { %6341 = vmatpush3.bf16.msra.mxu0 %v6595_v0  ;;  %vm7601_vm3 = vmand %vm123_vm0, %vm124_vm1  ;;  %vm177_vm4 = vsmask.f32 5392  ;;  %v126_v5 = vld [vmem:[#allocation2] sm:$0x3]  ;;  %v174_v7 = vld [vmem:[#allocation5 + $0x4] sm:$0xf] }
  0x72   :  { %6342 = vmatprep.subr.bf16.mxu0 %v6596_v1  ;;  %v173_v6 = vld [vmem:[#allocation5] sm:$0xf]  ;;  %v127_v8 = vsel %vm7601_vm3, 0, %v126_v5  ;;  %v189_v11 = vshrl.u32 %v174_v7, 16  ;;  %v192_v12 = vshll.u32 %v174_v7, 16  ;;  %v6599_v19 = vld [vmem:[#allocation8 + $0x20] sm:$0xff]   ;;  %vm7611_vm6 = vmor %vm124_vm1, %vm177_vm4 }
  0x73   :  { %v180_v9 = vshrl.u32 %v173_v6, 16  ;;  %v183_v10 = vshll.u32 %v173_v6, 16  ;;  %128 = vst [vmem:[#allocation2] sm:$0x3] %v127_v8  ;;  %v129_v13 = vld [vmem:[#allocation2 + $0xc] sm:$0x3]  ;;  %vm7617_vm8 = vmand %vm223_vm5, %vm133_vm2 }
  0x74   :  { %v191_v16 = vrot.slane %v189_v11, 6  ;;  %v130_v17 = vsel %vm7601_vm3, 0, %v129_v13  ;;  %v175_v18 = vld [vmem:[#allocation5 + $0x8] sm:$0xf]  ;;  %v194_v20 = vrot.slane %v192_v12, 7  ;;  %vm132_vm7 = vcmask 1042433  }
  0x75   :  { %6343 = vmatpush3.bf16.msra.mxu0 %v6596_v1  ;;  %v182_v14 = vrot.slane %v180_v9, 6  ;;  %v185_v15 = vrot.slane %v183_v10, 7  ;;  %131 = vst [vmem:[#allocation2 + $0xc] sm:$0x3] %v130_v17  ;;  %v176_v21 = vld [vmem:[#allocation5 + $0xc] sm:$0xf]  ;;  %vm7624_vm9 = vmand %vm132_vm7, %vm133_vm2 }
  0x76   :  { %6344 = vmatprep.subr.bf16.mxu0 %v6597_v2  ;;  %v199_v22 = vshrl.u32 %v175_v18, 16  ;;  %v202_v23 = vshll.u32 %v175_v18, 16  ;;  %v208_v25 = vshrl.u32 %v176_v21, 16  ;;  %v211_v26 = vshll.u32 %v176_v21, 16  ;;  %v6600_v35 = vld [vmem:[#allocation8 + $0x28] sm:$0xff]   ;;  %v6601_v43 = vld [vmem:[#allocation8 + $0x30] sm:$0xff]  }
  0x77   :  { %v186_v24 = vor.u32 %v185_v15, %v182_v14  ;;  %v195_v28 = vor.u32 %v194_v20, %v191_v16  ;;  %v135_v47 = vld [vmem:[#allocation2 + $0x8] sm:$0x6]  ;;  %v138_v49 = vld [vmem:[#allocation2 + $0x14] sm:$0x6]  ;;  %v6606_v62 = vld [vmem:[#allocation8 + $0x88] sm:$0xff]   ;;  %vm549_vm10 = vcmask 1042432  }
  0x78   :  { %v201_v29 = vrot.slane %v199_v22, 6  ;;  %v204_v30 = vrot.slane %v202_v23, 7  ;;  %v210_v33 = vrot.slane %v208_v25, 6  ;;  %v213_v34 = vrot.slane %v211_v26, 7  ;;  %v6602_v51 = vld [vmem:[#allocation8 + $0x38] sm:$0xff]   ;;  %v6604_v56 = vld [vmem:[#allocation8 + $0x80] sm:$0xff]  }
  0x79   :  { %6345 = vmatpush3.bf16.msra.mxu0 %v6597_v2  ;;  %v187_v31 = vrot.slane %v186_v24, 4  ;;  %v136_v48 = vsel %vm7624_vm9, 0, %v135_v47  ;;  %v139_v50 = vsel %vm7624_vm9, 0, %v138_v49  ;;  %v197_v54 = vrot.slane %v195_v28, 4  ;;  %v6607_v5 = vld [vmem:[#allocation8 + $0x90] sm:$0xff]   ;;  %v6608_v10 = vld [vmem:[#allocation8 + $0x98] sm:$0xff]  }
  0x7a   :  { %6346 = vmatprep.subr.bf16.mxu0 %v6598_v4  ;;  %v205_v36 = vor.u32 %v204_v30, %v201_v29  ;;  %v225_v38 = vld [vmem:[#allocation2] sm:$0xe]  ;;  %v214_v39 = vor.u32 %v213_v34, %v210_v33  ;;  %137 = vst [vmem:[#allocation2 + $0x8] sm:$0x6] %v136_v48  ;;  %140 = vst [vmem:[#allocation2 + $0x14] sm:$0x6] %v139_v50 }
  0x7b   :  { %v196_v37 = vsel %vm7611_vm6, %v187_v31, %v195_v28  ;;  %v226_v41 = vsel %vm7617_vm8, %v186_v24, %v225_v38  ;;  %vm550_vm11 = vcmask 1046532   ;;  %v6610_v21 = vld [vmem:[#allocation8 + $0xa8] sm:$0xff]   ;;  %vm694_vm13 = vsmask.f32 2304  ;;  %v6611_v30 = vld [vmem:[#allocation8 + $0xb0] sm:$0xff]   ;;  %v6612_v38 = vld [vmem:[#allocation8 + $0xb8] sm:$0xff]  }
  0x7c   :  { %228 = vst [vmem:[#allocation2 + $0x4] sm:$0xf] %v196_v37  ;;  %v206_v42 = vrot.slane %v205_v36, 4  ;;  %227 = vst [vmem:[#allocation2] sm:$0xe] %v226_v41  ;;  %v216_v57 = vrot.slane %v214_v39, 4 }
  0x7d   :  { %6347 = vmatpush3.bf16.msra.mxu0 %v6598_v4  ;;  %v232_v44 = vld [vmem:[#allocation2 + $0xc] sm:$0xe]  ;;  %vm7655_vm12 = vmor %vm549_vm10, %vm550_vm11  ;;  %vm695_vm14 = vsmask.f32 6416  ;;  %v6637_v48 = vld [vmem:[#allocation8 + $0x40] sm:$0xff]   ;;  %vm153_vm5 = vcmask 1045508  }
  0x7e   :  { %6348 = vmatprep.subr.bf16.mxu0 %v6599_v19  ;;  %v215_v45 = vsel %vm7611_vm6, %v206_v42, %v214_v39  ;;  %v233_v46 = vsel %vm7617_vm8, %v205_v36, %v232_v44  ;;  %vm7687_vm15 = vmor %vm694_vm13, %vm695_vm14  ;;  %6320 = vmatprep.subr.bf16.mxu1 %v6637_v48  ;;  %vm261_vm1 = vsmask.f32 3328  ;;  %vm262_vm2 = vsmask.f32 7440  ;;  %v6868_v3 = vld [vmem:[#allocation13 + $0x170] ss:$8 sps:$4 sm:$0xff]  }
  0x7f   :  { %234 = vst [vmem:[#allocation2 + $0xc] sm:$0xe] %v233_v46  ;;  %235 = vst [vmem:[#allocation2 + $0x10] sm:$0xf] %v215_v45  ;;  %6321 = vmatpush3.bf16.msra.mxu1 %v6637_v48  ;;  %vm1197_vm10 = vcmask 1044484  }
  0x80   :  { %vm7721_vm4 = vmor %vm261_vm1, %vm262_vm2  ;;  %v6877_v40 = vld [vmem:[#allocation13 + $0x290] ss:$8 sps:$4 sm:$0xff]   ;;  %v7021_v47 = vld [vmem:[#allocation13 + $0x420] ss:$8 sps:$4 sm:$0xff]  }
  0x81   :  { %6349 = vmatpush3.bf16.msra.mxu0 %v6599_v19  ;;  %v229_v61 = vld [vmem:[#allocation2 + $0x8] sm:$0x3]  ;;  %v236_v0 = vld [vmem:[#allocation2 + $0x14] sm:$0x3]  ;;  %vm7740_vm7 = vmor %vm123_vm0, %vm153_vm5  ;;  %vm1196_vm0 = vcmask 1040384  }
  0x82   :  { %6350 = vmatprep.subr.bf16.mxu0 %v6600_v35  ;;  %v230_v63 = vsel %vm7601_vm3, %v197_v54, %v229_v61  ;;  %v237_v2 = vsel %vm7601_vm3, %v216_v57, %v236_v0  ;;  %v6609_v19 = vld [vmem:[#allocation8 + $0xa0] sm:$0xff]   ;;  %v6639_v0 = vld [vmem:[#allocation8 + $0x48] sm:$0xff]   ;;  %vm7778_vm11 = vmor %vm1196_vm0, %vm1197_vm10  ;;  %vm154_vm0 = vsmask.f32 5376  ;;  %vm163_vm10 = vcmask 1046533  }
  0x83   :  { %v7638_v52 = vld [vmem:[#allocation2 + $0x4] sm:$0xf]  ;;  %v7640_v53 = vld [vmem:[#allocation2] sm:$0xf]  ;;  %231 = vst [vmem:[#allocation2 + $0x8] sm:$0x3] %v230_v63  ;;  %6322 = vmatprep.subr.bf16.mxu1 %v6639_v0 }
  0x84   :  { %v5712_v55 = vcombine.low %v7640_v53, %v7638_v52  ;;  %v543_v1 = vld [vmem:[#allocation2] sm:$0xe]  ;;  %238 = vst [vmem:[#allocation2 + $0x14] sm:$0x3] %v237_v2  ;;  %v554_v4 = vrot.slane %v7638_v52, 5  ;;  %v7667_v14 = vshll.u32 %v7638_v52, 16  ;;  %6323 = vmatpush3.bf16.msra.mxu1 %v6639_v0 }
  0x85   :  { %6351 = vmatpush3.bf16.msra.mxu0 %v6600_v35  ;;  %v5722_v6 = vrot.slane %v543_v1, 9  ;;  %v7670_v16 = vshrl.u32 %v7638_v52, 16  ;;  %v698_v17 = vshrl.u32 %v543_v1, 16  ;;  %v701_v18 = vshll.u32 %v543_v1, 16  ;;  %v6960_v0 = vld [vmem:[#allocation13 + $0x64] ss:$8 sps:$4 sm:$0xff]  }
  0x86   :  { %6352 = vmatprep.subr.bf16.mxu0 %v6601_v43  ;;  %v7644_v58 = vld [vmem:[#allocation2 + $0xc] sm:$0xf]  ;;  %v7646_v59 = vld [vmem:[#allocation2 + $0x10] sm:$0xf]  ;;  %6356 = vmatprep.mubr.bf16.mxu0 %v5712_v55  ;;  %v556_v8 = vrot.slane %v554_v4, 4  ;;  %v707_v25 = vrot.slane %v7667_v14, 6 }
  0x87   :  { %v5713_v60 = vcombine.low %v7644_v58, %v7646_v59  ;;  %v555_v11 = vsel %vm7655_vm12, %v5722_v6, %v554_v4  ;;  %v700_v22 = vrot.slane %v698_v17, 5  ;;  %v703_v23 = vrot.slane %v701_v18, 6  ;;  %v7678_v29 = vld [vmem:[#allocation2 + $0xc] sm:$0xe]  ;;  %v6615_v17 = vld [vmem:[#allocation8 + $0xd0] sm:$0xff]  }
  0x88   :  { %v706_v24 = vrot.slane %v7670_v16, 5  ;;  %v561_v31 = vrot.slane %v7646_v59, 5  ;;  %v5723_v39 = vrot.slane %v7678_v29, 9  ;;  %v1027_v46 = vrot.slane %v7670_v16, 6  ;;  %v7120_v27 = vld [vmem:[#allocation13 + $0x630] ss:$8 sps:$4 sm:$0xff]  }
  0x89   :  { %6353 = vmatpush3.bf16.msra.mxu0 %v6601_v43  ;;  %v704_v34 = vor.u32 %v703_v23, %v700_v22  ;;  %v1028_v49 = vrot.slane %v7667_v14, 7  ;;  %v265_v50 = vshrl.u32 %v7640_v53, 16  ;;  %v7698_v55 = vshrl.u32 %v7646_v59, 16  ;;  %v6616_v23 = vld [vmem:[#allocation8 + $0xd8] sm:$0xff]  }
  0x8a   :  { %6354 = vmatprep.subr.bf16.mxu0 %v6602_v51  ;;  %v7659_v9 = vld [vmem:[#allocation2 + $0x8] sm:$0x1]  ;;  %v708_v35 = vor.u32 %v707_v25, %v706_v24  ;;  %v563_v41 = vrot.slane %v561_v31, 4  ;;  %v268_v57 = vshll.u32 %v7640_v53, 16  ;;  %v7708_v63 = vshll.u32 %v7646_v59, 16  ;;  %v6641_v53 = vld [vmem:[#allocation8 + $0x50] sm:$0xff]  }
  0x8b   :  { %v557_v12 = vrot.slane %v7659_v9, 5  ;;  %v7672_v20 = vld [vmem:[#allocation2 + $0x8] sm:$0x3]  ;;  %v7681_v33 = vld [vmem:[#allocation2 + $0x14] sm:$0x1]  ;;  %v705_v43 = vrot.slane %v704_v34, 4  ;;  %6324 = vmatprep.subr.bf16.mxu1 %v6641_v53 }
  0x8c   :  { %v712_v26 = vshrl.u32 %v7672_v20, 16  ;;  %v715_v28 = vshll.u32 %v7672_v20, 16  ;;  %v564_v42 = vrot.slane %v7681_v33, 5  ;;  %v710_v44 = vrot.slane %v708_v35, 4  ;;  %6325 = vmatpush3.bf16.msra.mxu1 %v6641_v53  ;;  %v869_v53 = vld [vmem:[#allocation2] sm:$0xc] }
  0x8d   :  { %6355 = vmatpush3.bf16.msra.mxu0 %v6602_v51  ;;  %v558_v13 = vsel %vm7655_vm12, %v556_v8, %v557_v12  ;;  %v562_v51 = vsel %vm7655_vm12, %v5723_v39, %v561_v31  ;;  %v709_v61 = vsel %vm7687_vm15, %v705_v43, %v708_v35  ;;  %v1050_v1 = vrot.slane %v7698_v55, 6  ;;  %v6643_v12 = vld [vmem:[#allocation8 + $0x58] sm:$0xff]   ;;  %v6647_v31 = vld [vmem:[#allocation8 + $0x68] sm:$0xff]   ;;  %v6649_v39 = vld [vmem:[#allocation8 + $0x70] sm:$0xff]  }
  0x8e   :  { %6360 = vmatprep.subr.bf16.mxu0 %v6604_v56  ;;  %v5724_v15 = vcombine.low %v555_v11, %v558_v13  ;;  %v714_v36 = vrot.slane %v712_v26, 5  ;;  %v717_v37 = vrot.slane %v715_v28, 6  ;;  %v565_v54 = vsel %vm7655_vm12, %v563_v41, %v564_v42  ;;  %6326 = vmatprep.subr.bf16.mxu1 %v6643_v12 }
  0x8f   :  { %v5725_v2 = vcombine.low %v562_v51, %v565_v54  ;;  %v1051_v4 = vrot.slane %v7708_v63, 7  ;;  %v267_v8 = vrot.slane %v265_v50, 4  ;;  %v289_v13 = vshrl.u32 %v7644_v58, 16 }
  0x90   :  { %6357 = vmatmul.mubr.bf16.vlgmr.msra.gmra.mrb[0].mxu0 %v5713_v60  ;;  %v718_v45 = vor.u32 %v717_v37, %v714_v36  ;;  %v6613_v60 = vld [vmem:[#allocation8 + $0xc0] sm:$0xff]   ;;  %v280_v24 = vrot.slane %v7670_v16, 4  ;;  %v284_v26 = vshll.u32 %v7659_v9, 16  ;;  %6327 = vmatpush3.bf16.msra.mxu1 %v6643_v12  ;;  %v724_v35 = vshll.u32 %v7678_v29, 16 }
  0x91   :  { %6361 = vmatpush3.bf16.msra.mxu0 %v6604_v56  ;;  %6376 = vmatprep.mubr.bf16.mxu0 %v5724_v15  ;;  %v7700_v56 = vor.u32 %v1028_v49, %v1027_v46  ;;  %v7712_v11 = vor.u32 %v1051_v4, %v1050_v1  ;;  %v292_v15 = vshll.u32 %v7644_v58, 16  ;;  %v291_v22 = vrot.slane %v289_v13, 4  ;;  %v6617_v37 = vld [vmem:[#allocation8 + $0xe0] sm:$0xff]   ;;  %v6618_v46 = vld [vmem:[#allocation8 + $0xe8] sm:$0xff]  }
  0x92   :  { %6362 = vmatprep.subr.bf16.mxu0 %v6606_v62  ;;  %v721_v58 = vshrl.u32 %v7678_v29, 16  ;;  %v286_v34 = vrot.slane %v284_v26, 5  ;;  %v300_v9 = vrot.slane %v7708_v63, 5  ;;  %v304_v36 = vrot.slane %v7698_v55, 4 }
  0x93   :  { %v294_v25 = vrot.slane %v292_v15, 5  ;;  %v308_v43 = vshll.u32 %v7681_v33, 16  ;;  %v729_v49 = vrot.slane %v7698_v55, 5  ;;  %v730_v50 = vrot.slane %v7708_v63, 6  ;;  %v6619_v55 = vld [vmem:[#allocation8 + $0xf0] sm:$0xff]  }
  0x94   :  { %v723_v48 = vrot.slane %v721_v58, 5  ;;  %v726_v51 = vrot.slane %v724_v35, 6  ;;  %v6622_v58 = vld [vmem:[#allocation8 + $0x108] sm:$0xff]   ;;  %v1019_v35 = vshrl.u32 %v869_v53, 16 }
  0x95   :  { %6363 = vmatpush3.bf16.msra.mxu0 %v6606_v62  ;;  %v719_v62 = vsel %vm7687_vm15, %v710_v44, %v718_v45  ;;  %v295_v42 = vor.u32 %v294_v25, %v291_v22  ;;  %v305_v45 = vor.u32 %v304_v36, %v300_v9  ;;  %v731_v1 = vor.u32 %v730_v50, %v729_v49 }
  0x96   :  { %6364 = vmatprep.subr.bf16.mxu0 %v6607_v5  ;;  %v5734_v6 = vcombine.low %v709_v61, %v719_v62  ;;  %v310_v62 = vrot.slane %v308_v43, 5  ;;  %v727_v63 = vor.u32 %v726_v51, %v723_v48  ;;  %v1021_v36 = vrot.slane %v1019_v35, 6  ;;  %v6628_v48 = vld [vmem:[#allocation8 + $0x138] sm:$0xff]   ;;  %v6638_v35 = vld [vmem:[#allocation8 + $0x180] sm:$0xff]  }
  0x97   :  { %v296_v33 = vrot.slane %v295_v42, 4  ;;  %v306_v61 = vrot.slane %v305_v45, 4  ;;  %v733_v13 = vrot.slane %v731_v1, 4  ;;  %v870_v42 = vld [vmem:[#allocation2 + $0xc] sm:$0xc]  ;;  %v885_v43 = vrot.slane %v7646_v59, 6 }
  0x98   :  { %v728_v12 = vrot.slane %v727_v63, 4  ;;  %v5745_v49 = vrot.slane %v870_v42, 10  ;;  %v6630_v63 = vld [vmem:[#allocation8 + $0x148] sm:$0xff]  }
  0x99   :  { %6365 = vmatpush3.bf16.msra.mxu0 %v6607_v5  ;;  %v6614_v5 = vld [vmem:[#allocation8 + $0xc8] sm:$0xff]   ;;  %v887_v50 = vrot.slane %v885_v43, 4 }
  0x9a   :  { %6366 = vmatprep.subr.bf16.mxu0 %v6608_v10  ;;  %v732_v22 = vsel %vm7687_vm15, %v728_v12, %v731_v1  ;;  %v886_v59 = vsel %vm7740_vm7, %v5745_v49, %v885_v43  ;;  %v6648_v43 = vld [vmem:[#allocation8 + $0x1a8] sm:$0xff]   ;;  %v7256_v49 = vld [vmem:[#allocation2 + $0x10] sm:$0xf] }
  0x9d   :  { %6367 = vmatpush3.bf16.msra.mxu0 %v6608_v10  ;;  %v270_v10 = vrot.slane %v268_v57, 5 }
  0x9e   :  { %6368 = vmatprep.subr.bf16.mxu0 %v6609_v19 }
  0x9f   :  { %v271_v18 = vor.u32 %v270_v10, %v267_v8  ;;  %v311_v8 = vsel %vm7721_vm4, %v306_v61, %v310_v62  ;;  %v6620_v10 = vld [vmem:[#allocation8 + $0xf8] sm:$0xff]  }
  0xa1   :  { %6369 = vmatpush3.bf16.msra.mxu0 %v6609_v19  ;;  %v6645_v19 = vld [vmem:[#allocation8 + $0x60] sm:$0xff]   ;;  %v272_v28 = vrot.slane %v271_v18, 4  ;;  %v5744_v18 = vrot.slane %v869_v53, 10 }
  0xa2   :  { %6370 = vmatprep.subr.bf16.mxu0 %v6610_v21  ;;  %6328 = vmatprep.subr.bf16.mxu1 %v6645_v19 }
  0xa3   :  { %6329 = vmatpush3.bf16.msra.mxu1 %v6645_v19 }
  0xa4   :  { %6330 = vmatprep.subr.bf16.mxu1 %v6647_v31 }
  0xa5   :  { %6371 = vmatpush3.bf16.msra.mxu0 %v6610_v21  ;;  %v276_v21 = vrot.slane %v7667_v14, 5 }
  0xa6   :  { %6372 = vmatprep.subr.bf16.mxu0 %v6611_v30 }
  0xa7   :  { %v277_v29 = vsel %vm7721_vm4, %v272_v28, %v276_v21  ;;  %6331 = vmatpush3.bf16.msra.mxu1 %v6647_v31  ;;  %v6623_v28 = vld [vmem:[#allocation8 + $0x110] sm:$0xff]   ;;  %v6625_v31 = vld [vmem:[#allocation8 + $0x120] sm:$0xff]  }
  0xa8   :  { %6332 = vmatprep.subr.bf16.mxu1 %v6649_v39 }
  0xa9   :  { %6373 = vmatpush3.bf16.msra.mxu0 %v6611_v30  ;;  %v281_v30 = vor.u32 %v280_v24, %v276_v21  ;;  %v881_v21 = vrot.slane %v7672_v20, 6 }
  0xaa   :  { %6374 = vmatprep.subr.bf16.mxu0 %v6612_v38 }
  0xab   :  { %v282_v14 = vrot.slane %v281_v30, 4  ;;  %6333 = vmatpush3.bf16.msra.mxu1 %v6649_v39  ;;  %v6624_v30 = vld [vmem:[#allocation8 + $0x118] sm:$0xff]  }
  0xad   :  { %6375 = vmatpush3.bf16.msra.mxu0 %v6612_v38  ;;  %v7727_v38 = vld [vmem:[#allocation2 + $0x14] sm:$0x3]  ;;  %v287_v41 = vsel %vm7721_vm4, %v282_v14, %v286_v34  ;;  %v7758_v34 = vld [vmem:[#allocation2 + $0x8] sm:$0x7]  ;;  %v1022_v14 = vshll.u32 %v869_v53, 16 }
  0xae   :  { %6380 = vmatprep.subr.bf16.mxu0 %v6613_v60  ;;  %v5702_v44 = vcombine.low %v277_v29, %v287_v41  ;;  %v735_v54 = vshrl.u32 %v7727_v38, 16  ;;  %v738_v57 = vshll.u32 %v7727_v38, 16  ;;  %v1033_v39 = vshrl.u32 %v7758_v34, 16  ;;  %v6627_v41 = vld [vmem:[#allocation8 + $0x130] sm:$0xff]   ;;  %v6633_v53 = vld [vmem:[#allocation8 + $0x160] sm:$0xff]  }
  0xaf   :  { %v1036_v29 = vshll.u32 %v7758_v34, 16  ;;  %v888_v51 = vrot.slane %v7727_v38, 6 }
  0xb0   :  { %6377 = vmatmul.mubr.bf16.vlgmr.msra.gmra.mrb[0].mxu0 %v5725_v2  ;;  %6336 = vmatprep.mubr.bf16.mxu1 %v5702_v44  ;;  %v737_v2 = vrot.slane %v735_v54, 5  ;;  %v740_v4 = vrot.slane %v738_v57, 6  ;;  %v1035_v45 = vrot.slane %v1033_v39, 6  ;;  %v1031_v57 = vrot.slane %v7700_v56, 4 }
  0xb1   :  { %6381 = vmatpush3.bf16.msra.mxu0 %v6613_v60  ;;  %6396 = vmatprep.mubr.bf16.mxu0 %v5734_v6  ;;  %v6651_v60 = vld [vmem:[#allocation8 + $0x78] sm:$0xff]   ;;  %v301_v6 = vsel %vm7721_vm4, %v296_v33, %v300_v9  ;;  %v6626_v9 = vld [vmem:[#allocation8 + $0x128] sm:$0xff]   ;;  %v6629_v33 = vld [vmem:[#allocation8 + $0x140] sm:$0xff]   ;;  %v889_v61 = vsel %vm7740_vm7, %v887_v50, %v888_v51  ;;  %v1208_v50 = vrot.slane %v7256_v49, 7 }
  0xb2   :  { %6382 = vmatprep.subr.bf16.mxu0 %v6614_v5  ;;  %6334 = vmatprep.subr.bf16.mxu1 %v6651_v60  ;;  %v741_v15 = vor.u32 %v740_v4, %v737_v2  ;;  %v6631_v2 = vld [vmem:[#allocation8 + $0x150] sm:$0xff]   ;;  %v6632_v4 = vld [vmem:[#allocation8 + $0x158] sm:$0xff]  }
  0xb3   :  { %6335 = vmatpush3.bf16.msra.mxu1 %v6651_v60  ;;  %v6652_v51 = vld [vmem:[#allocation8 + $0x1b8] sm:$0xff]  }
  0xb5   :  { %6383 = vmatpush3.bf16.msra.mxu0 %v6614_v5  ;;  %v878_v5 = vrot.slane %v7638_v52, 6  ;;  %v6621_v52 = vld [vmem:[#allocation8 + $0x100] sm:$0xff]  }
  0xb6   :  { %6384 = vmatprep.subr.bf16.mxu0 %v6615_v17 }
  0xb7   :  { %v880_v19 = vrot.slane %v878_v5, 4  ;;  %v879_v24 = vsel %vm7740_vm7, %v5744_v18, %v878_v5  ;;  %v7774_v5 = vld [vmem:[#allocation2 + $0x14] sm:$0x7]  ;;  %v6635_v18 = vld [vmem:[#allocation8 + $0x170] sm:$0xff]  }
  0xb9   :  { %6385 = vmatpush3.bf16.msra.mxu0 %v6615_v17  ;;  %v5703_v17 = vcombine.low %v301_v6, %v311_v8  ;;  %v882_v25 = vsel %vm7740_vm7, %v880_v19, %v881_v21  ;;  %v1045_v6 = vshll.u32 %v870_v42, 16  ;;  %v6634_v8 = vld [vmem:[#allocation8 + $0x168] sm:$0xff]  }
  0xba   :  { %6386 = vmatprep.subr.bf16.mxu0 %v6616_v23  ;;  %v5746_v20 = vcombine.low %v879_v24, %v882_v25  ;;  %v6636_v25 = vld [vmem:[#allocation8 + $0x178] sm:$0xff]  }
  0xbb   :  { %6337 = vmatmul.mubr.bf16.vlgmr.msra.gmra.mrb[0].mxu1 %v5703_v17  ;;  %v1047_v12 = vrot.slane %v1045_v6, 7  ;;  %v8366_v17 = vmov 0  ;;  %v6661_v6 = vld [vmem:[#allocation11 + $0xa4] ss:$8 sps:$4 sm:$0xff]  }
  0xbc   :  { %v8367_v17 = vsel %vm7778_vm11, 4294967295, %v8366_v17 }
  0xbd   :  { %6387 = vmatpush3.bf16.msra.mxu0 %v6616_v23  ;;  %v742_v23 = vsel %vm7687_vm15, %v733_v13, %v741_v15  ;;  %v1056_v13 = vshrl.u32 %v7774_v5, 16  ;;  %v1059_v15 = vshll.u32 %v7774_v5, 16 }
  0xbe   :  { %6388 = vmatprep.subr.bf16.mxu0 %v6617_v37  ;;  %v5735_v26 = vcombine.low %v732_v22, %v742_v23  ;;  %v1190_v22 = vld [vmem:[#allocation2] sm:$0x8]  ;;  %v7255_v23 = vld [vmem:[#allocation2 + $0x4] sm:$0xf] }
  0xbf   :  { %v1058_v21 = vrot.slane %v1056_v13, 6  ;;  %v1201_v24 = vrot.slane %v7255_v23, 7  ;;  %v6667_v13 = vld [vmem:[#allocation11 + $0xc4] ss:$8 sps:$4 sm:$0xff]   ;;  %v7433_v23 = vmov 0  }
  0xc0   :  { %1650 = vmatprep.mubr.bf16.mxu1 %v7433_v23 }
  0xc1   :  { %6389 = vmatpush3.bf16.msra.mxu0 %v6617_v37  ;;  %v1024_v37 = vrot.slane %v1022_v14, 7 }
  0xc2   :  { %6390 = vmatprep.subr.bf16.mxu0 %v6618_v46 }
  0xc3   :  { %v1025_v44 = vor.u32 %v1024_v37, %v1021_v36 }
  0xc5   :  { %6391 = vmatpush3.bf16.msra.mxu0 %v6618_v46  ;;  %v1038_v46 = vrot.slane %v1036_v29, 7  ;;  %v1026_v54 = vrot.slane %v1025_v44, 4  ;;  %v6640_v29 = vld [vmem:[#allocation8 + $0x188] sm:$0xff]   ;;  %v144_v44 = vld [vmem:[#allocation3 + $0xc] sm:$0x3] }
  0xc6   :  { %6392 = vmatprep.subr.bf16.mxu0 %v6619_v55 }
  0xc7   :  { %v1039_v60 = vor.u32 %v1038_v46, %v1035_v45  ;;  %v1030_v62 = vsel %vm7611_vm6, %v1026_v54, %v7700_v56  ;;  %v1042_v56 = vshrl.u32 %v870_v42, 16  ;;  %v6646_v42 = vld [vmem:[#allocation8 + $0x1a0] sm:$0xff]   ;;  %v6650_v45 = vld [vmem:[#allocation8 + $0x1b0] sm:$0xff]   ;;  %v1191_v46 = vld [vmem:[#allocation2 + $0xc] sm:$0x8] }
  0xc8   :  { %v5767_v54 = vrot.slane %v1191_v46, 11 }
  0xc9   :  { %6393 = vmatpush3.bf16.msra.mxu0 %v6619_v55  ;;  %v1040_v38 = vsel %vm7611_vm6, %v1031_v57, %v1039_v60  ;;  %v5747_v55 = vcombine.low %v886_v59, %v889_v61  ;;  %v1210_v57 = vrot.slane %v1208_v50, 4  ;;  %v1211_v60 = vrot.slane %v7774_v5, 7  ;;  %v147_v5 = vld [vmem:[#allocation3 + $0x8] sm:$0x6] }
  0xca   :  { %6394 = vmatprep.subr.bf16.mxu0 %v6620_v10  ;;  %v5756_v1 = vcombine.low %v1030_v62, %v1040_v38  ;;  %v6655_v62 = vld [vmem:[#allocation11 + $0x84] ss:$8 sps:$4 sm:$0xff]   ;;  %v6653_v38 = vld [vmem:[#allocation11 + $0x80] ss:$8 sps:$4 sm:$0xff]  }
  0xcb   :  { %v1212_v59 = vsel %vm7778_vm11, %v1210_v57, %v1211_v60  ;;  %1618 = vmatprep.subr.bf16.mxu1 %v6655_v62 }
  0xcc   :  { %1619 = vmatpush1.bf16.msra.mxu1 %v6653_v38 }
  0xcd   :  { %6395 = vmatpush3.bf16.msra.mxu0 %v6620_v10  ;;  %v1044_v10 = vrot.slane %v1042_v56, 6  ;;  %v148_v56 = vsel %vm7624_vm9, 0, %v147_v5 }
  0xce   :  { %6400 = vmatprep.subr.bf16.mxu0 %v6621_v52  ;;  %149 = vst [vmem:[#allocation3 + $0x8] sm:$0x6] %v148_v56 }
  0xcf   :  { %v1048_v19 = vor.u32 %v1047_v12, %v1044_v10  ;;  %v6664_v10 = vld [vmem:[#allocation11 + $0xb4] ss:$8 sps:$4 sm:$0xff]   ;;  %v6662_v12 = vld [vmem:[#allocation11 + $0xb0] ss:$8 sps:$4 sm:$0xff]  }
  0xd0   :  { %6397 = vmatmul.mubr.bf16.vlgmr.msra.gmra.mrb[0].mxu0 %v5735_v26 }
  0xd1   :  { %6401 = vmatpush3.bf16.msra.mxu0 %v6621_v52  ;;  %6416 = vmatprep.mubr.bf16.mxu0 %v5746_v20  ;;  %v1061_v52 = vrot.slane %v1059_v15, 7  ;;  %v1049_v26 = vrot.slane %v1048_v19, 4  ;;  %v6665_v15 = vld [vmem:[#allocation11 + $0xc0] ss:$8 sps:$4 sm:$0xff]  }
  0xd2   :  { %6402 = vmatprep.subr.bf16.mxu0 %v6622_v58 }
  0xd3   :  { %v1062_v20 = vor.u32 %v1061_v52, %v1058_v21  ;;  %v1053_v14 = vsel %vm7611_vm6, %v1049_v26, %v7712_v11  ;;  %v6668_v21 = vld [vmem:[#allocation11 + $0xd0] ss:$8 sps:$4 sm:$0xff]   ;;  %v6671_v26 = vld [vmem:[#allocation11 + $0xe0] ss:$8 sps:$4 sm:$0xff]  }
  0xd5   :  { %6403 = vmatpush3.bf16.msra.mxu0 %v6622_v58  ;;  %v1054_v58 = vrot.slane %v7712_v11, 4  ;;  %v6644_v11 = vld [vmem:[#allocation8 + $0x198] sm:$0xff]  }
  0xd6   :  { %6404 = vmatprep.subr.bf16.mxu0 %v6623_v28 }
  0xd9   :  { %6405 = vmatpush3.bf16.msra.mxu0 %v6623_v28  ;;  %v5766_v28 = vrot.slane %v1190_v22, 11  ;;  %v6673_v22 = vld [vmem:[#allocation11 + $0xe4] ss:$8 sps:$4 sm:$0xff]  }
  0xda   :  { %6406 = vmatprep.subr.bf16.mxu0 %v6624_v30 }
  0xdb   :  { %v1202_v36 = vsel %vm7778_vm11, %v5766_v28, %v1201_v24  ;;  %v6679_v28 = vld [vmem:[#allocation11 + $0x4] ss:$8 sps:$4 sm:$0xff]  }
  0xdd   :  { %6407 = vmatpush3.bf16.msra.mxu0 %v6624_v30  ;;  %v1203_v30 = vrot.slane %v1201_v24, 4 }
  0xde   :  { %6408 = vmatprep.subr.bf16.mxu0 %v6625_v31 }
  0xe1   :  { %6409 = vmatpush3.bf16.msra.mxu0 %v6625_v31  ;;  %v1204_v31 = vrot.slane %v7758_v34, 7 }
  0xe2   :  { %6410 = vmatprep.subr.bf16.mxu0 %v6626_v9 }
  0xe3   :  { %v1205_v37 = vsel %vm7778_vm11, %v1203_v30, %v1204_v31  ;;  %v5778_v31 = vld [vmem:[%s8337_s2] ss:$0 sm:$0xff] }
  0xe4   :  { %v5768_v34 = vcombine.low %v1202_v36, %v1205_v37 }
  0xe5   :  { %6411 = vmatpush3.bf16.msra.mxu0 %v6626_v9  ;;  %v1063_v9 = vsel %vm7611_vm6, %v1054_v58, %v1062_v20  ;;  %v6676_v58 = vld [vmem:[#allocation11 + $0xf4] ss:$8 sps:$4 sm:$0xff]   ;;  %v6674_v20 = vld [vmem:[#allocation11 + $0xf0] ss:$8 sps:$4 sm:$0xff]  }
  0xe6   :  { %6412 = vmatprep.subr.bf16.mxu0 %v6627_v41  ;;  %v5757_v39 = vcombine.low %v1053_v14, %v1063_v9  ;;  %v5779_v9 = vld [vmem:[#allocation10] ss:$0 sm:$0xff] }
  0xe9   :  { %6413 = vmatpush3.bf16.msra.mxu0 %v6627_v41  ;;  %v6642_v41 = vld [vmem:[#allocation8 + $0x190] sm:$0xff]  }
  0xea   :  { %6414 = vmatprep.subr.bf16.mxu0 %v6628_v48 }
  0xed   :  { %6415 = vmatpush3.bf16.msra.mxu0 %v6628_v48  ;;  %v145_v48 = vsel %vm7601_vm3, 0, %v144_v44 }
  0xee   :  { %6420 = vmatprep.subr.bf16.mxu0 %v6629_v33  ;;  %146 = vst [vmem:[#allocation3 + $0xc] sm:$0x3] %v145_v48 }
  0xf0   :  { %6417 = vmatmul.mubr.bf16.vlgmr.msra.gmra.mrb[0].mxu0 %v5747_v55  ;;  %v141_v55 = vld [vmem:[#allocation3] sm:$0x3] }
  0xf1   :  { %6421 = vmatpush3.bf16.msra.mxu0 %v6629_v33  ;;  %6436 = vmatprep.mubr.bf16.mxu0 %v5756_v1  ;;  %v1209_v33 = vsel %vm7778_vm11, %v5767_v54, %v1208_v50  ;;  %v6658_v1 = vld [vmem:[#allocation11 + $0x94] ss:$8 sps:$4 sm:$0xff]  }
  0xf2   :  { %6422 = vmatprep.subr.bf16.mxu0 %v6630_v63  ;;  %v5769_v61 = vcombine.low %v1209_v33, %v1212_v59  ;;  %1620 = vmatprep.subr.bf16.mxu1 %v6658_v1 }
  0xf5   :  { %6423 = vmatpush3.bf16.msra.mxu0 %v6630_v63  ;;  %v142_v63 = vsel %vm7601_vm3, 0, %v141_v55 }
  0xf6   :  { %6424 = vmatprep.subr.bf16.mxu0 %v6631_v2  ;;  %143 = vst [vmem:[#allocation3] sm:$0x3] %v142_v63 }
  0xf9   :  { %6425 = vmatpush3.bf16.msra.mxu0 %v6631_v2  ;;  %v6656_v2 = vld [vmem:[#allocation11 + $0x90] ss:$8 sps:$4 sm:$0xff]  }
  0xfa   :  { %6426 = vmatprep.subr.bf16.mxu0 %v6632_v4  ;;  %1621 = vmatpush1.bf16.msra.mxu1 %v6656_v2 }
  0xfb   :  { %1622 = vmatprep.subr.bf16.mxu1 %v6661_v6 }
  0xfd   :  { %6427 = vmatpush3.bf16.msra.mxu0 %v6632_v4  ;;  %v150_v4 = vld [vmem:[#allocation3 + $0x14] sm:$0x6] }
  0xfe   :  { %6428 = vmatprep.subr.bf16.mxu0 %v6633_v53 }
 0x101   :  { %6429 = vmatpush3.bf16.msra.mxu0 %v6633_v53  ;;  %v151_v53 = vsel %vm7624_vm9, 0, %v150_v4 }
 0x102   :  { %6430 = vmatprep.subr.bf16.mxu0 %v6634_v8  ;;  %152 = vst [vmem:[#allocation3 + $0x14] sm:$0x6] %v151_v53 }
 0x105   :  { %6431 = vmatpush3.bf16.msra.mxu0 %v6634_v8  ;;  %v6659_v8 = vld [vmem:[#allocation11 + $0xa0] ss:$8 sps:$4 sm:$0xff]  }
 0x106   :  { %6432 = vmatprep.subr.bf16.mxu0 %v6635_v18  ;;  %1623 = vmatpush1.bf16.msra.mxu1 %v6659_v8  ;;  %v1436_v8 = vld [vmem:[#allocation3 + $0xc] sm:$0xe] }
 0x107   :  { %1624 = vmatprep.subr.bf16.mxu1 %v6664_v10 }
 0x109   :  { %6433 = vmatpush3.bf16.msra.mxu0 %v6635_v18  ;;  %v6670_v18 = vld [vmem:[#allocation11 + $0xd4] ss:$8 sps:$4 sm:$0xff]  }
 0x10a   :  { %6434 = vmatprep.subr.bf16.mxu0 %v6636_v25  ;;  %1625 = vmatpush1.bf16.msra.mxu1 %v6662_v12 }
 0x10b   :  { %1626 = vmatprep.subr.bf16.mxu1 %v6667_v13 }
 0x10d   :  { %6435 = vmatpush3.bf16.msra.mxu0 %v6636_v25 }
 0x10e   :  { %6440 = vmatprep.subr.bf16.mxu0 %v6638_v35  ;;  %1627 = vmatpush1.bf16.msra.mxu1 %v6665_v15 }
 0x10f   :  { %1628 = vmatprep.subr.bf16.mxu1 %v6670_v18 }
 0x110   :  { %6437 = vmatmul.mubr.bf16.vlgmr.msra.gmra.mrb[0].mxu0 %v5757_v39 }
 0x111   :  { %6441 = vmatpush3.bf16.msra.mxu0 %v6638_v35  ;;  %6456 = vmatprep.mubr.bf16.mxu0 %v5768_v34 }
 0x112   :  { %6442 = vmatprep.subr.bf16.mxu0 %v6640_v29  ;;  %1629 = vmatpush1.bf16.msra.mxu1 %v6668_v21 }
 0x113   :  { %1630 = vmatprep.subr.bf16.mxu1 %v6673_v22 }
 0x115   :  { %6443 = vmatpush3.bf16.msra.mxu0 %v6640_v29 }
 0x116   :  { %6444 = vmatprep.subr.bf16.mxu0 %v6642_v41  ;;  %1631 = vmatpush1.bf16.msra.mxu1 %v6671_v26 }
 0x117   :  { %1632 = vmatprep.subr.bf16.mxu1 %v6676_v58 }
 0x119   :  { %6445 = vmatpush3.bf16.msra.mxu0 %v6642_v41 }
 0x11a   :  { %6446 = vmatprep.subr.bf16.mxu0 %v6644_v11  ;;  %1633 = vmatpush1.bf16.msra.mxu1 %v6674_v20 }
 0x11b   :  { %1763 = vmatprep.subr.bf16.mxu1 %v6679_v28 }
 0x11d   :  { %6447 = vmatpush3.bf16.msra.mxu0 %v6644_v11 }
 0x11e   :  { %6448 = vmatprep.subr.bf16.mxu0 %v6646_v42 }
 0x121   :  { %6449 = vmatpush3.bf16.msra.mxu0 %v6646_v42 }
 0x122   :  { %6450 = vmatprep.subr.bf16.mxu0 %v6648_v43 }
 0x125   :  { %6451 = vmatpush3.bf16.msra.mxu0 %v6648_v43 }
 0x126   :  { %6452 = vmatprep.subr.bf16.mxu0 %v6650_v45 }
 0x129   :  { %6453 = vmatpush3.bf16.msra.mxu0 %v6650_v45 }
 0x12a   :  { %6454 = vmatprep.subr.bf16.mxu0 %v6652_v51 }
 0x12d   :  { %6455 = vmatpush3.bf16.msra.mxu0 %v6652_v51 }
 0x130   :  { %6457 = vmatmul.mubr.bf16.vlgmr.msra.gmra.mrb[0].mxu0 %v5769_v61 }
 0x18e   :  { %v6338_v19 = vpop.f32.mrb[0].mxu1 }
 0x18f   :  { %v419_v52 = vpop.f32.mrb[1].mxu1 }
 0x190   :  { %v6339_v24 = vpop.f32.mrb[2].mxu1 }
 0x191   :  { %v422_v25 = vpop.f32.mrb[3].mxu1 }
 0x203   :  { %v6458_v30 = vpop.f32.mrb[0].mxu0 }
 0x204   :  { %v6460_v35 = vadd.f32 %v6458_v30, %v6338_v19  ;;  %v1320_v14 = vpop.f32.mrb[1].mxu0  ;;  %v1429_v19 = vld [vmem:[#allocation3] sm:$0xe] }
 0x205   :  { %v6461_v36 = vadd.f32 %v1320_v14, %v419_v52  ;;  %v6459_v37 = vpop.f32.mrb[2].mxu0 }
 0x206   :  { %v1348_v39 = vmul.f32 %v6460_v35, %v5778_v31  ;;  %v6462_v29 = vadd.f32 %v6459_v37, %v6339_v24  ;;  %v1323_v34 = vpop.f32.mrb[3].mxu0 }
 0x207   :  { %v1346_v41 = vmul.f32 %v6461_v36, %v5778_v31  ;;  %v6463_v11 = vadd.f32 %v1323_v34, %v422_v25  ;;  %v1433_v36 = vld [vmem:[#allocation3 + $0x8] sm:$0x3] }
 0x208   :  { %v1359_v42 = vadd.f32 %v5779_v9, %v1348_v39  ;;  %v1349_v43 = vmul.f32 %v6462_v29, %v5778_v31 }
 0x209   :  { %v1357_v44 = vadd.f32 %v5779_v9, %v1346_v41  ;;  %v1347_v45 = vmul.f32 %v6463_v11, %v5778_v31  ;;  %v1440_v31 = vld [vmem:[#allocation3 + $0x14] sm:$0x3] }
 0x20a   :  { %vm1363_vm13 = vcmp.gt.f32.partialorder %v1359_v42, 0.0  ;;  %v1367_v46 = vmul.f32 0.2, %v1359_v42  ;;  %v1360_v48 = vadd.f32 %v5779_v9, %v1349_v43 }
 0x20b   :  { %vm1361_vm14 = vcmp.gt.f32.partialorder %v1357_v44, 0.0  ;;  %v1365_v49 = vmul.f32 0.2, %v1357_v44  ;;  %v1358_v50 = vadd.f32 %v5779_v9, %v1347_v45 }
 0x20c   :  { %v1371_v51 = vsel %vm1363_vm13, %v1359_v42, %v1367_v46  ;;  %vm1364_vm1 = vcmp.gt.f32.partialorder %v1360_v48, 0.0  ;;  %v1368_v54 = vmul.f32 0.2, %v1360_v48  ;;  %vm155_vm13 = vmand %vm153_vm5, %vm154_vm0 }
 0x20d   :  { %v6244_v57 = vpack.c.bf16 %v1371_v51, %v1371_v51  ;;  %v1369_v60 = vsel %vm1361_vm14, %v1357_v44, %v1365_v49  ;;  %vm1362_vm2 = vcmp.gt.f32.partialorder %v1358_v50, 0.0  ;;  %v1366_v33 = vmul.f32 0.2, %v1358_v50 }
 0x20e   :  { %v6242_v59 = vpack.c.bf16 %v1369_v60, %v1369_v60  ;;  %v1372_v61 = vsel %vm1364_vm1, %v1360_v48, %v1368_v54  ;;  %vm164_vm14 = vsmask.f32 7958  ;;  %vm7996_vm1 = vmor %vm155_vm13, %vm7601_vm3 }
 0x20f   :  { %v1405_v62 = vshrl.u32 %v6244_v57, 16  ;;  %v1408_v38 = vshll.u32 %v6244_v57, 16  ;;  %v6245_v55 = vpack.c.bf16 %v1372_v61, %v1372_v61  ;;  %v1370_v63 = vsel %vm1362_vm2, %v1358_v50, %v1366_v33  ;;  %vm165_vm2 = vmand %vm163_vm10, %vm164_vm14 }
 0x210   :  { %v1386_v1 = vshrl.u32 %v6242_v59, 16  ;;  %v1389_v2 = vshll.u32 %v6242_v59, 16  ;;  %v6243_v4 = vpack.c.bf16 %v1370_v63, %v1370_v63 }
 0x211   :  { %v1407_v53 = vrot.slane %v1405_v62, 6  ;;  %v1410_v5 = vrot.slane %v1408_v38, 7  ;;  %v1414_v56 = vshrl.u32 %v6245_v55, 16  ;;  %v1417_v6 = vshll.u32 %v6245_v55, 16 }
 0x212   :  { %v1388_v10 = vrot.slane %v1386_v1, 6  ;;  %v1391_v12 = vrot.slane %v1389_v2, 7  ;;  %v1395_v13 = vshrl.u32 %v6243_v4, 16  ;;  %v1398_v15 = vshll.u32 %v6243_v4, 16 }
 0x213   :  { %v1411_v18 = vor.u32 %v1410_v5, %v1407_v53  ;;  %v1416_v21 = vrot.slane %v1414_v56, 6  ;;  %v1419_v52 = vrot.slane %v1417_v6, 7 }
 0x214   :  { %v1392_v22 = vor.u32 %v1391_v12, %v1388_v10  ;;  %v1397_v24 = vrot.slane %v1395_v13, 6  ;;  %v1400_v25 = vrot.slane %v1398_v15, 7 }
 0x215   :  { %v1412_v26 = vrot.slane %v1411_v18, 4  ;;  %v1437_v58 = vsel %vm7617_vm8, %v1411_v18, %v1436_v8  ;;  %v1420_v20 = vor.u32 %v1419_v52, %v1416_v21 }
 0x216   :  { %1438 = vst [vmem:[#allocation3 + $0xc] sm:$0xe] %v1437_v58  ;;  %v1393_v28 = vrot.slane %v1392_v22, 4  ;;  %v1430_v30 = vsel %vm7617_vm8, %v1392_v22, %v1429_v19  ;;  %v1401_v35 = vor.u32 %v1400_v25, %v1397_v24 }
 0x217   :  { %1431 = vst [vmem:[#allocation3] sm:$0xe] %v1430_v30  ;;  %v1421_v14 = vsel %vm7611_vm6, %v1412_v26, %v1420_v20  ;;  %v1422_v9 = vrot.slane %v1420_v20, 4  ;;  %v6677_v26 = vld [vmem:[#allocation11] ss:$8 sps:$4 sm:$0xff]  }
 0x218   :  { %1439 = vst [vmem:[#allocation3 + $0x10] sm:$0xf] %v1421_v14  ;;  %v1402_v37 = vsel %vm7611_vm6, %v1393_v28, %v1401_v35  ;;  %v1403_v39 = vrot.slane %v1401_v35, 4  ;;  %v6682_v35 = vld [vmem:[#allocation11 + $0x14] ss:$8 sps:$4 sm:$0xff]  }
 0x219   :  { %v1441_v29 = vsel %vm7601_vm3, %v1422_v9, %v1440_v31  ;;  %1432 = vst [vmem:[#allocation3 + $0x4] sm:$0xf] %v1402_v37 }
 0x21a   :  { %1442 = vst [vmem:[#allocation3 + $0x14] sm:$0x3] %v1441_v29  ;;  %v1434_v34 = vsel %vm7601_vm3, %v1403_v39, %v1433_v36 }
 0x21b   :  { %1435 = vst [vmem:[#allocation3 + $0x8] sm:$0x3] %v1434_v34 }
 0x21d   :  { %v7822_v41 = vld [vmem:[#allocation3 + $0xc] sm:$0xf] }
 0x21e   :  { %v7824_v11 = vld [vmem:[#allocation3] sm:$0xf]  ;;  %v1490_v46 = vshrl.u32 %v7822_v41, 16  ;;  %v1493_v48 = vshll.u32 %v7822_v41, 16  ;;  %v7852_v8 = vld [vmem:[#allocation3 + $0xc] sm:$0xe] }
 0x21f   :  { %v1466_v42 = vshrl.u32 %v7824_v11, 16  ;;  %v1469_v43 = vshll.u32 %v7824_v11, 16  ;;  %v7828_v44 = vld [vmem:[#allocation3 + $0x10] sm:$0xf]  ;;  %v7850_v1 = vld [vmem:[#allocation3] sm:$0xe] }
 0x220   :  { %v7830_v45 = vld [vmem:[#allocation3 + $0x4] sm:$0xf]  ;;  %v7835_v49 = vshll.u32 %v7828_v44, 16  ;;  %v7838_v50 = vshrl.u32 %v7828_v44, 16  ;;  %v1492_v4 = vrot.slane %v1490_v46, 4  ;;  %v1495_v53 = vrot.slane %v1493_v48, 5 }
 0x221   :  { %v1468_v51 = vrot.slane %v1466_v42, 4  ;;  %v1471_v54 = vrot.slane %v1469_v43, 5  ;;  %v7841_v57 = vshll.u32 %v7830_v45, 16  ;;  %v7844_v60 = vshrl.u32 %v7830_v45, 16  ;;  %v1464_v2 = vld [vmem:[#allocation3 + $0x14] sm:$0x1] }
 0x222   :  { %v1463_v33 = vld [vmem:[#allocation3 + $0x8] sm:$0x1]  ;;  %v1501_v59 = vrot.slane %v7835_v49, 5  ;;  %v1505_v61 = vrot.slane %v7838_v50, 4  ;;  %v5820_v12 = vrot.slane %v7850_v1, 9  ;;  %v1824_v13 = vrot.slane %v7830_v45, 5 }
 0x223   :  { %v1472_v62 = vor.u32 %v1471_v54, %v1468_v51  ;;  %v1477_v38 = vrot.slane %v7841_v57, 5  ;;  %v1481_v55 = vrot.slane %v7844_v60, 4  ;;  %v1485_v63 = vshll.u32 %v1463_v33, 16  ;;  %v6680_v43 = vld [vmem:[#allocation11 + $0x10] ss:$8 sps:$4 sm:$0xff]  }
 0x224   :  { %v1506_v6 = vor.u32 %v1505_v61, %v1501_v59  ;;  %v1827_v10 = vrot.slane %v1463_v33, 5  ;;  %v1831_v19 = vrot.slane %v7828_v44, 5  ;;  %v1834_v21 = vrot.slane %v1464_v2, 5  ;;  %v6685_v33 = vld [vmem:[#allocation11 + $0x24] ss:$8 sps:$4 sm:$0xff]  }
 0x225   :  { %v1473_v5 = vrot.slane %v1472_v62, 4  ;;  %v1482_v56 = vor.u32 %v1481_v55, %v1477_v38  ;;  %v1487_v18 = vrot.slane %v1485_v63, 5  ;;  %v1496_v52 = vor.u32 %v1495_v53, %v1492_v4  ;;  %v6683_v55 = vld [vmem:[#allocation11 + $0x20] ss:$8 sps:$4 sm:$0xff]   ;;  %v6688_v4 = vld [vmem:[#allocation11 + $0x34] ss:$8 sps:$4 sm:$0xff]  }
 0x226   :  { %v1509_v22 = vshll.u32 %v1464_v2, 16  ;;  %v1826_v24 = vrot.slane %v1824_v13, 4  ;;  %v5821_v25 = vrot.slane %v7852_v8, 9  ;;  %v1507_v28 = vrot.slane %v1506_v6, 4  ;;  %v6686_v53 = vld [vmem:[#allocation11 + $0x30] ss:$8 sps:$4 sm:$0xff]  }
 0x227   :  { %v1483_v15 = vrot.slane %v1482_v56, 4  ;;  %v1478_v58 = vsel %vm7721_vm4, %v1473_v5, %v1477_v38  ;;  %v1833_v30 = vrot.slane %v1831_v19, 4  ;;  %v7864_v14 = vsel %vm7655_vm12, %v5820_v12, %v1824_v13  ;;  %v6691_v5 = vld [vmem:[#allocation11 + $0x44] ss:$8 sps:$4 sm:$0xff]   ;;  %v6694_v12 = vld [vmem:[#allocation11 + $0x54] ss:$8 sps:$4 sm:$0xff]  }
 0x228   :  { %v7868_v9 = vsel %vm7655_vm12, %v1826_v24, %v1827_v10  ;;  %v7872_v36 = vsel %vm7655_vm12, %v5821_v25, %v1831_v19  ;;  %v2013_v29 = vrot.slane %v7844_v60, 5  ;;  %v2014_v34 = vrot.slane %v7841_v57, 6  ;;  %v6689_v10 = vld [vmem:[#allocation11 + $0x40] ss:$8 sps:$4 sm:$0xff]   ;;  %v6705_v25 = vld [vmem:[#allocation11 + $0x110] ss:$8 sps:$4 sm:$0xff]  }
 0x229   :  { %v1488_v20 = vsel %vm7721_vm4, %v1483_v15, %v1487_v18  ;;  %v5822_v37 = vcombine.low %v7864_v14, %v7868_v9  ;;  %v7878_v39 = vsel %vm7655_vm12, %v1833_v30, %v1834_v21  ;;  %v1497_v46 = vrot.slane %v1496_v52, 4  ;;  %v6692_v18 = vld [vmem:[#allocation11 + $0x50] ss:$8 sps:$4 sm:$0xff]   ;;  %v6697_v21 = vld [vmem:[#allocation11 + $0x64] ss:$8 sps:$4 sm:$0xff]  }
 0x22a   :  { %v5784_v31 = vcombine.low %v1478_v58, %v1488_v20  ;;  %v5823_v42 = vcombine.low %v7872_v36, %v7878_v39  ;;  %v1511_v48 = vrot.slane %v1509_v22, 5  ;;  %v7885_v51 = vor.u32 %v2014_v34, %v2013_v29  ;;  %v6698_v52 = vld [vmem:[#allocation11 + $0x70] ss:$8 sps:$4 sm:$0xff]   ;;  %v6704_v22 = vld [vmem:[#allocation11 + $0x104] ss:$8 sps:$4 sm:$0xff]  }
 0x22b   :  { %v2036_v54 = vrot.slane %v7838_v50, 5  ;;  %v2037_v61 = vrot.slane %v7835_v49, 6  ;;  %v1502_v63 = vsel %vm7721_vm4, %v1497_v46, %v1501_v59  ;;  %v2413_v56 = vrot.slane %v7844_v60, 6  ;;  %v6695_v60 = vld [vmem:[#allocation11 + $0x60] ss:$8 sps:$4 sm:$0xff]  }
 0x22c   :  { %1651 = vmatmul.mubr.bf16.vlgmr.msra.gmra.mrb[4].mxu1 %v5784_v31  ;;  %v1512_v62 = vsel %vm7721_vm4, %v1507_v28, %v1511_v48  ;;  %v2414_v6 = vrot.slane %v7841_v57, 7  ;;  %v2436_v59 = vrot.slane %v7838_v50, 6  ;;  %v2437_v15 = vrot.slane %v7835_v49, 7  ;;  %v6700_v57 = vld [vmem:[#allocation11 + $0x74] ss:$8 sps:$4 sm:$0xff]  }
 0x22d   :  { %1764 = vmatpush1.bf16.msra.mxu1 %v6677_v26  ;;  %1660 = vmatprep.mubr.bf16.mxu1 %v7433_v23  ;;  %v7891_v38 = vor.u32 %v2037_v61, %v2036_v54  ;;  %v5785_v2 = vcombine.low %v1502_v63, %v1512_v62  ;;  %v6702_v24 = vld [vmem:[#allocation11 + $0x100] ss:$8 sps:$4 sm:$0xff]   ;;  %v5802_v50 = vcombine.low %v7824_v11, %v7830_v45  ;;  %v6707_v49 = vld [vmem:[#allocation11 + $0x114] ss:$8 sps:$4 sm:$0xff]   ;;  %v6711_v26 = vld [vmem:[#allocation11 + $0x124] ss:$8 sps:$4 sm:$0xff]  }
 0x22e   :  { %1765 = vmatprep.subr.bf16.mxu1 %v6682_v35  ;;  %v7898_v13 = vor.u32 %v2414_v6, %v2413_v56  ;;  %v7902_v19 = vor.u32 %v2437_v15, %v2436_v59  ;;  %v6709_v58 = vld [vmem:[#allocation11 + $0x120] ss:$8 sps:$4 sm:$0xff]   ;;  %v5803_v20 = vcombine.low %v7822_v41, %v7828_v44  ;;  %v6714_v28 = vld [vmem:[#allocation11 + $0x134] ss:$8 sps:$4 sm:$0xff]   ;;  %v6712_v30 = vld [vmem:[#allocation11 + $0x130] ss:$8 sps:$4 sm:$0xff]  }
 0x22f   :  { %v6717_v11 = vld [vmem:[#allocation11 + $0x144] ss:$8 sps:$4 sm:$0xff]   ;;  %v6715_v31 = vld [vmem:[#allocation11 + $0x140] ss:$8 sps:$4 sm:$0xff]   ;;  %v6720_v35 = vld [vmem:[#allocation11 + $0x154] ss:$8 sps:$4 sm:$0xff]  }
 0x230   :  { %v6718_v29 = vld [vmem:[#allocation11 + $0x150] ss:$8 sps:$4 sm:$0xff]   ;;  %v6723_v34 = vld [vmem:[#allocation11 + $0x164] ss:$8 sps:$4 sm:$0xff]   ;;  %v6726_v41 = vld [vmem:[#allocation11 + $0x174] ss:$8 sps:$4 sm:$0xff]  }
 0x231   :  { %1766 = vmatpush1.bf16.msra.mxu1 %v6680_v43  ;;  %v6721_v43 = vld [vmem:[#allocation11 + $0x160] ss:$8 sps:$4 sm:$0xff]   ;;  %v6724_v46 = vld [vmem:[#allocation11 + $0x170] ss:$8 sps:$4 sm:$0xff]   ;;  %v6729_v48 = vld [vmem:[#allocation11 + $0x184] ss:$8 sps:$4 sm:$0xff]  }
 0x232   :  { %1767 = vmatprep.subr.bf16.mxu1 %v6685_v33  ;;  %v6727_v54 = vld [vmem:[#allocation11 + $0x180] ss:$8 sps:$4 sm:$0xff]   ;;  %v6732_v33 = vld [vmem:[#allocation11 + $0x194] ss:$8 sps:$4 sm:$0xff]   ;;  %v6730_v61 = vld [vmem:[#allocation11 + $0x190] ss:$8 sps:$4 sm:$0xff]  }
 0x233   :  { %v6735_v62 = vld [vmem:[#allocation11 + $0x1a4] ss:$8 sps:$4 sm:$0xff]   ;;  %v6738_v63 = vld [vmem:[#allocation11 + $0x1b4] ss:$8 sps:$4 sm:$0xff]   ;;  %v6739_v6 = vld [vmem:[#allocation11 + $0x1c0] ss:$8 sps:$4 sm:$0xff]  }
 0x234   :  { %1661 = vmatmul.mubr.bf16.gmra.mrb[8].mxu1 %v5785_v2  ;;  %v6823_v2 = vld [vmem:[#allocation13 + $0x200] ss:$8 sps:$4 sm:$0xff]   ;;  %v6831_v14 = vld [vmem:[#allocation13 + $0x214] ss:$8 sps:$4 sm:$0xff]   ;;  %v6741_v9 = vld [vmem:[#allocation11 + $0x1c4] ss:$8 sps:$4 sm:$0xff]  }
 0x235   :  { %1768 = vmatpush1.bf16.msra.mxu1 %v6683_v55  ;;  %1795 = vmatprep.mubr.bf16.mxu1 %v7433_v23  ;;  %v6733_v55 = vld [vmem:[#allocation11 + $0x1a0] ss:$8 sps:$4 sm:$0xff]   ;;  %v6837_v56 = vld [vmem:[#allocation13 + $0x224] ss:$8 sps:$4 sm:$0xff]   ;;  %v2005_v36 = vshrl.u32 %v7850_v1, 16  ;;  %v2008_v39 = vshll.u32 %v7850_v1, 16 }
 0x236   :  { %1769 = vmatprep.subr.bf16.mxu1 %v6688_v4  ;;  %v6825_v4 = vld [vmem:[#allocation13 + $0x204] ss:$8 sps:$4 sm:$0xff]   ;;  %v6835_v59 = vld [vmem:[#allocation13 + $0x220] ss:$8 sps:$4 sm:$0xff]   ;;  %v6843_v15 = vld [vmem:[#allocation13 + $0x234] ss:$8 sps:$4 sm:$0xff]  }
 0x237   :  { %3757 = vmatprep.subr.bf16.mxu0 %v6825_v4  ;;  %v6841_v1 = vld [vmem:[#allocation13 + $0x230] ss:$8 sps:$4 sm:$0xff]  }
 0x238   :  { %3758 = vmatpush1.bf16.msra.mxu0 %v6823_v2 }
 0x239   :  { %1770 = vmatpush1.bf16.msra.mxu1 %v6686_v53  ;;  %v6736_v53 = vld [vmem:[#allocation11 + $0x1b0] ss:$8 sps:$4 sm:$0xff]   ;;  %3759 = vmatprep.subr.bf16.mxu0 %v6831_v14  ;;  %v2040_v14 = vrot.slane %v7891_v38, 4 }
 0x23a   :  { %1771 = vmatprep.subr.bf16.mxu1 %v6691_v5  ;;  %v7918_v5 = vld [vmem:[#allocation3 + $0x8] sm:$0x3] }
 0x23d   :  { %1772 = vmatpush1.bf16.msra.mxu1 %v6689_v10  ;;  %v2019_v10 = vshrl.u32 %v7918_v5, 16 }
 0x23e   :  { %1773 = vmatprep.subr.bf16.mxu1 %v6694_v12  ;;  %v2022_v12 = vshll.u32 %v7918_v5, 16 }
 0x241   :  { %1774 = vmatpush1.bf16.msra.mxu1 %v6692_v18  ;;  %v6742_v18 = vld [vmem:[#allocation11 + $0x1d0] ss:$8 sps:$4 sm:$0xff]  }
 0x242   :  { %1775 = vmatprep.subr.bf16.mxu1 %v6697_v21  ;;  %v2007_v21 = vrot.slane %v2005_v36, 5 }
 0x245   :  { %1776 = vmatpush1.bf16.msra.mxu1 %v6695_v60  ;;  %v2010_v60 = vrot.slane %v2008_v39, 6 }
 0x246   :  { %1777 = vmatprep.subr.bf16.mxu1 %v6700_v57  ;;  %v6747_v57 = vld [vmem:[#allocation11 + $0x1e4] ss:$8 sps:$4 sm:$0xff]  }
 0x249   :  { %1778 = vmatpush1.bf16.msra.mxu1 %v6698_v52  ;;  %v2021_v52 = vrot.slane %v2019_v10, 5 }
 0x24a   :  { %1941 = vmatprep.subr.bf16.mxu1 %v6704_v22  ;;  %v2024_v22 = vrot.slane %v2022_v12, 6  ;;  %v6757_v12 = vld [vmem:[#allocation11 + $0x220] ss:$8 sps:$4 sm:$0xff]  }
 0x24c   :  { %1796 = vmatmul.mubr.bf16.vlgmr.msra.gmra.mrb[4].mxu1 %v5802_v50  ;;  %v6849_v50 = vld [vmem:[#allocation13 + $0x244] ss:$8 sps:$4 sm:$0xff]  }
 0x24d   :  { %1942 = vmatpush1.bf16.msra.mxu1 %v6702_v24  ;;  %1805 = vmatprep.mubr.bf16.mxu1 %v7433_v23  ;;  %v7924_v24 = vld [vmem:[#allocation3 + $0x14] sm:$0x3] }
 0x24e   :  { %1943 = vmatprep.subr.bf16.mxu1 %v6707_v49  ;;  %v6745_v49 = vld [vmem:[#allocation11 + $0x1e0] ss:$8 sps:$4 sm:$0xff]  }
 0x251   :  { %1944 = vmatpush1.bf16.msra.mxu1 %v6705_v25  ;;  %v2011_v25 = vor.u32 %v2010_v60, %v2007_v21  ;;  %v6765_v21 = vld [vmem:[#allocation11 + $0x244] ss:$8 sps:$4 sm:$0xff]   ;;  %v6763_v60 = vld [vmem:[#allocation11 + $0x240] ss:$8 sps:$4 sm:$0xff]  }
 0x252   :  { %1945 = vmatprep.subr.bf16.mxu1 %v6711_v26  ;;  %v2028_v26 = vshrl.u32 %v7852_v8, 16 }
 0x254   :  { %1806 = vmatmul.mubr.bf16.gmra.mrb[8].mxu1 %v5803_v20  ;;  %v6750_v20 = vld [vmem:[#allocation11 + $0x1f4] ss:$8 sps:$4 sm:$0xff]  }
 0x255   :  { %1946 = vmatpush1.bf16.msra.mxu1 %v6709_v58  ;;  %1973 = vmatprep.mubr.bf16.mxu1 %v7433_v23  ;;  %v2031_v58 = vshll.u32 %v7852_v8, 16  ;;  %v6753_v8 = vld [vmem:[#allocation11 + $0x204] ss:$8 sps:$4 sm:$0xff]  }
 0x256   :  { %1947 = vmatprep.subr.bf16.mxu1 %v6714_v28  ;;  %v2017_v28 = vrot.slane %v7885_v51, 4 }
 0x259   :  { %1948 = vmatpush1.bf16.msra.mxu1 %v6712_v30  ;;  %v2025_v30 = vor.u32 %v2024_v22, %v2021_v52  ;;  %v6766_v52 = vld [vmem:[#allocation11 + $0x250] ss:$8 sps:$4 sm:$0xff]   ;;  %v2224_v22 = vrot.slane %v7830_v45, 6 }
 0x25a   :  { %1949 = vmatprep.subr.bf16.mxu1 %v6717_v11  ;;  %v2042_v11 = vshrl.u32 %v7924_v24, 16 }
 0x25d   :  { %1950 = vmatpush1.bf16.msra.mxu1 %v6715_v31  ;;  %v2045_v31 = vshll.u32 %v7924_v24, 16 }
 0x25e   :  { %1951 = vmatprep.subr.bf16.mxu1 %v6720_v35  ;;  %v6847_v35 = vld [vmem:[#allocation13 + $0x240] ss:$8 sps:$4 sm:$0xff]  }
 0x261   :  { %1952 = vmatpush1.bf16.msra.mxu1 %v6718_v29  ;;  %v6855_v29 = vld [vmem:[#allocation13 + $0x254] ss:$8 sps:$4 sm:$0xff]  }
 0x262   :  { %1953 = vmatprep.subr.bf16.mxu1 %v6723_v34  ;;  %v6748_v34 = vld [vmem:[#allocation11 + $0x1f0] ss:$8 sps:$4 sm:$0xff]  }
 0x265   :  { %1954 = vmatpush1.bf16.msra.mxu1 %v6721_v43  ;;  %v2012_v43 = vrot.slane %v2011_v25, 4  ;;  %v2227_v25 = vrot.slane %v7918_v5, 6 }
 0x266   :  { %1955 = vmatprep.subr.bf16.mxu1 %v6726_v41  ;;  %v2030_v41 = vrot.slane %v2028_v26, 5  ;;  %v2216_v26 = vld [vmem:[#allocation3] sm:$0xc] }
 0x269   :  { %1956 = vmatpush1.bf16.msra.mxu1 %v6724_v46  ;;  %v2033_v46 = vrot.slane %v2031_v58, 6  ;;  %v6772_v58 = vld [vmem:[#allocation11 + $0x270] ss:$8 sps:$4 sm:$0xff]  }
 0x26a   :  { %2155 = vmatprep.subr.bf16.mxu1 %v6729_v48  ;;  %v2026_v48 = vsel %vm7687_vm15, %v2017_v28, %v2025_v30  ;;  %v5858_v28 = vrot.slane %v2216_v26, 10 }
 0x26b   :  { %v2034_v2 = vor.u32 %v2033_v46, %v2030_v41  ;;  %v2217_v41 = vld [vmem:[#allocation3 + $0xc] sm:$0xc]  ;;  %v6778_v46 = vld [vmem:[#allocation11 + $0x290] ss:$8 sps:$4 sm:$0xff]  }
 0x26c   :  { %1974 = vmatmul.mubr.bf16.vlgmr.msra.gmra.mrb[4].mxu1 %v5822_v37  ;;  %v6829_v37 = vld [vmem:[#allocation13 + $0x210] ss:$8 sps:$4 sm:$0xff]  }
 0x26d   :  { %2156 = vmatpush1.bf16.msra.mxu1 %v6727_v54  ;;  %1983 = vmatprep.mubr.bf16.mxu1 %v7433_v23  ;;  %v2044_v54 = vrot.slane %v2042_v11, 5  ;;  %v2035_v36 = vrot.slane %v2034_v2, 4  ;;  %v2231_v11 = vrot.slane %v7828_v44, 6  ;;  %v7958_v2 = vld [vmem:[#allocation3 + $0x8] sm:$0x7] }
 0x26e   :  { %2157 = vmatprep.subr.bf16.mxu1 %v6732_v33  ;;  %3760 = vmatpush1.bf16.msra.mxu0 %v6829_v37  ;;  %v2047_v33 = vrot.slane %v2045_v31, 6  ;;  %v6859_v37 = vld [vmem:[#allocation13 + $0x260] ss:$8 sps:$4 sm:$0xff]   ;;  %v2225_v31 = vsel %vm7740_vm7, %v5858_v28, %v2224_v22 }
 0x26f   :  { %3761 = vmatprep.subr.bf16.mxu0 %v6837_v56  ;;  %v6867_v56 = vld [vmem:[#allocation13 + $0x274] ss:$8 sps:$4 sm:$0xff]   ;;  %v2039_v10 = vsel %vm7687_vm15, %v2035_v36, %v7891_v38  ;;  %v6771_v38 = vld [vmem:[#allocation11 + $0x264] ss:$8 sps:$4 sm:$0xff]   ;;  %v2233_v5 = vrot.slane %v2231_v11, 4 }
 0x271   :  { %2158 = vmatpush1.bf16.msra.mxu1 %v6730_v61  ;;  %v6853_v61 = vld [vmem:[#allocation13 + $0x250] ss:$8 sps:$4 sm:$0xff]  }
 0x272   :  { %2159 = vmatprep.subr.bf16.mxu1 %v6735_v62  ;;  %3762 = vmatpush1.bf16.msra.mxu0 %v6835_v59  ;;  %v6861_v62 = vld [vmem:[#allocation13 + $0x264] ss:$8 sps:$4 sm:$0xff]  }
 0x273   :  { %3763 = vmatprep.subr.bf16.mxu0 %v6843_v15  ;;  %v6762_v15 = vld [vmem:[#allocation11 + $0x234] ss:$8 sps:$4 sm:$0xff]  }
 0x274   :  { %1984 = vmatmul.mubr.bf16.gmra.mrb[8].mxu1 %v5823_v42  ;;  %v6744_v42 = vld [vmem:[#allocation11 + $0x1d4] ss:$8 sps:$4 sm:$0xff]  }
 0x275   :  { %2160 = vmatpush1.bf16.msra.mxu1 %v6733_v55  ;;  %2187 = vmatprep.mubr.bf16.mxu1 %v7433_v23  ;;  %v2016_v55 = vsel %vm7687_vm15, %v2012_v43, %v7885_v51  ;;  %v6759_v51 = vld [vmem:[#allocation11 + $0x224] ss:$8 sps:$4 sm:$0xff]   ;;  %v2234_v43 = vrot.slane %v7924_v24, 6  ;;  %v6786_v24 = vld [vmem:[#allocation11 + $0x2b4] ss:$8 sps:$4 sm:$0xff]  }
 0x276   :  { %2161 = vmatprep.subr.bf16.mxu1 %v6738_v63  ;;  %3764 = vmatpush1.bf16.msra.mxu0 %v6841_v1  ;;  %v6751_v63 = vld [vmem:[#allocation11 + $0x200] ss:$8 sps:$4 sm:$0xff]   ;;  %v5840_v4 = vcombine.low %v2016_v55, %v2026_v48  ;;  %v5859_v48 = vrot.slane %v2217_v41, 10  ;;  %v6784_v55 = vld [vmem:[#allocation11 + $0x2b0] ss:$8 sps:$4 sm:$0xff]  }
 0x277   :  { %3765 = vmatprep.subr.bf16.mxu0 %v6849_v50  ;;  %v6769_v1 = vld [vmem:[#allocation11 + $0x260] ss:$8 sps:$4 sm:$0xff]   ;;  %v6774_v50 = vld [vmem:[#allocation11 + $0x274] ss:$8 sps:$4 sm:$0xff]  }
 0x279   :  { %2162 = vmatpush1.bf16.msra.mxu1 %v6736_v53  ;;  %v6756_v53 = vld [vmem:[#allocation11 + $0x214] ss:$8 sps:$4 sm:$0xff]  }
 0x27a   :  { %2163 = vmatprep.subr.bf16.mxu1 %v6741_v9  ;;  %3766 = vmatpush1.bf16.msra.mxu0 %v6847_v35  ;;  %v2048_v9 = vor.u32 %v2047_v33, %v2044_v54  ;;  %v6775_v35 = vld [vmem:[#allocation11 + $0x280] ss:$8 sps:$4 sm:$0xff]   ;;  %v2235_v54 = vsel %vm7740_vm7, %v2233_v5, %v2234_v43  ;;  %v2232_v33 = vsel %vm7740_vm7, %v5859_v48, %v2231_v11  ;;  %v6802_v43 = vld [vmem:[#allocation11 + $0x310] ss:$8 sps:$4 sm:$0xff]  }
 0x27b   :  { %3767 = vmatprep.subr.bf16.mxu0 %v6855_v29  ;;  %v6799_v11 = vld [vmem:[#allocation11 + $0x300] ss:$8 sps:$4 sm:$0xff]  }
 0x27c   :  { %v2049_v39 = vsel %vm7687_vm15, %v2040_v14, %v2048_v9  ;;  %v2408_v14 = vshll.u32 %v2216_v26, 16  ;;  %v6792_v9 = vld [vmem:[#allocation11 + $0x2d4] ss:$8 sps:$4 sm:$0xff]   ;;  %v6805_v48 = vld [vmem:[#allocation11 + $0x320] ss:$8 sps:$4 sm:$0xff]  }
 0x27d   :  { %2164 = vmatpush1.bf16.msra.mxu1 %v6739_v6  ;;  %v6754_v6 = vld [vmem:[#allocation11 + $0x210] ss:$8 sps:$4 sm:$0xff]   ;;  %v5841_v59 = vcombine.low %v2039_v10, %v2049_v39  ;;  %v6795_v39 = vld [vmem:[#allocation11 + $0x2e4] ss:$8 sps:$4 sm:$0xff]  }
 0x27e   :  { %2165 = vmatprep.subr.bf16.mxu1 %v6744_v42  ;;  %3768 = vmatpush1.bf16.msra.mxu0 %v6853_v61  ;;  %v6865_v42 = vld [vmem:[#allocation13 + $0x270] ss:$8 sps:$4 sm:$0xff]   ;;  %v6781_v61 = vld [vmem:[#allocation11 + $0x2a0] ss:$8 sps:$4 sm:$0xff]  }
 0x27f   :  { %3769 = vmatprep.subr.bf16.mxu0 %v6861_v62  ;;  %v5861_v62 = vcombine.low %v2232_v33, %v2235_v54  ;;  %v6810_v33 = vld [vmem:[#allocation11 + $0x334] ss:$8 sps:$4 sm:$0xff]  }
 0x281   :  { %2166 = vmatpush1.bf16.msra.mxu1 %v6742_v18  ;;  %v6760_v18 = vld [vmem:[#allocation11 + $0x230] ss:$8 sps:$4 sm:$0xff]  }
 0x282   :  { %2167 = vmatprep.subr.bf16.mxu1 %v6747_v57  ;;  %3770 = vmatpush1.bf16.msra.mxu0 %v6859_v37  ;;  %v6768_v57 = vld [vmem:[#allocation11 + $0x254] ss:$8 sps:$4 sm:$0xff]   ;;  %v2419_v37 = vshrl.u32 %v7958_v2, 16 }
 0x283   :  { %3771 = vmatprep.subr.bf16.mxu0 %v6867_v56  ;;  %v2422_v56 = vshll.u32 %v7958_v2, 16 }
 0x285   :  { %2168 = vmatpush1.bf16.msra.mxu1 %v6745_v49  ;;  %v2226_v49 = vrot.slane %v2224_v22, 4  ;;  %v2424_v10 = vrot.slane %v2422_v56, 7  ;;  %v2616_v56 = vld [vmem:[#allocation3] sm:$0x8] }
 0x286   :  { %2169 = vmatprep.subr.bf16.mxu1 %v6750_v20  ;;  %3772 = vmatpush1.bf16.msra.mxu0 %v6865_v42  ;;  %v6777_v20 = vld [vmem:[#allocation11 + $0x284] ss:$8 sps:$4 sm:$0xff]   ;;  %v2421_v42 = vrot.slane %v2419_v37, 6  ;;  %v2627_v37 = vrot.slane %v7958_v2, 7 }
 0x287   :  { %v2228_v30 = vsel %vm7740_vm7, %v2226_v49, %v2227_v25 }
 0x288   :  { %v5860_v29 = vcombine.low %v2225_v31, %v2228_v30 }
 0x289   :  { %2170 = vmatpush1.bf16.msra.mxu1 %v6748_v34  ;;  %v6780_v34 = vld [vmem:[#allocation11 + $0x294] ss:$8 sps:$4 sm:$0xff]  }
 0x28a   :  { %2341 = vmatprep.subr.bf16.mxu1 %v6753_v8  ;;  %v6783_v8 = vld [vmem:[#allocation11 + $0x2a4] ss:$8 sps:$4 sm:$0xff]  }
 0x28c   :  { %2188 = vmatmul.mubr.bf16.vlgmr.msra.gmra.mrb[4].mxu1 %v5840_v4  ;;  %v6787_v4 = vld [vmem:[#allocation11 + $0x2c0] ss:$8 sps:$4 sm:$0xff]  }
 0x28d   :  { %2342 = vmatpush1.bf16.msra.mxu1 %v6751_v63  ;;  %2197 = vmatprep.mubr.bf16.mxu1 %v7433_v23  ;;  %v6789_v63 = vld [vmem:[#allocation11 + $0x2c4] ss:$8 sps:$4 sm:$0xff]  }
 0x28e   :  { %2343 = vmatprep.subr.bf16.mxu1 %v6756_v53  ;;  %v2405_v53 = vshrl.u32 %v2216_v26, 16  ;;  %v6801_v26 = vld [vmem:[#allocation11 + $0x304] ss:$8 sps:$4 sm:$0xff]  }
 0x290   :  { %v2407_v36 = vrot.slane %v2405_v53, 6  ;;  %v6817_v53 = vld [vmem:[#allocation11 + $0x360] ss:$8 sps:$4 sm:$0xff]  }
 0x291   :  { %2344 = vmatpush1.bf16.msra.mxu1 %v6754_v6  ;;  %v6790_v6 = vld [vmem:[#allocation11 + $0x2d0] ss:$8 sps:$4 sm:$0xff]  }
 0x292   :  { %2345 = vmatprep.subr.bf16.mxu1 %v6759_v51  ;;  %v2410_v51 = vrot.slane %v2408_v14, 7  ;;  %v6822_v14 = vld [vmem:[#allocation11 + $0x374] ss:$8 sps:$4 sm:$0xff]  }
 0x294   :  { %2198 = vmatmul.mubr.bf16.gmra.mrb[8].mxu1 %v5841_v59  ;;  %v6793_v59 = vld [vmem:[#allocation11 + $0x2e0] ss:$8 sps:$4 sm:$0xff]  }
 0x295   :  { %2346 = vmatpush1.bf16.msra.mxu1 %v6757_v12  ;;  %2373 = vmatprep.mubr.bf16.mxu1 %v7433_v23  ;;  %v7962_v12 = vld [vmem:[#allocation3 + $0x14] sm:$0x7] }
 0x296   :  { %2347 = vmatprep.subr.bf16.mxu1 %v6762_v15  ;;  %v2411_v15 = vor.u32 %v2410_v51, %v2407_v36  ;;  %v2445_v22 = vshll.u32 %v7962_v12, 16  ;;  %v6828_v36 = vld [vmem:[#allocation13 + $0x104] ss:$8 sps:$4 sm:$0xff]   ;;  %v5896_v51 = vrot.slane %v2616_v56, 11 }
 0x297   :  { %v6900_v56 = vld [vmem:[#allocation13 + $0x1c4] ss:$8 sps:$4 sm:$0xff]  }
 0x298   :  { %v2447_v28 = vrot.slane %v2445_v22, 7  ;;  %v6838_v22 = vld [vmem:[#allocation13 + $0x120] ss:$8 sps:$4 sm:$0xff]  }
 0x299   :  { %2348 = vmatpush1.bf16.msra.mxu1 %v6760_v18  ;;  %v2428_v18 = vshrl.u32 %v2217_v41, 16 }
 0x29a   :  { %2349 = vmatprep.subr.bf16.mxu1 %v6765_v21  ;;  %v2431_v21 = vshll.u32 %v2217_v41, 16 }
 0x29b   :  { %v2430_v49 = vrot.slane %v2428_v18, 6  ;;  %v2634_v18 = vrot.slane %v7962_v12, 7 }
 0x29c   :  { %v2433_v25 = vrot.slane %v2431_v21, 7  ;;  %v2617_v21 = vld [vmem:[#allocation3 + $0xc] sm:$0x8] }
 0x29d   :  { %2350 = vmatpush1.bf16.msra.mxu1 %v6763_v60  ;;  %v6798_v60 = vld [vmem:[#allocation11 + $0x2f4] ss:$8 sps:$4 sm:$0xff]  }
 0x29e   :  { %2351 = vmatprep.subr.bf16.mxu1 %v6768_v57  ;;  %v2417_v57 = vrot.slane %v7898_v13, 4  ;;  %v2434_v31 = vor.u32 %v2433_v25, %v2430_v49  ;;  %v6850_v49 = vld [vmem:[#allocation13 + $0x140] ss:$8 sps:$4 sm:$0xff]   ;;  %v6858_v25 = vld [vmem:[#allocation13 + $0x154] ss:$8 sps:$4 sm:$0xff]  }
 0x2a0   :  { %v2435_v41 = vrot.slane %v2434_v31, 4  ;;  %v170_v31 = vld [vmem:[#allocation4 + $0x28] sm:$0x66] }
 0x2a1   :  { %2352 = vmatpush1.bf16.msra.mxu1 %v6766_v52  ;;  %v2425_v52 = vor.u32 %v2424_v10, %v2421_v42  ;;  %v2631_v42 = vrot.slane %v7828_v44, 7  ;;  %v6826_v10 = vld [vmem:[#allocation13 + $0x100] ss:$8 sps:$4 sm:$0xff]   ;;  %v5897_v44 = vrot.slane %v2617_v21, 11  ;;  %v6918_v21 = vld [vmem:[#allocation13 + $0x1f4] ss:$8 sps:$4 sm:$0xff]  }
 0x2a2   :  { %2353 = vmatprep.subr.bf16.mxu1 %v6771_v38  ;;  %v2442_v38 = vshrl.u32 %v7962_v12, 16  ;;  %v6846_v12 = vld [vmem:[#allocation13 + $0x134] ss:$8 sps:$4 sm:$0xff]  }
 0x2a3   :  { %v2633_v2 = vrot.slane %v2631_v42, 4 }
 0x2a5   :  { %2354 = vmatpush1.bf16.msra.mxu1 %v6769_v1  ;;  %v6796_v1 = vld [vmem:[#allocation11 + $0x2f0] ss:$8 sps:$4 sm:$0xff]  }
 0x2a6   :  { %2355 = vmatprep.subr.bf16.mxu1 %v6774_v50  ;;  %v2412_v50 = vrot.slane %v2411_v15, 4  ;;  %v6834_v15 = vld [vmem:[#allocation13 + $0x114] ss:$8 sps:$4 sm:$0xff]  }
 0x2a8   :  { %v2416_v30 = vsel %vm7611_vm6, %v2412_v50, %v7898_v13  ;;  %v2439_v13 = vsel %vm7611_vm6, %v2435_v41, %v7902_v19  ;;  %v6844_v50 = vld [vmem:[#allocation13 + $0x130] ss:$8 sps:$4 sm:$0xff]   ;;  %v6873_v41 = vld [vmem:[#allocation13 + $0x284] ss:$8 sps:$4 sm:$0xff]  }
 0x2a9   :  { %2356 = vmatpush1.bf16.msra.mxu1 %v6772_v58  ;;  %v2426_v58 = vsel %vm7611_vm6, %v2417_v57, %v2425_v52  ;;  %v6840_v57 = vld [vmem:[#allocation13 + $0x124] ss:$8 sps:$4 sm:$0xff]   ;;  %v2635_v52 = vsel %vm7778_vm11, %v2633_v2, %v2634_v18  ;;  %3773 = vmatprep.subr.bf16.mxu0 %v6873_v41  ;;  %v6910_v2 = vld [vmem:[#allocation13 + $0x1e0] ss:$8 sps:$4 sm:$0xff]   ;;  %v6913_v18 = vld [vmem:[#allocation13 + $0x2f0] ss:$8 sps:$4 sm:$0xff]  }
 0x2aa   :  { %2555 = vmatprep.subr.bf16.mxu1 %v6777_v20  ;;  %v2444_v20 = vrot.slane %v2442_v38, 6  ;;  %v2632_v38 = vsel %vm7778_vm11, %v5897_v44, %v2631_v42  ;;  %v6909_v42 = vld [vmem:[#allocation13 + $0x2e4] ss:$8 sps:$4 sm:$0xff]  }
 0x2ab   :  { %v6924_v44 = vld [vmem:[#allocation13 + $0x4] ss:$8 sps:$4 sm:$0xff]  }
 0x2ac   :  { %2374 = vmatmul.mubr.bf16.vlgmr.msra.gmra.mrb[4].mxu1 %v5860_v29  ;;  %v6804_v29 = vld [vmem:[#allocation11 + $0x314] ss:$8 sps:$4 sm:$0xff]   ;;  %v2448_v5 = vor.u32 %v2447_v28, %v2444_v20  ;;  %v6862_v20 = vld [vmem:[#allocation13 + $0x160] ss:$8 sps:$4 sm:$0xff]  }
 0x2ad   :  { %2556 = vmatpush1.bf16.msra.mxu1 %v6775_v35  ;;  %2383 = vmatprep.mubr.bf16.mxu1 %v7433_v23  ;;  %v5878_v35 = vcombine.low %v2416_v30, %v2426_v58  ;;  %v6864_v58 = vld [vmem:[#allocation13 + $0x164] ss:$8 sps:$4 sm:$0xff]   ;;  %v157_v28 = vld [vmem:[#allocation4] sm:$0x33] }
 0x2ae   :  { %2557 = vmatprep.subr.bf16.mxu1 %v6780_v34  ;;  %v2440_v34 = vrot.slane %v7902_v19, 4  ;;  %v2624_v19 = vrot.slane %v7830_v45, 7 }
 0x2b0   :  { %v2625_v45 = vsel %vm7778_vm11, %v5896_v51, %v2624_v19  ;;  %v6901_v51 = vld [vmem:[#allocation13 + $0x2d0] ss:$8 sps:$4 sm:$0xff]  }
 0x2b1   :  { %2558 = vmatpush1.bf16.msra.mxu1 %v6778_v46  ;;  %v6807_v46 = vld [vmem:[#allocation11 + $0x324] ss:$8 sps:$4 sm:$0xff]  }
 0x2b2   :  { %2559 = vmatprep.subr.bf16.mxu1 %v6783_v8  ;;  %v2449_v8 = vsel %vm7611_vm6, %v2440_v34, %v2448_v5  ;;  %v6870_v5 = vld [vmem:[#allocation13 + $0x174] ss:$8 sps:$4 sm:$0xff]  }
 0x2b3   :  { %v5879_v54 = vcombine.low %v2439_v13, %v2449_v8  ;;  %v6879_v8 = vld [vmem:[#allocation13 + $0x294] ss:$8 sps:$4 sm:$0xff]  }
 0x2b4   :  { %2384 = vmatmul.mubr.bf16.gmra.mrb[8].mxu1 %v5861_v62  ;;  %v6813_v62 = vld [vmem:[#allocation11 + $0x344] ss:$8 sps:$4 sm:$0xff]   ;;  %v160_v13 = vld [vmem:[#allocation4 + $0x18] sm:$0x33] }
 0x2b5   :  { %2560 = vmatpush1.bf16.msra.mxu1 %v6781_v61  ;;  %2587 = vmatprep.mubr.bf16.mxu1 %v7433_v23  ;;  %v6808_v61 = vld [vmem:[#allocation11 + $0x330] ss:$8 sps:$4 sm:$0xff]  }
 0x2b6   :  { %2561 = vmatprep.subr.bf16.mxu1 %v6786_v24  ;;  %v6811_v24 = vld [vmem:[#allocation11 + $0x340] ss:$8 sps:$4 sm:$0xff]  }
 0x2b9   :  { %2562 = vmatpush1.bf16.msra.mxu1 %v6784_v55  ;;  %v6816_v55 = vld [vmem:[#allocation11 + $0x354] ss:$8 sps:$4 sm:$0xff]  }
 0x2ba   :  { %2563 = vmatprep.subr.bf16.mxu1 %v6789_v63  ;;  %v6814_v63 = vld [vmem:[#allocation11 + $0x350] ss:$8 sps:$4 sm:$0xff]  }
 0x2bd   :  { %2564 = vmatpush1.bf16.msra.mxu1 %v6787_v4  ;;  %v6819_v4 = vld [vmem:[#allocation11 + $0x364] ss:$8 sps:$4 sm:$0xff]  }
 0x2be   :  { %2565 = vmatprep.subr.bf16.mxu1 %v6792_v9  ;;  %v2626_v9 = vrot.slane %v2624_v19, 4  ;;  %v6889_v19 = vld [vmem:[#allocation13 + $0x2b0] ss:$8 sps:$4 sm:$0xff]  }
 0x2c1   :  { %2566 = vmatpush1.bf16.msra.mxu1 %v6790_v6  ;;  %v6820_v6 = vld [vmem:[#allocation11 + $0x370] ss:$8 sps:$4 sm:$0xff]  }
 0x2c2   :  { %2567 = vmatprep.subr.bf16.mxu1 %v6795_v39  ;;  %v2628_v39 = vsel %vm7778_vm11, %v2626_v9, %v2627_v37  ;;  %vm166_vm11 = vmor %vm165_vm2, %vm7624_vm9  ;;  %v6892_v9 = vld [vmem:[#allocation13 + $0x1b0] ss:$8 sps:$4 sm:$0xff]   ;;  %v6895_v37 = vld [vmem:[#allocation13 + $0x2c0] ss:$8 sps:$4 sm:$0xff]  }
 0x2c3   :  { %v171_v34 = vsel %vm166_vm11, 0, %v170_v31 }
 0x2c4   :  { %172 = vst [vmem:[#allocation4 + $0x28] sm:$0x66] %v171_v34 }
 0x2c5   :  { %2568 = vmatpush1.bf16.msra.mxu1 %v6793_v59  ;;  %v5898_v59 = vcombine.low %v2625_v45, %v2628_v39  ;;  %v6906_v39 = vld [vmem:[#allocation13 + $0x1d4] ss:$8 sps:$4 sm:$0xff]   ;;  %v6904_v45 = vld [vmem:[#allocation13 + $0x1d0] ss:$8 sps:$4 sm:$0xff]  }
 0x2c6   :  { %2569 = vmatprep.subr.bf16.mxu1 %v6798_v60  ;;  %v6832_v60 = vld [vmem:[#allocation13 + $0x110] ss:$8 sps:$4 sm:$0xff]  }
 0x2c9   :  { %2570 = vmatpush1.bf16.msra.mxu1 %v6796_v1  ;;  %v5899_v1 = vcombine.low %v2632_v38, %v2635_v52  ;;  %v2804_v52 = vlaneseq }
 0x2ca   :  { %2741 = vmatprep.subr.bf16.mxu1 %v6801_v26  ;;  %v6856_v26 = vld [vmem:[#allocation13 + $0x150] ss:$8 sps:$4 sm:$0xff]  }
 0x2cb   :  { %v8008_v38 = vshrl.u32 %v2804_v52, 7 }
 0x2cc   :  { %2588 = vmatmul.mubr.bf16.vlgmr.msra.gmra.mrb[4].mxu1 %v5878_v35  ;;  %v158_v35 = vsel %vm7996_vm1, 0, %v157_v28 }
 0x2cd   :  { %2742 = vmatpush1.bf16.msra.mxu1 %v6799_v11  ;;  %2597 = vmatprep.mubr.bf16.mxu1 %v7433_v23  ;;  %v167_v11 = vld [vmem:[#allocation4 + $0x10] sm:$0x66]  ;;  %159 = vst [vmem:[#allocation4] sm:$0x33] %v158_v35 }
 0x2ce   :  { %2743 = vmatprep.subr.bf16.mxu1 %v6804_v29  ;;  %v168_v29 = vsel %vm166_vm11, 0, %v167_v11  ;;  %vm2930_vm11 = vcmask 1047557  }
 0x2cf   :  { %169 = vst [vmem:[#allocation4 + $0x10] sm:$0x66] %v168_v29  ;;  %vm8027_vm10 = vmand %vm2930_vm11, %vm164_vm14 }
 0x2d0   :  { %vm2932_vm13 = vmor %vm8027_vm10, %vm7617_vm8  ;;  %vm8372_vm8 = vnez %v8367_v17  ;;  %v6984_v17 = vld [vmem:[#allocation13 + $0xa4] ss:$8 sps:$4 sm:$0xff]   ;;  %vm5678_vm10 = vcmp.lt.s32.totalorder %v2804_v52, 512 }
 0x2d1   :  { %2744 = vmatpush1.bf16.msra.mxu1 %v6802_v43  ;;  %v6871_v43 = vld [vmem:[#allocation13 + $0x280] ss:$8 sps:$4 sm:$0xff]  }
 0x2d2   :  { %2745 = vmatprep.subr.bf16.mxu1 %v6807_v46  ;;  %v6876_v46 = vld [vmem:[#allocation13 + $0x184] ss:$8 sps:$4 sm:$0xff]   ;;  %3774 = vmatpush1.bf16.msra.mxu0 %v6871_v43 }
 0x2d3   :  { %3775 = vmatprep.subr.bf16.mxu0 %v6879_v8 }
 0x2d4   :  { %2598 = vmatmul.mubr.bf16.gmra.mrb[8].mxu1 %v5879_v54  ;;  %v161_v54 = vsel %vm7996_vm1, 0, %v160_v13 }
 0x2d5   :  { %2746 = vmatpush1.bf16.msra.mxu1 %v6805_v48  ;;  %2773 = vmatprep.mubr.bf16.mxu1 %v7433_v23  ;;  %v6874_v48 = vld [vmem:[#allocation13 + $0x180] ss:$8 sps:$4 sm:$0xff]   ;;  %162 = vst [vmem:[#allocation4 + $0x18] sm:$0x33] %v161_v54 }
 0x2d6   :  { %2747 = vmatprep.subr.bf16.mxu1 %v6810_v33  ;;  %3776 = vmatpush1.bf16.msra.mxu0 %v6877_v40  ;;  %v6880_v33 = vld [vmem:[#allocation13 + $0x190] ss:$8 sps:$4 sm:$0xff]  }
 0x2d9   :  { %2748 = vmatpush1.bf16.msra.mxu1 %v6808_v61  ;;  %v6882_v61 = vld [vmem:[#allocation13 + $0x194] ss:$8 sps:$4 sm:$0xff]  }
 0x2da   :  { %2749 = vmatprep.subr.bf16.mxu1 %v6813_v62  ;;  %v6883_v62 = vld [vmem:[#allocation13 + $0x2a0] ss:$8 sps:$4 sm:$0xff]  }
 0x2dd   :  { %2750 = vmatpush1.bf16.msra.mxu1 %v6811_v24  ;;  %v6885_v24 = vld [vmem:[#allocation13 + $0x2a4] ss:$8 sps:$4 sm:$0xff]  }
 0x2de   :  { %2751 = vmatprep.subr.bf16.mxu1 %v6816_v55  ;;  %v6888_v55 = vld [vmem:[#allocation13 + $0x1a4] ss:$8 sps:$4 sm:$0xff]   ;;  %3777 = vmatprep.subr.bf16.mxu0 %v6885_v24 }
 0x2df   :  { %3778 = vmatpush1.bf16.msra.mxu0 %v6883_v62 }
 0x2e1   :  { %2752 = vmatpush1.bf16.msra.mxu1 %v6814_v63  ;;  %v6891_v63 = vld [vmem:[#allocation13 + $0x2b4] ss:$8 sps:$4 sm:$0xff]  }
 0x2e2   :  { %2753 = vmatprep.subr.bf16.mxu1 %v6819_v4  ;;  %v6886_v4 = vld [vmem:[#allocation13 + $0x1a0] ss:$8 sps:$4 sm:$0xff]   ;;  %3779 = vmatprep.subr.bf16.mxu0 %v6891_v63 }
 0x2e3   :  { %3780 = vmatpush1.bf16.msra.mxu0 %v6889_v19 }
 0x2e5   :  { %2754 = vmatpush1.bf16.msra.mxu1 %v6817_v53  ;;  %v6894_v53 = vld [vmem:[#allocation13 + $0x1b4] ss:$8 sps:$4 sm:$0xff]  }
 0x2e6   :  { %2755 = vmatprep.subr.bf16.mxu1 %v6822_v14  ;;  %v6897_v14 = vld [vmem:[#allocation13 + $0x2c4] ss:$8 sps:$4 sm:$0xff]  }
 0x2e7   :  { %3781 = vmatprep.subr.bf16.mxu0 %v6897_v14 }
 0x2e8   :  { %3782 = vmatpush1.bf16.msra.mxu0 %v6895_v37 }
 0x2e9   :  { %2756 = vmatpush1.bf16.msra.mxu1 %v6820_v6  ;;  %v6903_v6 = vld [vmem:[#allocation13 + $0x2d4] ss:$8 sps:$4 sm:$0xff]  }
 0x2ea   :  { %3242 = vmatprep.subr.bf16.mxu1 %v6828_v36  ;;  %v6898_v36 = vld [vmem:[#allocation13 + $0x1c0] ss:$8 sps:$4 sm:$0xff]   ;;  %3783 = vmatprep.subr.bf16.mxu0 %v6903_v6 }
 0x2ec   :  { %2774 = vmatmul.mubr.bf16.vlgmr.msra.gmra.mrb[4].mxu1 %v5898_v59  ;;  %3784 = vmatpush1.bf16.msra.mxu0 %v6901_v51  ;;  %v6912_v59 = vld [vmem:[#allocation13 + $0x1e4] ss:$8 sps:$4 sm:$0xff]  }
 0x2ed   :  { %2783 = vmatprep.mubr.bf16.mxu1 %v7433_v23  ;;  %3243 = vmatpush1.bf16.msra.mxu1 %v6826_v10  ;;  %v6852_v23 = vld [vmem:[#allocation13 + $0x144] ss:$8 sps:$4 sm:$0xff]   ;;  %v6907_v10 = vld [vmem:[#allocation13 + $0x2e0] ss:$8 sps:$4 sm:$0xff]  }
 0x2ee   :  { %3244 = vmatprep.subr.bf16.mxu1 %v6834_v15  ;;  %3785 = vmatprep.subr.bf16.mxu0 %v6909_v42  ;;  %v6915_v15 = vld [vmem:[#allocation13 + $0x2f4] ss:$8 sps:$4 sm:$0xff]  }
 0x2f0   :  { %3786 = vmatpush1.bf16.msra.mxu0 %v6907_v10  ;;  %v2933_v10 = vld [vmem:[#allocation4] sm:$0xee] }
 0x2f1   :  { %3245 = vmatpush1.bf16.msra.mxu1 %v6832_v60  ;;  %3787 = vmatprep.subr.bf16.mxu0 %v6915_v15  ;;  %v6921_v60 = vld [vmem:[#allocation13 + $0x304] ss:$8 sps:$4 sm:$0xff]  }
 0x2f2   :  { %3246 = vmatprep.subr.bf16.mxu1 %v6840_v57  ;;  %v6916_v57 = vld [vmem:[#allocation13 + $0x1f0] ss:$8 sps:$4 sm:$0xff]  }
 0x2f4   :  { %2784 = vmatmul.mubr.bf16.gmra.mrb[8].mxu1 %v5899_v1  ;;  %3788 = vmatpush1.bf16.msra.mxu0 %v6913_v18  ;;  %v2802_v1 = vld [vmem:[%s8340_s5] sm:$0x3] }
 0x2f5   :  { %3247 = vmatpush1.bf16.msra.mxu1 %v6838_v22  ;;  %4075 = vmatprep.subr.bf16.mxu0 %v6921_v60  ;;  %v8011_v22 = vsub.s32 0, %v8008_v38 }
 0x2f6   :  { %3248 = vmatprep.subr.bf16.mxu1 %v6846_v12  ;;  %v8017_v12 = vsub.s32 1, %v8008_v38 }
 0x2f9   :  { %3249 = vmatpush1.bf16.msra.mxu1 %v6844_v50  ;;  %v2822_v50 = vld [vmem:[%s8341_s6] sm:$0x3] }
 0x2fa   :  { %3250 = vmatprep.subr.bf16.mxu1 %v6852_v23  ;;  %v2807_v23 = vrot.slane %v2802_v1, %v8011_v22 }
 0x2fd   :  { %3251 = vmatpush1.bf16.msra.mxu1 %v6850_v49  ;;  %v2811_v49 = vrot.slane %v2802_v1, %v8017_v12 }
 0x2fe   :  { %3252 = vmatprep.subr.bf16.mxu1 %v6858_v25  ;;  %v2827_v25 = vrot.slane %v2822_v50, %v8011_v22 }
 0x301   :  { %3253 = vmatpush1.bf16.msra.mxu1 %v6856_v26 }
 0x302   :  { %3254 = vmatprep.subr.bf16.mxu1 %v6864_v58  ;;  %v2831_v58 = vrot.slane %v2822_v50, %v8017_v12 }
 0x305   :  { %3255 = vmatpush1.bf16.msra.mxu1 %v6862_v20 }
 0x306   :  { %3256 = vmatprep.subr.bf16.mxu1 %v6870_v5 }
 0x309   :  { %3257 = vmatpush1.bf16.msra.mxu1 %v6868_v3 }
 0x30a   :  { %3258 = vmatprep.subr.bf16.mxu1 %v6876_v46 }
 0x30d   :  { %3259 = vmatpush1.bf16.msra.mxu1 %v6874_v48 }
 0x30e   :  { %3260 = vmatprep.subr.bf16.mxu1 %v6882_v61 }
 0x311   :  { %3261 = vmatpush1.bf16.msra.mxu1 %v6880_v33 }
 0x312   :  { %3262 = vmatprep.subr.bf16.mxu1 %v6888_v55 }
 0x315   :  { %3263 = vmatpush1.bf16.msra.mxu1 %v6886_v4 }
 0x316   :  { %3264 = vmatprep.subr.bf16.mxu1 %v6894_v53 }
 0x319   :  { %3265 = vmatpush1.bf16.msra.mxu1 %v6892_v9  ;;  %v2944_v9 = vld [vmem:[#allocation4 + $0x28] sm:$0x33] }
 0x31a   :  { %3266 = vmatprep.subr.bf16.mxu1 %v6900_v56 }
 0x31d   :  { %3267 = vmatpush1.bf16.msra.mxu1 %v6898_v36 }
 0x31e   :  { %3268 = vmatprep.subr.bf16.mxu1 %v6906_v39 }
 0x321   :  { %3269 = vmatpush1.bf16.msra.mxu1 %v6904_v45 }
 0x322   :  { %3270 = vmatprep.subr.bf16.mxu1 %v6912_v59 }
 0x325   :  { %3271 = vmatpush1.bf16.msra.mxu1 %v6910_v2 }
 0x326   :  { %3272 = vmatprep.subr.bf16.mxu1 %v6918_v21 }
 0x329   :  { %3273 = vmatpush1.bf16.msra.mxu1 %v6916_v57 }
 0x32a   :  { %3475 = vmatprep.subr.bf16.mxu1 %v6924_v44 }
 0x3bf   :  { %v2775_v26 = vpop.f32.mrb[4].mxu1 }
 0x3c0   :  { %v2814_v20 = vmul.f32 %v2807_v23, %v2775_v26  ;;  %v2777_v28 = vpop.f32.mrb[5].mxu1 }
 0x3c1   :  { %v2815_v11 = vmul.f32 %v2811_v49, %v2777_v28  ;;  %v2779_v31 = vpop.f32.mrb[6].mxu1  ;;  %v2937_v28 = vld [vmem:[#allocation4 + $0x10] sm:$0x33] }
 0x3c2   :  { %v2834_v35 = vadd.f32 %v2827_v25, %v2814_v20  ;;  %v2816_v29 = vmul.f32 %v2807_v23, %v2779_v31  ;;  %v2781_v34 = vpop.f32.mrb[7].mxu1 }
 0x3c3   :  { %v2835_v3 = vadd.f32 %v2831_v58, %v2815_v11  ;;  %v2817_v5 = vmul.f32 %v2811_v49, %v2781_v34 }
 0x3c4   :  { %vm2842_vm3 = vcmp.gt.f32.partialorder %v2834_v35, 0.0  ;;  %v2850_v43 = vmul.f32 0.2, %v2834_v35  ;;  %v2836_v41 = vadd.f32 %v2827_v25, %v2816_v29 }
 0x3c5   :  { %vm2843_vm9 = vcmp.gt.f32.partialorder %v2835_v3, 0.0  ;;  %v2851_v46 = vmul.f32 0.2, %v2835_v3  ;;  %v2837_v8 = vadd.f32 %v2831_v58, %v2817_v5 }
 0x3c6   :  { %v2858_v13 = vsel %vm2842_vm3, %v2834_v35, %v2850_v43  ;;  %vm2844_vm5 = vcmp.gt.f32.partialorder %v2836_v41, 0.0  ;;  %v2852_v48 = vmul.f32 0.2, %v2836_v41 }
 0x3c7   :  { %v2859_v54 = vsel %vm2843_vm9, %v2835_v3, %v2851_v46  ;;  %vm2845_vm0 = vcmp.gt.f32.partialorder %v2837_v8, 0.0  ;;  %v2853_v40 = vmul.f32 0.2, %v2837_v8  ;;  %v2785_v33 = vpop.f32.mrb[8].mxu1 }
 0x3c8   :  { %v6246_v61 = vpack.c.bf16 %v2859_v54, %v2858_v13  ;;  %v2860_v62 = vsel %vm2844_vm5, %v2836_v41, %v2852_v48  ;;  %v2818_v24 = vmul.f32 %v2807_v23, %v2785_v33  ;;  %v2787_v55 = vpop.f32.mrb[9].mxu1  ;;  %v2940_v48 = vld [vmem:[#allocation4 + $0x18] sm:$0xee] }
 0x3c9   :  { %v2861_v63 = vsel %vm2845_vm0, %v2837_v8, %v2853_v40  ;;  %v2819_v4 = vmul.f32 %v2811_v49, %v2787_v55  ;;  %v2789_v19 = vpop.f32.mrb[10].mxu1  ;;  %vm5229_vm0 = vcmask 1041409  }
 0x3ca   :  { %v2887_v53 = vshrl.u32 %v6246_v61, 16  ;;  %v2890_v14 = vshll.u32 %v6246_v61, 16  ;;  %v6247_v37 = vpack.c.bf16 %v2861_v63, %v2860_v62  ;;  %v2838_v56 = vadd.f32 %v2827_v25, %v2818_v24  ;;  %v2791_v6 = vpop.f32.mrb[11].mxu1 }
 0x3cb   :  { %v2839_v36 = vadd.f32 %v2831_v58, %v2819_v4  ;;  %v2820_v51 = vmul.f32 %v2807_v23, %v2789_v19  ;;  %v2821_v39 = vmul.f32 %v2811_v49, %v2791_v6 }
 0x3cc   :  { %v2889_v42 = vrot.slane %v2887_v53, 6  ;;  %v2892_v45 = vrot.slane %v2890_v14, 7  ;;  %v2896_v59 = vshrl.u32 %v6247_v37, 16  ;;  %v2899_v15 = vshll.u32 %v6247_v37, 16 }
 0x3cd   :  { %vm2846_vm14 = vcmp.gt.f32.partialorder %v2838_v56, 0.0  ;;  %v2854_v2 = vmul.f32 0.2, %v2838_v56  ;;  %vm2847_vm2 = vcmp.gt.f32.partialorder %v2839_v36, 0.0  ;;  %v2855_v18 = vmul.f32 0.2, %v2839_v36 }
 0x3ce   :  { %v2893_v21 = vor.u32 %v2892_v45, %v2889_v42  ;;  %v2898_v60 = vrot.slane %v2896_v59, 6  ;;  %v2901_v57 = vrot.slane %v2899_v15, 7  ;;  %v2840_v44 = vadd.f32 %v2827_v25, %v2820_v51 }
 0x3cf   :  { %v2862_v1 = vsel %vm2846_vm14, %v2838_v56, %v2854_v2  ;;  %v2863_v50 = vsel %vm2847_vm2, %v2839_v36, %v2855_v18  ;;  %v2841_v23 = vadd.f32 %v2831_v58, %v2821_v39 }
 0x3d0   :  { %v2894_v49 = vrot.slane %v2893_v21, 4  ;;  %v2934_v26 = vsel %vm2932_vm13, %v2893_v21, %v2933_v10  ;;  %v2902_v20 = vor.u32 %v2901_v57, %v2898_v60  ;;  %v6248_v11 = vpack.c.bf16 %v2863_v50, %v2862_v1 }
 0x3d1   :  { %2935 = vst [vmem:[#allocation4] sm:$0xee] %v2934_v26  ;;  %vm2848_vm3 = vcmp.gt.f32.partialorder %v2840_v44, 0.0  ;;  %v2856_v31 = vmul.f32 0.2, %v2840_v44  ;;  %vm2849_vm9 = vcmp.gt.f32.partialorder %v2841_v23, 0.0 }
 0x3d2   :  { %v2857_v35 = vmul.f32 0.2, %v2841_v23  ;;  %v8042_v25 = vsel %vm7611_vm6, %v2894_v49, %v2902_v20  ;;  %v2904_v58 = vrot.slane %v2902_v20, 4  ;;  %v2906_v29 = vshrl.u32 %v6248_v11, 16 }
 0x3d3   :  { %v2909_v34 = vshll.u32 %v6248_v11, 16  ;;  %v2864_v3 = vsel %vm2848_vm3, %v2840_v44, %v2856_v31  ;;  %v8045_v43 = vshll.u32 %v8042_v25, 16  ;;  %v3536_v54 = vrot.slane %v8042_v25, 5 }
 0x3d4   :  { %v2865_v5 = vsel %vm2849_vm9, %v2841_v23, %v2857_v35  ;;  %v2938_v41 = vsel %vm7996_vm1, %v2904_v58, %v2937_v28  ;;  %v2908_v46 = vrot.slane %v2906_v29, 6  ;;  %v8051_v40 = vshrl.u32 %v8042_v25, 16 }
 0x3d5   :  { %v2911_v8 = vrot.slane %v2909_v34, 7  ;;  %v6249_v13 = vpack.c.bf16 %v2865_v5, %v2864_v3  ;;  %2939 = vst [vmem:[#allocation4 + $0x10] sm:$0x33] %v2938_v41  ;;  %v2997_v24 = vrot.slane %v8045_v43, 5  ;;  %v3538_v39 = vrot.slane %v3536_v54, 4 }
 0x3d6   :  { %v3001_v55 = vrot.slane %v8051_v40, 4  ;;  %v3830_v15 = vrot.slane %v8045_v43, 6  ;;  %v3829_v57 = vrot.slane %v8051_v40, 5  ;;  %v6919_v3 = vld [vmem:[#allocation13 + $0x300] ss:$8 sps:$4 sm:$0xff]  }
 0x3d7   :  { %v2912_v33 = vor.u32 %v2911_v8, %v2908_v46  ;;  %v2915_v61 = vshrl.u32 %v6249_v13, 16  ;;  %v2918_v62 = vshll.u32 %v6249_v13, 16  ;;  %v6927_v8 = vld [vmem:[#allocation13 + $0x314] ss:$8 sps:$4 sm:$0xff]  }
 0x3d8   :  { %v3528_v14 = vld [vmem:[#allocation4] sm:$0xee]  ;;  %v3002_v42 = vor.u32 %v3001_v55, %v2997_v24  ;;  %v8079_v5 = vor.u32 %v3830_v15, %v3829_v57 }
 0x3d9   :  { %v2913_v63 = vrot.slane %v2912_v33, 4  ;;  %v2941_v4 = vsel %vm2932_vm13, %v2912_v33, %v2940_v48  ;;  %v2917_v19 = vrot.slane %v2915_v61, 6  ;;  %v2920_v53 = vrot.slane %v2918_v62, 7  ;;  %v8060_v37 = vld [vmem:[#allocation4] sm:$0xff] }
 0x3da   :  { %2942 = vst [vmem:[#allocation4 + $0x18] sm:$0xee] %v2941_v4  ;;  %v5992_v56 = vrot.slane %v3528_v14, 9  ;;  %v2986_v6 = vshrl.u32 %v8060_v37, 16  ;;  %v2989_v36 = vshll.u32 %v8060_v37, 16  ;;  %v3821_v45 = vshrl.u32 %v3528_v14, 16 }
 0x3db   :  { %v2921_v51 = vor.u32 %v2920_v53, %v2917_v19  ;;  %v3824_v59 = vshll.u32 %v3528_v14, 16  ;;  %v3003_v26 = vrot.slane %v3002_v42, 4  ;;  %v6922_v62 = vld [vmem:[#allocation13] ss:$8 sps:$4 sm:$0xff]   ;;  %v6930_v4 = vld [vmem:[#allocation13 + $0x14] ss:$8 sps:$4 sm:$0xff]  }
 0x3dc   :  { %v2988_v10 = vrot.slane %v2986_v6, 4  ;;  %v2991_v32 = vrot.slane %v2989_v36, 5  ;;  %v2983_v21 = vld [vmem:[#allocation4 + $0x10] sm:$0x11]  ;;  %v3537_v44 = vsel %vm7655_vm12, %v5992_v56, %v3536_v54  ;;  %v3823_v20 = vrot.slane %v3821_v45, 5 }
 0x3dd   :  { %v8067_v2 = vsel %vm7611_vm6, %v2913_v63, %v2921_v51  ;;  %v2923_v18 = vrot.slane %v2921_v51, 4  ;;  %v8069_v60 = vld [vmem:[#allocation4 + $0x10] sm:$0x33]  ;;  %v3539_v1 = vrot.slane %v2983_v21, 5  ;;  %v3005_v23 = vshll.u32 %v2983_v21, 16 }
 0x3de   :  { %v2992_v50 = vor.u32 %v2991_v32, %v2988_v10  ;;  %v3835_v28 = vshrl.u32 %v8069_v60, 16  ;;  %v3826_v58 = vrot.slane %v3824_v59, 6  ;;  %v3838_v54 = vshll.u32 %v8069_v60, 16  ;;  %v6925_v56 = vld [vmem:[#allocation13 + $0x310] ss:$8 sps:$4 sm:$0xff]  }
 0x3df   :  { %v2945_v49 = vsel %vm7996_vm1, %v2923_v18, %v2944_v9  ;;  %v3540_v11 = vsel %vm7655_vm12, %v3538_v39, %v3539_v1  ;;  %v3007_v35 = vrot.slane %v3005_v23, 5  ;;  %v3543_v55 = vrot.slane %v8067_v2, 5  ;;  %v6933_v39 = vld [vmem:[#allocation13 + $0x324] ss:$8 sps:$4 sm:$0xff]   ;;  %v6928_v32 = vld [vmem:[#allocation13 + $0x10] ss:$8 sps:$4 sm:$0xff]  }
 0x3e0   :  { %2946 = vst [vmem:[#allocation4 + $0x28] sm:$0x33] %v2945_v49  ;;  %v2993_v31 = vrot.slane %v2992_v50, 4  ;;  %v5994_v29 = vcombine.low %v3537_v44, %v3540_v11  ;;  %v5995_v34 = vcombine.high %v3537_v44, %v3540_v11  ;;  %v3837_v48 = vrot.slane %v3835_v28, 5  ;;  %v6936_v49 = vld [vmem:[#allocation13 + $0x24] ss:$8 sps:$4 sm:$0xff]  }
 0x3e1   :  { %v8081_v41 = vld [vmem:[#allocation4 + $0x18] sm:$0xff]  ;;  %v3008_v46 = vsel %vm7721_vm4, %v3003_v26, %v3007_v35  ;;  %v3840_v19 = vrot.slane %v3838_v54, 6  ;;  %v8094_v14 = vshll.u32 %v8067_v2, 16  ;;  %v8098_v51 = vshrl.u32 %v8067_v2, 16 }
 0x3e2   :  { %v2998_v30 = vsel %vm7721_vm4, %v2993_v31, %v2997_v24  ;;  %v8087_v13 = vld [vmem:[#allocation4 + $0x18] sm:$0xee]  ;;  %3789 = vmatprep.mubr.bf16.mxu0 %v5995_v34  ;;  %v3010_v63 = vshrl.u32 %v8081_v41, 16  ;;  %v3827_v24 = vor.u32 %v3826_v58, %v3823_v20  ;;  %v3013_v53 = vshll.u32 %v8081_v41, 16  ;;  %v6931_v20 = vld [vmem:[#allocation13 + $0x320] ss:$8 sps:$4 sm:$0xff]  }
 0x3e3   :  { %v5920_v33 = vcombine.low %v2998_v30, %v3008_v46  ;;  %v5921_v61 = vcombine.high %v2998_v30, %v3008_v46  ;;  %3790 = vmatmul.mubr.bf16.vlgmr.msra.gmra.mrb[4].mxu0 %v5994_v29  ;;  %v5993_v6 = vrot.slane %v8087_v13, 9  ;;  %v3833_v42 = vrot.slane %v8079_v5, 4  ;;  %v6939_v29 = vld [vmem:[#allocation13 + $0x334] ss:$8 sps:$4 sm:$0xff]   ;;  %v8115_v34 = vld [vmem:[#allocation4] sm:$0xcc] }
 0x3e4   :  { %4076 = vmatpush1.bf16.msra.mxu0 %v6919_v3  ;;  %v3012_v36 = vrot.slane %v3010_v63, 4  ;;  %v3841_v45 = vor.u32 %v3840_v19, %v3837_v48  ;;  %v3015_v9 = vrot.slane %v3013_v53, 5  ;;  %v3021_v10 = vrot.slane %v8094_v14, 5  ;;  %v6945_v19 = vld [vmem:[#allocation13 + $0x344] ss:$8 sps:$4 sm:$0xff]  }
 0x3e5   :  { %3274 = vmatprep.mubr.bf16.mxu1 %v5921_v61  ;;  %4077 = vmatprep.subr.bf16.mxu0 %v6927_v8  ;;  %v3545_v15 = vrot.slane %v3543_v55, 4  ;;  %v3025_v18 = vrot.slane %v8098_v51, 4  ;;  %v5956_v21 = vcombine.low %v8060_v37, %v8042_v25  ;;  %v5959_v57 = vcombine.high %v8081_v41, %v8067_v2  ;;  %v6934_v8 = vld [vmem:[#allocation13 + $0x20] ss:$8 sps:$4 sm:$0xff]  }
 0x3e6   :  { %3275 = vmatmul.mubr.bf16.vlgmr.msra.gmra.mrb[12].mxu1 %v5920_v33  ;;  %v3828_v1 = vrot.slane %v3827_v24, 4  ;;  %v3016_v50 = vor.u32 %v3015_v9, %v3012_v36  ;;  %v3544_v26 = vsel %vm7655_vm12, %v5993_v6, %v3543_v55  ;;  %v8113_v31 = vsel %vm7687_vm15, %v3833_v42, %v3841_v45  ;;  %v6942_v33 = vld [vmem:[#allocation13 + $0x34] ss:$8 sps:$4 sm:$0xff]   ;;  %v6937_v55 = vld [vmem:[#allocation13 + $0x330] ss:$8 sps:$4 sm:$0xff]  }
 0x3e7   :  { %3476 = vmatpush1.bf16.msra.mxu1 %v6922_v62  ;;  %v2984_v59 = vld [vmem:[#allocation4 + $0x28] sm:$0x11]  ;;  %v3026_v28 = vor.u32 %v3025_v18, %v3021_v10  ;;  %v4144_v48 = vrot.slane %v8042_v25, 6  ;;  %v6066_v63 = vrot.slane %v8115_v34, 10  ;;  %v6940_v6 = vld [vmem:[#allocation13 + $0x30] ss:$8 sps:$4 sm:$0xff]   ;;  %v5957_v45 = vcombine.high %v8060_v37, %v8042_v25 }
 0x3e8   :  { %3477 = vmatprep.subr.bf16.mxu1 %v6930_v4  ;;  %v3546_v44 = vrot.slane %v2984_v59, 5  ;;  %v3029_v23 = vshll.u32 %v2984_v59, 16  ;;  %4078 = vmatpush1.bf16.msra.mxu0 %v6925_v56  ;;  %v3017_v35 = vrot.slane %v3016_v50, 4  ;;  %v8121_v7 = vsel %vm7687_vm15, %v3828_v1, %v8079_v5  ;;  %v8130_v4 = vld [vmem:[#allocation4 + $0x18] sm:$0xcc] }
 0x3e9   :  { %4079 = vmatprep.subr.bf16.mxu0 %v6933_v39  ;;  %v3027_v46 = vrot.slane %v3026_v28, 4  ;;  %v6031_v61 = vcombine.high %v8121_v7, %v8113_v31  ;;  %v8132_v53 = vld [vmem:[#allocation4 + $0x28] sm:$0x33]  ;;  %v4437_v56 = vrot.slane %v8051_v40, 6  ;;  %v4146_v36 = vrot.slane %v4144_v48, 4 }
 0x3ea   :  { %v3547_v11 = vsel %vm7655_vm12, %v3545_v15, %v3546_v44  ;;  %v3031_v58 = vrot.slane %v3029_v23, 5  ;;  %v3022_v54 = vsel %vm7721_vm4, %v3017_v35, %v3021_v10  ;;  %v4147_v16 = vrot.slane %v8069_v60, 6  ;;  %v6948_v9 = vld [vmem:[#allocation13 + $0x44] ss:$8 sps:$4 sm:$0xff]   ;;  %v6951_v15 = vld [vmem:[#allocation13 + $0x354] ss:$8 sps:$4 sm:$0xff]  }
 0x3eb   :  { %v5997_v3 = vcombine.high %v3544_v26, %v3547_v11  ;;  %3478 = vmatpush1.bf16.msra.mxu1 %v6928_v32  ;;  %v5996_v30 = vcombine.low %v3544_v26, %v3547_v11  ;;  %v5958_v39 = vcombine.low %v8081_v41, %v8067_v2  ;;  %v4438_v42 = vrot.slane %v8045_v43, 7  ;;  %v6943_v32 = vld [vmem:[#allocation13 + $0x340] ss:$8 sps:$4 sm:$0xff]   ;;  %v6949_v28 = vld [vmem:[#allocation13 + $0x350] ss:$8 sps:$4 sm:$0xff]  }
 0x3ec   :  { %3479 = vmatprep.subr.bf16.mxu1 %v6936_v49  ;;  %4080 = vmatpush1.bf16.msra.mxu0 %v6931_v20  ;;  %v3032_v62 = vsel %vm7721_vm4, %v3027_v46, %v3031_v58  ;;  %v6067_v10 = vrot.slane %v8130_v4, 10  ;;  %v4151_v40 = vrot.slane %v8067_v2, 6  ;;  %v8145_v60 = vsel %vm7740_vm7, %v6066_v63, %v4144_v48  ;;  %v6946_v50 = vld [vmem:[#allocation13 + $0x40] ss:$8 sps:$4 sm:$0xff]   ;;  %v6954_v49 = vld [vmem:[#allocation13 + $0x54] ss:$8 sps:$4 sm:$0xff]  }
 0x3ed   :  { %3799 = vmatprep.mubr.bf16.mxu0 %v5997_v3  ;;  %v5923_v5 = vcombine.high %v3022_v54, %v3032_v62  ;;  %4081 = vmatprep.subr.bf16.mxu0 %v6939_v29  ;;  %v5922_v24 = vcombine.low %v3022_v54, %v3032_v62  ;;  %v8149_v43 = vsel %vm7740_vm7, %v4146_v36, %v4147_v16  ;;  %v4154_v59 = vrot.slane %v8132_v53, 6  ;;  %v6957_v58 = vld [vmem:[#allocation13 + $0x364] ss:$8 sps:$4 sm:$0xff]   ;;  %v6952_v29 = vld [vmem:[#allocation13 + $0x50] ss:$8 sps:$4 sm:$0xff]  }
 0x3ee   :  { %3800 = vmatmul.mubr.bf16.gmra.mrb[8].mxu0 %v5996_v30  ;;  %v6068_v18 = vcombine.low %v8145_v60, %v8149_v43  ;;  %v6069_v44 = vcombine.high %v8145_v60, %v8149_v43  ;;  %v4153_v1 = vrot.slane %v4151_v40, 4  ;;  %v8156_v23 = vor.u32 %v4438_v42, %v4437_v56  ;;  %v8172_v46 = vld [vmem:[#allocation4 + $0x10] sm:$0x77]  ;;  %v6955_v48 = vld [vmem:[#allocation13 + $0x360] ss:$8 sps:$4 sm:$0xff]  }
 0x3ef   :  { %4107 = vmatprep.mubr.bf16.mxu0 %v6031_v61  ;;  %3480 = vmatpush1.bf16.msra.mxu1 %v6934_v8  ;;  %v8160_v26 = vsel %vm7740_vm7, %v6067_v10, %v4151_v40  ;;  %v4460_v3 = vrot.slane %v8098_v51, 6  ;;  %v4461_v30 = vrot.slane %v8094_v14, 7  ;;  %v4744_v8 = vld [vmem:[#allocation4] sm:$0x88]  ;;  %v6963_v61 = vld [vmem:[#allocation13 + $0x374] ss:$8 sps:$4 sm:$0xff]  }
 0x3f0   :  { %3284 = vmatprep.mubr.bf16.mxu1 %v5923_v5  ;;  %3481 = vmatprep.subr.bf16.mxu1 %v6942_v33  ;;  %v8164_v20 = vsel %vm7740_vm7, %v4153_v1, %v4154_v59  ;;  %v6958_v33 = vld [vmem:[#allocation13 + $0x60] ss:$8 sps:$4 sm:$0xff]   ;;  %v4745_v62 = vld [vmem:[#allocation4 + $0x18] sm:$0x88]  ;;  %v6140_v63 = vrot.slane %v4744_v8, 11  ;;  %v4752_v5 = vrot.slane %v8042_v25, 7 }
 0x3f1   :  { %3285 = vmatmul.mubr.bf16.gmra.mrb[16].mxu1 %v5922_v24  ;;  %4082 = vmatpush1.bf16.msra.mxu0 %v6937_v55  ;;  %v6071_v11 = vcombine.high %v8160_v26, %v8164_v20  ;;  %v6070_v35 = vcombine.low %v8160_v26, %v8164_v20  ;;  %v8174_v54 = vor.u32 %v4461_v30, %v4460_v3  ;;  %v8176_v55 = vld [vmem:[#allocation4 + $0x28] sm:$0x77]  ;;  %v4755_v24 = vrot.slane %v8172_v46, 7  ;;  %v6961_v56 = vld [vmem:[#allocation13 + $0x370] ss:$8 sps:$4 sm:$0xff]  }
 0x3f2   :  { %3507 = vmatprep.mubr.bf16.mxu1 %v5957_v45  ;;  %4083 = vmatprep.subr.bf16.mxu0 %v6945_v19  ;;  %v6966_v19 = vld [vmem:[#allocation13 + $0x74] ss:$8 sps:$4 sm:$0xff]   ;;  %v6969_v36 = vld [vmem:[#allocation13 + $0x384] ss:$8 sps:$4 sm:$0xff]   ;;  %v6141_v16 = vrot.slane %v4745_v62, 11  ;;  %v4759_v42 = vrot.slane %v8067_v2, 7  ;;  %v8184_v10 = vsel %vm8372_vm8, %v6140_v63, %v4752_v5 }
 0x3f3   :  { %3482 = vmatpush1.bf16.msra.mxu1 %v6940_v6  ;;  %v4754_v6 = vrot.slane %v4752_v5, 4  ;;  %v4762_v45 = vrot.slane %v8176_v55, 7  ;;  %v6973_v8 = vld [vmem:[#allocation13 + $0x390] ss:$8 sps:$4 sm:$0xff]   ;;  %v6987_v62 = vld [vmem:[#allocation13 + $0x3b4] ss:$8 sps:$4 sm:$0xff]  }
 0x3f4   :  { %3483 = vmatprep.subr.bf16.mxu1 %v6948_v9  ;;  %v6964_v9 = vld [vmem:[#allocation13 + $0x70] ss:$8 sps:$4 sm:$0xff]   ;;  %v4761_v1 = vrot.slane %v4759_v42, 4  ;;  %v6982_v63 = vld [vmem:[#allocation13 + $0xa0] ss:$8 sps:$4 sm:$0xff]  }
 0x3f5   :  { %4084 = vmatpush1.bf16.msra.mxu0 %v6943_v32  ;;  %v8188_v40 = vsel %vm8372_vm8, %v4754_v6, %v4755_v24  ;;  %v6972_v32 = vld [vmem:[#allocation13 + $0x84] ss:$8 sps:$4 sm:$0xff]   ;;  %v6990_v5 = vld [vmem:[#allocation13 + $0xb4] ss:$8 sps:$4 sm:$0xff]   ;;  %v6985_v24 = vld [vmem:[#allocation13 + $0x3b0] ss:$8 sps:$4 sm:$0xff]  }
 0x3f6   :  { %4085 = vmatprep.subr.bf16.mxu0 %v6951_v15  ;;  %v6142_v59 = vcombine.low %v8184_v10, %v8188_v40  ;;  %v6143_v15 = vcombine.high %v8184_v10, %v8188_v40  ;;  %v6996_v6 = vld [vmem:[#allocation13 + $0xc4] ss:$8 sps:$4 sm:$0xff]   ;;  %v7027_v37 = vld [vmem:[#allocation13 + $0x440] ss:$8 sps:$4 sm:$0xff]   ;;  %v7044_v41 = vld [vmem:[#allocation13 + $0x494] ss:$8 sps:$4 sm:$0xff]  }
 0x3f7   :  { %3484 = vmatpush1.bf16.msra.mxu1 %v6946_v50  ;;  %v6967_v50 = vld [vmem:[#allocation13 + $0x380] ss:$8 sps:$4 sm:$0xff]   ;;  %v7029_v25 = vld [vmem:[#allocation13 + $0x444] ss:$8 sps:$4 sm:$0xff]   ;;  %v7074_v43 = vld [vmem:[#allocation13 + $0x534] ss:$8 sps:$4 sm:$0xff]  }
 0x3f8   :  { %3485 = vmatprep.subr.bf16.mxu1 %v6954_v49  ;;  %v6975_v49 = vld [vmem:[#allocation13 + $0x394] ss:$8 sps:$4 sm:$0xff]   ;;  %v7039_v2 = vld [vmem:[#allocation13 + $0x480] ss:$8 sps:$4 sm:$0xff]   ;;  %v7084_v26 = vld [vmem:[#allocation13 + $0x570] ss:$8 sps:$4 sm:$0xff]  }
 0x3f9   :  { %4086 = vmatpush1.bf16.msra.mxu0 %v6949_v28  ;;  %v8196_v28 = vsel %vm8372_vm8, %v6141_v16, %v4759_v42  ;;  %v6999_v16 = vld [vmem:[#allocation13 + $0x3d4] ss:$8 sps:$4 sm:$0xff]   ;;  %v3844_v42 = vshrl.u32 %v8087_v13, 16  ;;  %v7089_v20 = vld [vmem:[#allocation13 + $0x584] ss:$8 sps:$4 sm:$0xff]  }
 0x3fa   :  { %4087 = vmatprep.subr.bf16.mxu0 %v6957_v58  ;;  %v8200_v58 = vsel %vm8372_vm8, %v4761_v1, %v4762_v45  ;;  %v3847_v45 = vshll.u32 %v8087_v13, 16  ;;  %v3858_v1 = vshrl.u32 %v8132_v53, 16  ;;  %v7000_v13 = vld [vmem:[#allocation13 + $0xd0] ss:$8 sps:$4 sm:$0xff]  }
 0x3fb   :  { %3486 = vmatpush1.bf16.msra.mxu1 %v6952_v29  ;;  %v6970_v29 = vld [vmem:[#allocation13 + $0x80] ss:$8 sps:$4 sm:$0xff]   ;;  %v6145_v3 = vcombine.high %v8196_v28, %v8200_v58  ;;  %v6144_v30 = vcombine.low %v8196_v28, %v8200_v58  ;;  %v7179_v58 = vld [vmem:[#allocation14 + $0xc4] ss:$16 sps:$4 sm:$0xff]  }
 0x3fc   :  { %3487 = vmatprep.subr.bf16.mxu1 %v6960_v0  ;;  %v6978_v0 = vld [vmem:[#allocation13 + $0x94] ss:$8 sps:$4 sm:$0xff]   ;;  %v7177_v28 = vld [vmem:[#allocation14 + $0xc0] ss:$16 sps:$4 sm:$0xff]  }
 0x3fd   :  { %4088 = vmatpush1.bf16.msra.mxu0 %v6955_v48  ;;  %v6981_v48 = vld [vmem:[#allocation13 + $0x3a4] ss:$8 sps:$4 sm:$0xff]  }
 0x3fe   :  { %4089 = vmatprep.subr.bf16.mxu0 %v6963_v61  ;;  %v6979_v61 = vld [vmem:[#allocation13 + $0x3a0] ss:$8 sps:$4 sm:$0xff]  }
 0x3ff   :  { %3488 = vmatpush1.bf16.msra.mxu1 %v6958_v33  ;;  %v6976_v33 = vld [vmem:[#allocation13 + $0x90] ss:$8 sps:$4 sm:$0xff]  }
 0x400   :  { %3489 = vmatprep.subr.bf16.mxu1 %v6966_v19  ;;  %v6993_v19 = vld [vmem:[#allocation13 + $0x3c4] ss:$8 sps:$4 sm:$0xff]  }
 0x401   :  { %4090 = vmatpush1.bf16.msra.mxu0 %v6961_v56  ;;  %v6988_v56 = vld [vmem:[#allocation13 + $0xb0] ss:$8 sps:$4 sm:$0xff]  }
 0x402   :  { %4091 = vmatprep.subr.bf16.mxu0 %v6969_v36  ;;  %v6991_v36 = vld [vmem:[#allocation13 + $0x3c0] ss:$8 sps:$4 sm:$0xff]  }
 0x403   :  { %3490 = vmatpush1.bf16.msra.mxu1 %v6964_v9  ;;  %v6994_v9 = vld [vmem:[#allocation13 + $0xc0] ss:$8 sps:$4 sm:$0xff]  }
 0x404   :  { %3491 = vmatprep.subr.bf16.mxu1 %v6972_v32  ;;  %v7002_v32 = vld [vmem:[#allocation13 + $0xd4] ss:$8 sps:$4 sm:$0xff]  }
 0x405   :  { %4092 = vmatpush1.bf16.msra.mxu0 %v6967_v50  ;;  %v3861_v50 = vshll.u32 %v8132_v53, 16  ;;  %v7011_v53 = vld [vmem:[#allocation13 + $0x3f4] ss:$8 sps:$4 sm:$0xff]  }
 0x406   :  { %4093 = vmatprep.subr.bf16.mxu0 %v6975_v49  ;;  %v6997_v49 = vld [vmem:[#allocation13 + $0x3d0] ss:$8 sps:$4 sm:$0xff]  }
 0x407   :  { %3492 = vmatpush1.bf16.msra.mxu1 %v6970_v29  ;;  %v7005_v29 = vld [vmem:[#allocation13 + $0x3e4] ss:$8 sps:$4 sm:$0xff]  }
 0x408   :  { %3493 = vmatprep.subr.bf16.mxu1 %v6978_v0  ;;  %v3846_v0 = vrot.slane %v3844_v42, 5  ;;  %v7012_v42 = vld [vmem:[#allocation13 + $0xf0] ss:$8 sps:$4 sm:$0xff]  }
 0x409   :  { %4094 = vmatpush1.bf16.msra.mxu0 %v6973_v8  ;;  %v3849_v8 = vrot.slane %v3847_v45, 6 }
 0x40a   :  { %4095 = vmatprep.subr.bf16.mxu0 %v6981_v48  ;;  %v3852_v48 = vrot.slane %v8098_v51, 5  ;;  %v7009_v51 = vld [vmem:[#allocation13 + $0x3f0] ss:$8 sps:$4 sm:$0xff]  }
 0x40b   :  { %3494 = vmatpush1.bf16.msra.mxu1 %v6976_v33  ;;  %v3853_v33 = vrot.slane %v8094_v14, 6  ;;  %v7017_v14 = vld [vmem:[#allocation13 + $0x404] ss:$8 sps:$4 sm:$0xff]  }
 0x40c   :  { %3495 = vmatprep.subr.bf16.mxu1 %v6984_v17  ;;  %v7008_v17 = vld [vmem:[#allocation13 + $0xe4] ss:$8 sps:$4 sm:$0xff]  }
 0x40d   :  { %4096 = vmatpush1.bf16.msra.mxu0 %v6979_v61  ;;  %v3860_v61 = vrot.slane %v3858_v1, 5 }
 0x40e   :  { %4097 = vmatprep.subr.bf16.mxu0 %v6987_v62  ;;  %v3863_v62 = vrot.slane %v3861_v50, 6  ;;  %v7020_v50 = vld [vmem:[#allocation13 + $0x414] ss:$8 sps:$4 sm:$0xff]  }
 0x40f   :  { %3496 = vmatpush1.bf16.msra.mxu1 %v6982_v63  ;;  %v7003_v63 = vld [vmem:[#allocation13 + $0x3e0] ss:$8 sps:$4 sm:$0xff]  }
 0x410   :  { %3497 = vmatprep.subr.bf16.mxu1 %v6990_v5  ;;  %v3850_v5 = vor.u32 %v3849_v8, %v3846_v0  ;;  %v7023_v0 = vld [vmem:[#allocation13 + $0x424] ss:$8 sps:$4 sm:$0xff]   ;;  %v7024_v8 = vld [vmem:[#allocation13 + $0x430] ss:$8 sps:$4 sm:$0xff]  }
 0x411   :  { %4098 = vmatpush1.bf16.msra.mxu0 %v6985_v24  ;;  %v3854_v24 = vor.u32 %v3853_v33, %v3852_v48  ;;  %v7035_v48 = vld [vmem:[#allocation13 + $0x464] ss:$8 sps:$4 sm:$0xff]   ;;  %v7033_v33 = vld [vmem:[#allocation13 + $0x460] ss:$8 sps:$4 sm:$0xff]  }
 0x412   :  { %4099 = vmatprep.subr.bf16.mxu0 %v6993_v19  ;;  %v7006_v19 = vld [vmem:[#allocation13 + $0xe0] ss:$8 sps:$4 sm:$0xff]  }
 0x413   :  { %3498 = vmatpush1.bf16.msra.mxu1 %v6988_v56  ;;  %v7014_v56 = vld [vmem:[#allocation13 + $0xf4] ss:$8 sps:$4 sm:$0xff]  }
 0x414   :  { %3499 = vmatprep.subr.bf16.mxu1 %v6996_v6  ;;  %v3864_v6 = vor.u32 %v3863_v62, %v3860_v61  ;;  %v7047_v61 = vld [vmem:[#allocation13 + $0x4a4] ss:$8 sps:$4 sm:$0xff]   ;;  %v7045_v62 = vld [vmem:[#allocation13 + $0x4a0] ss:$8 sps:$4 sm:$0xff]  }
 0x415   :  { %4100 = vmatpush1.bf16.msra.mxu0 %v6991_v36  ;;  %v3851_v36 = vrot.slane %v3850_v5, 4  ;;  %v7053_v5 = vld [vmem:[#allocation13 + $0x4c4] ss:$8 sps:$4 sm:$0xff]  }
 0x416   :  { %4101 = vmatprep.subr.bf16.mxu0 %v6999_v16  ;;  %v3856_v16 = vrot.slane %v3854_v24, 4 }
 0x417   :  { %3500 = vmatpush1.bf16.msra.mxu1 %v6994_v9  ;;  %v7015_v9 = vld [vmem:[#allocation13 + $0x400] ss:$8 sps:$4 sm:$0xff]   ;;  %v3855_v1 = vsel %vm7687_vm15, %v3851_v36, %v3854_v24  ;;  %v4429_v36 = vshrl.u32 %v8115_v34, 16 }
 0x418   :  { %3501 = vmatprep.subr.bf16.mxu1 %v7002_v32  ;;  %v3865_v45 = vsel %vm7687_vm15, %v3856_v16, %v3864_v6  ;;  %v6030_v32 = vcombine.low %v8121_v7, %v8113_v31  ;;  %v7026_v7 = vld [vmem:[#allocation13 + $0x434] ss:$8 sps:$4 sm:$0xff]   ;;  %v7051_v24 = vld [vmem:[#allocation13 + $0x4c0] ss:$8 sps:$4 sm:$0xff]   ;;  %v7059_v6 = vld [vmem:[#allocation13 + $0x4e4] ss:$8 sps:$4 sm:$0xff]  }
 0x419   :  { %4102 = vmatpush1.bf16.msra.mxu0 %v6997_v49  ;;  %v6033_v49 = vcombine.high %v3855_v1, %v3865_v45  ;;  %v6032_v31 = vcombine.low %v3855_v1, %v3865_v45  ;;  %v4432_v16 = vshll.u32 %v8115_v34, 16  ;;  %v4446_v45 = vshll.u32 %v8172_v46, 16 }
 0x41a   :  { %4103 = vmatprep.subr.bf16.mxu0 %v7005_v29  ;;  %v7018_v29 = vld [vmem:[#allocation13 + $0x410] ss:$8 sps:$4 sm:$0xff]   ;;  %v4431_v1 = vrot.slane %v4429_v36, 6 }
 0x41b   :  { %3502 = vmatpush1.bf16.msra.mxu1 %v7000_v13  ;;  %v7038_v13 = vld [vmem:[#allocation13 + $0x474] ss:$8 sps:$4 sm:$0xff]   ;;  %v7168_v36 = vld [vmem:[#allocation14 + $0x60] ss:$16 sps:$4 sm:$0xff]  }
 0x41c   :  { %3503 = vmatprep.subr.bf16.mxu1 %v7008_v17  ;;  %v7041_v17 = vld [vmem:[#allocation13 + $0x484] ss:$8 sps:$4 sm:$0xff]  }
 0x41d   :  { %4104 = vmatpush1.bf16.msra.mxu0 %v7003_v63  ;;  %v7050_v63 = vld [vmem:[#allocation13 + $0x4b4] ss:$8 sps:$4 sm:$0xff]  }
 0x41e   :  { %4105 = vmatprep.subr.bf16.mxu0 %v7011_v53  ;;  %v7048_v53 = vld [vmem:[#allocation13 + $0x4b0] ss:$8 sps:$4 sm:$0xff]  }
 0x41f   :  { %3504 = vmatpush1.bf16.msra.mxu1 %v7006_v19  ;;  %v7056_v19 = vld [vmem:[#allocation13 + $0x4d4] ss:$8 sps:$4 sm:$0xff]  }
 0x420   :  { %3505 = vmatprep.subr.bf16.mxu1 %v7014_v56  ;;  %v7054_v56 = vld [vmem:[#allocation13 + $0x4d0] ss:$8 sps:$4 sm:$0xff]  }
 0x421   :  { %4106 = vmatpush1.bf16.msra.mxu0 %v7009_v51  ;;  %v7057_v51 = vld [vmem:[#allocation13 + $0x4e0] ss:$8 sps:$4 sm:$0xff]  }
 0x422   :  { %4365 = vmatprep.subr.bf16.mxu0 %v7017_v14  ;;  %v7062_v14 = vld [vmem:[#allocation13 + $0x4f4] ss:$8 sps:$4 sm:$0xff]  }
 0x423   :  { %3506 = vmatpush1.bf16.msra.mxu1 %v7012_v42  ;;  %v4443_v42 = vshrl.u32 %v8172_v46, 16  ;;  %v7066_v46 = vld [vmem:[#allocation13 + $0x510] ss:$8 sps:$4 sm:$0xff]  }
 0x424   :  { %4108 = vmatmul.mubr.bf16.vlgmr.msra.gmra.mrb[4].mxu0 %v6030_v32  ;;  %v7065_v32 = vld [vmem:[#allocation13 + $0x504] ss:$8 sps:$4 sm:$0xff]  }
 0x425   :  { %4117 = vmatprep.mubr.bf16.mxu0 %v6033_v49  ;;  %4366 = vmatpush1.bf16.msra.mxu0 %v7015_v9  ;;  %v7060_v9 = vld [vmem:[#allocation13 + $0x4f0] ss:$8 sps:$4 sm:$0xff]   ;;  %v4445_v49 = vrot.slane %v4443_v42, 6  ;;  %v7099_v42 = vld [vmem:[#allocation13 + $0x5c0] ss:$8 sps:$4 sm:$0xff]  }
 0x426   :  { %3508 = vmatmul.mubr.bf16.vlgmr.msra.gmra.mrb[12].mxu1 %v5956_v21  ;;  %4367 = vmatprep.subr.bf16.mxu0 %v7020_v50  ;;  %v7032_v21 = vld [vmem:[#allocation13 + $0x454] ss:$8 sps:$4 sm:$0xff]   ;;  %v4434_v50 = vrot.slane %v4432_v16, 7 }
 0x427   :  { %3517 = vmatprep.mubr.bf16.mxu1 %v5959_v57  ;;  %v7030_v57 = vld [vmem:[#allocation13 + $0x450] ss:$8 sps:$4 sm:$0xff]   ;;  %v7173_v16 = vld [vmem:[#allocation14 + $0x84] ss:$16 sps:$4 sm:$0xff]  }
 0x429   :  { %4368 = vmatpush1.bf16.msra.mxu0 %v7018_v29  ;;  %v4448_v29 = vrot.slane %v4446_v45, 7  ;;  %v7104_v45 = vld [vmem:[#allocation13 + $0x5d4] ss:$8 sps:$4 sm:$0xff]  }
 0x42a   :  { %4369 = vmatprep.subr.bf16.mxu0 %v7023_v0  ;;  %v7063_v0 = vld [vmem:[#allocation13 + $0x500] ss:$8 sps:$4 sm:$0xff]  }
 0x42b   :  { %v4449_v34 = vor.u32 %v4448_v29, %v4445_v49  ;;  %v4469_v49 = vshll.u32 %v8176_v55, 16  ;;  %v7102_v29 = vld [vmem:[#allocation13 + $0x5d0] ss:$8 sps:$4 sm:$0xff]  }
 0x42c   :  { %4118 = vmatmul.mubr.bf16.gmra.mrb[8].mxu0 %v6032_v31  ;;  %v4435_v31 = vor.u32 %v4434_v50, %v4431_v1  ;;  %v7171_v1 = vld [vmem:[#allocation14 + $0x80] ss:$16 sps:$4 sm:$0xff]   ;;  %v4466_v50 = vshrl.u32 %v8176_v55, 16  ;;  %v7113_v55 = vld [vmem:[#allocation13 + $0x604] ss:$8 sps:$4 sm:$0xff]  }
 0x42d   :  { %4370 = vmatpush1.bf16.msra.mxu0 %v7021_v47  ;;  %4397 = vmatprep.mubr.bf16.mxu0 %v6069_v44  ;;  %v7036_v44 = vld [vmem:[#allocation13 + $0x470] ss:$8 sps:$4 sm:$0xff]   ;;  %v7068_v47 = vld [vmem:[#allocation13 + $0x514] ss:$8 sps:$4 sm:$0xff]  }
 0x42e   :  { %3518 = vmatmul.mubr.bf16.gmra.mrb[16].mxu1 %v5958_v39  ;;  %4371 = vmatprep.subr.bf16.mxu0 %v7026_v7  ;;  %v7042_v39 = vld [vmem:[#allocation13 + $0x490] ss:$8 sps:$4 sm:$0xff]   ;;  %v7071_v7 = vld [vmem:[#allocation13 + $0x524] ss:$8 sps:$4 sm:$0xff]  }
 0x431   :  { %4372 = vmatpush1.bf16.msra.mxu0 %v7024_v8  ;;  %v4436_v8 = vrot.slane %v4435_v31, 4 }
 0x432   :  { %4373 = vmatprep.subr.bf16.mxu0 %v7029_v25  ;;  %v4441_v25 = vrot.slane %v8156_v23, 4 }
 0x433   :  { %v8248_v60 = vsel %vm7611_vm6, %v4436_v8, %v8156_v23  ;;  %v7078_v23 = vld [vmem:[#allocation13 + $0x550] ss:$8 sps:$4 sm:$0xff]  }
 0x435   :  { %4374 = vmatpush1.bf16.msra.mxu0 %v7027_v37  ;;  %v8243_v37 = vsel %vm7611_vm6, %v4441_v25, %v4449_v34  ;;  %v4468_v34 = vrot.slane %v4466_v50, 6 }
 0x436   :  { %4375 = vmatprep.subr.bf16.mxu0 %v7032_v21  ;;  %v7069_v21 = vld [vmem:[#allocation13 + $0x520] ss:$8 sps:$4 sm:$0xff]  }
 0x439   :  { %4376 = vmatpush1.bf16.msra.mxu0 %v7030_v57  ;;  %v7077_v57 = vld [vmem:[#allocation13 + $0x544] ss:$8 sps:$4 sm:$0xff]  }
 0x43a   :  { %4377 = vmatprep.subr.bf16.mxu0 %v7035_v48  ;;  %v7075_v48 = vld [vmem:[#allocation13 + $0x540] ss:$8 sps:$4 sm:$0xff]  }
 0x43d   :  { %4378 = vmatpush1.bf16.msra.mxu0 %v7033_v33  ;;  %v7080_v33 = vld [vmem:[#allocation13 + $0x554] ss:$8 sps:$4 sm:$0xff]  }
 0x43e   :  { %4379 = vmatprep.subr.bf16.mxu0 %v7038_v13  ;;  %v7083_v13 = vld [vmem:[#allocation13 + $0x564] ss:$8 sps:$4 sm:$0xff]  }
 0x441   :  { %4380 = vmatpush1.bf16.msra.mxu0 %v7036_v44  ;;  %v7081_v44 = vld [vmem:[#allocation13 + $0x560] ss:$8 sps:$4 sm:$0xff]  }
 0x442   :  { %4381 = vmatprep.subr.bf16.mxu0 %v7041_v17  ;;  %v7086_v17 = vld [vmem:[#allocation13 + $0x574] ss:$8 sps:$4 sm:$0xff]  }
 0x445   :  { %4382 = vmatpush1.bf16.msra.mxu0 %v7039_v2  ;;  %v7092_v2 = vld [vmem:[#allocation13 + $0x594] ss:$8 sps:$4 sm:$0xff]  }
 0x446   :  { %4383 = vmatprep.subr.bf16.mxu0 %v7044_v41  ;;  %v7159_v41 = vld [vmem:[#allocation14] ss:$16 sps:$4 sm:$0xff]  }
 0x449   :  { %4384 = vmatpush1.bf16.msra.mxu0 %v7042_v39  ;;  %v7161_v39 = vld [vmem:[#allocation14 + $0x4] ss:$16 sps:$4 sm:$0xff]  }
 0x44a   :  { %4385 = vmatprep.subr.bf16.mxu0 %v7047_v61  ;;  %v7090_v61 = vld [vmem:[#allocation13 + $0x590] ss:$8 sps:$4 sm:$0xff]   ;;  %5556 = vmatprep.subr.bf16.mxu1 %v7161_v39  ;;  %v7129_v39 = vld [vmem:[#allocation13 + $0x660] ss:$8 sps:$4 sm:$0xff]  }
 0x44b   :  { %5557 = vmatpush1.bf16.msra.mxu1 %v7159_v41  ;;  %v7131_v41 = vld [vmem:[#allocation13 + $0x664] ss:$8 sps:$4 sm:$0xff]  }
 0x44d   :  { %4386 = vmatpush1.bf16.msra.mxu0 %v7045_v62  ;;  %v7164_v62 = vld [vmem:[#allocation14 + $0x24] ss:$16 sps:$4 sm:$0xff]  }
 0x44e   :  { %4387 = vmatprep.subr.bf16.mxu0 %v7050_v63  ;;  %v7095_v63 = vld [vmem:[#allocation13 + $0x5a4] ss:$8 sps:$4 sm:$0xff]   ;;  %5558 = vmatprep.subr.bf16.mxu1 %v7164_v62  ;;  %v7132_v62 = vld [vmem:[#allocation13 + $0x670] ss:$8 sps:$4 sm:$0xff]  }
 0x451   :  { %4388 = vmatpush1.bf16.msra.mxu0 %v7048_v53  ;;  %v7162_v53 = vld [vmem:[#allocation14 + $0x20] ss:$16 sps:$4 sm:$0xff]  }
 0x452   :  { %4389 = vmatprep.subr.bf16.mxu0 %v7053_v5  ;;  %v7167_v5 = vld [vmem:[#allocation14 + $0x44] ss:$16 sps:$4 sm:$0xff]   ;;  %5559 = vmatpush1.bf16.msra.mxu1 %v7162_v53 }
 0x453   :  { %5560 = vmatprep.subr.bf16.mxu1 %v7167_v5  ;;  %v7140_v53 = vld [vmem:[#allocation13 + $0x694] ss:$8 sps:$4 sm:$0xff]   ;;  %v7138_v5 = vld [vmem:[#allocation13 + $0x690] ss:$8 sps:$4 sm:$0xff]  }
 0x455   :  { %4390 = vmatpush1.bf16.msra.mxu0 %v7051_v24  ;;  %v7093_v24 = vld [vmem:[#allocation13 + $0x5a0] ss:$8 sps:$4 sm:$0xff]  }
 0x456   :  { %4391 = vmatprep.subr.bf16.mxu0 %v7056_v19  ;;  %v7098_v19 = vld [vmem:[#allocation13 + $0x5b4] ss:$8 sps:$4 sm:$0xff]  }
 0x459   :  { %4392 = vmatpush1.bf16.msra.mxu0 %v7054_v56  ;;  %v7165_v56 = vld [vmem:[#allocation14 + $0x40] ss:$16 sps:$4 sm:$0xff]  }
 0x45a   :  { %4393 = vmatprep.subr.bf16.mxu0 %v7059_v6  ;;  %v7170_v6 = vld [vmem:[#allocation14 + $0x64] ss:$16 sps:$4 sm:$0xff]   ;;  %5561 = vmatpush1.bf16.msra.mxu1 %v7165_v56 }
 0x45b   :  { %5562 = vmatprep.subr.bf16.mxu1 %v7170_v6  ;;  %v7146_v56 = vld [vmem:[#allocation13 + $0x6b4] ss:$8 sps:$4 sm:$0xff]   ;;  %v7144_v6 = vld [vmem:[#allocation13 + $0x6b0] ss:$8 sps:$4 sm:$0xff]  }
 0x45d   :  { %4394 = vmatpush1.bf16.msra.mxu0 %v7057_v51  ;;  %v7096_v51 = vld [vmem:[#allocation13 + $0x5b0] ss:$8 sps:$4 sm:$0xff]  }
 0x45e   :  { %4395 = vmatprep.subr.bf16.mxu0 %v7062_v14  ;;  %v7101_v14 = vld [vmem:[#allocation13 + $0x5c4] ss:$8 sps:$4 sm:$0xff]   ;;  %5563 = vmatpush1.bf16.msra.mxu1 %v7168_v36  ;;  %v7152_v36 = vld [vmem:[#allocation13 + $0x6d4] ss:$8 sps:$4 sm:$0xff]  }
 0x45f   :  { %5564 = vmatprep.subr.bf16.mxu1 %v7173_v16  ;;  %v7150_v16 = vld [vmem:[#allocation13 + $0x6d0] ss:$8 sps:$4 sm:$0xff]  }
 0x461   :  { %4396 = vmatpush1.bf16.msra.mxu0 %v7060_v9  ;;  %v4452_v9 = vshrl.u32 %v8130_v4, 16 }
 0x462   :  { %4683 = vmatprep.subr.bf16.mxu0 %v7065_v32  ;;  %v4455_v32 = vshll.u32 %v8130_v4, 16  ;;  %5565 = vmatpush1.bf16.msra.mxu1 %v7171_v1  ;;  %v7110_v4 = vld [vmem:[#allocation13 + $0x5f4] ss:$8 sps:$4 sm:$0xff]  }
 0x464   :  { %4398 = vmatmul.mubr.bf16.vlgmr.msra.gmra.mrb[4].mxu0 %v6068_v18  ;;  %v6105_v18 = vcombine.high %v8248_v60, %v8243_v37  ;;  %v4457_v31 = vrot.slane %v4455_v32, 7  ;;  %v7156_v32 = vld [vmem:[#allocation13 + $0x6f0] ss:$8 sps:$4 sm:$0xff]  }
 0x465   :  { %4407 = vmatprep.mubr.bf16.mxu0 %v6071_v11  ;;  %4684 = vmatpush1.bf16.msra.mxu0 %v7063_v0  ;;  %v7072_v11 = vld [vmem:[#allocation13 + $0x530] ss:$8 sps:$4 sm:$0xff]   ;;  %v7107_v0 = vld [vmem:[#allocation13 + $0x5e4] ss:$8 sps:$4 sm:$0xff]  }
 0x466   :  { %4685 = vmatprep.subr.bf16.mxu0 %v7068_v47  ;;  %v4454_v47 = vrot.slane %v4452_v9, 6  ;;  %v7158_v9 = vld [vmem:[#allocation13 + $0x6f4] ss:$8 sps:$4 sm:$0xff]  }
 0x468   :  { %v4458_v8 = vor.u32 %v4457_v31, %v4454_v47  ;;  %v7180_v31 = vld [vmem:[#allocation14 + $0xe0] ss:$16 sps:$4 sm:$0xff]  }
 0x469   :  { %4686 = vmatpush1.bf16.msra.mxu0 %v7066_v46  ;;  %v4471_v46 = vrot.slane %v4469_v49, 7 }
 0x46a   :  { %4687 = vmatprep.subr.bf16.mxu0 %v7071_v7  ;;  %v7105_v7 = vld [vmem:[#allocation13 + $0x5e0] ss:$8 sps:$4 sm:$0xff]  }
 0x46b   :  { %v4472_v25 = vor.u32 %v4471_v46, %v4468_v34  ;;  %v7183_v34 = vld [vmem:[#allocation14 + $0x100] ss:$16 sps:$4 sm:$0xff]   ;;  %v7185_v46 = vld [vmem:[#allocation14 + $0x104] ss:$16 sps:$4 sm:$0xff]  }
 0x46c   :  { %4408 = vmatmul.mubr.bf16.gmra.mrb[8].mxu0 %v6070_v35  ;;  %v7087_v35 = vld [vmem:[#allocation13 + $0x580] ss:$8 sps:$4 sm:$0xff]  }
 0x46d   :  { %4688 = vmatpush1.bf16.msra.mxu0 %v7069_v21  ;;  %4715 = vmatprep.mubr.bf16.mxu0 %v6105_v18  ;;  %v7108_v21 = vld [vmem:[#allocation13 + $0x5f0] ss:$8 sps:$4 sm:$0xff]   ;;  %v4464_v18 = vrot.slane %v8174_v54, 4 }
 0x46e   :  { %4689 = vmatprep.subr.bf16.mxu0 %v7074_v43  ;;  %v4459_v43 = vrot.slane %v4458_v8, 4  ;;  %v7191_v8 = vld [vmem:[#allocation14 + $0x144] ss:$16 sps:$4 sm:$0xff]  }
 0x471   :  { %4690 = vmatpush1.bf16.msra.mxu0 %v7072_v11  ;;  %v4473_v11 = vsel %vm7611_vm6, %v4464_v18, %v4472_v25  ;;  %v7189_v25 = vld [vmem:[#allocation14 + $0x140] ss:$16 sps:$4 sm:$0xff]  }
 0x472   :  { %4691 = vmatprep.subr.bf16.mxu0 %v7077_v57  ;;  %v7111_v57 = vld [vmem:[#allocation13 + $0x600] ss:$8 sps:$4 sm:$0xff]  }
 0x473   :  { %v7195_v18 = vld [vmem:[#allocation14 + $0x180] ss:$16 sps:$4 sm:$0xff]  }
 0x475   :  { %4692 = vmatpush1.bf16.msra.mxu0 %v7075_v48  ;;  %v6104_v48 = vcombine.low %v8248_v60, %v8243_v37  ;;  %v7123_v37 = vld [vmem:[#allocation13 + $0x640] ss:$8 sps:$4 sm:$0xff]   ;;  %v7128_v60 = vld [vmem:[#allocation13 + $0x654] ss:$8 sps:$4 sm:$0xff]  }
 0x476   :  { %4693 = vmatprep.subr.bf16.mxu0 %v7080_v33  ;;  %v4463_v33 = vsel %vm7611_vm6, %v4459_v43, %v8174_v54  ;;  %v7125_v54 = vld [vmem:[#allocation13 + $0x644] ss:$8 sps:$4 sm:$0xff]  }
 0x477   :  { %v7197_v43 = vld [vmem:[#allocation14 + $0x184] ss:$16 sps:$4 sm:$0xff]  }
 0x479   :  { %4694 = vmatpush1.bf16.msra.mxu0 %v7078_v23  ;;  %v7116_v23 = vld [vmem:[#allocation13 + $0x614] ss:$8 sps:$4 sm:$0xff]  }
 0x47a   :  { %4695 = vmatprep.subr.bf16.mxu0 %v7083_v13  ;;  %v6107_v13 = vcombine.high %v4463_v33, %v4473_v11 }
 0x47d   :  { %4696 = vmatpush1.bf16.msra.mxu0 %v7081_v44  ;;  %v7114_v44 = vld [vmem:[#allocation13 + $0x610] ss:$8 sps:$4 sm:$0xff]  }
 0x47e   :  { %4697 = vmatprep.subr.bf16.mxu0 %v7086_v17  ;;  %v7119_v17 = vld [vmem:[#allocation13 + $0x624] ss:$8 sps:$4 sm:$0xff]  }
 0x481   :  { %4698 = vmatpush1.bf16.msra.mxu0 %v7084_v26  ;;  %v7117_v26 = vld [vmem:[#allocation13 + $0x620] ss:$8 sps:$4 sm:$0xff]  }
 0x482   :  { %4699 = vmatprep.subr.bf16.mxu0 %v7089_v20  ;;  %v6106_v20 = vcombine.low %v4463_v33, %v4473_v11  ;;  %v7200_v11 = vld [vmem:[#allocation14 + $0x1a4] ss:$16 sps:$4 sm:$0xff]   ;;  %v7201_v33 = vld [vmem:[#allocation14 + $0x1c0] ss:$16 sps:$4 sm:$0xff]  }
 0x485   :  { %4700 = vmatpush1.bf16.msra.mxu0 %v7087_v35  ;;  %v7122_v35 = vld [vmem:[#allocation13 + $0x634] ss:$8 sps:$4 sm:$0xff]  }
 0x486   :  { %4701 = vmatprep.subr.bf16.mxu0 %v7092_v2  ;;  %v7126_v2 = vld [vmem:[#allocation13 + $0x650] ss:$8 sps:$4 sm:$0xff]  }
 0x489   :  { %4702 = vmatpush1.bf16.msra.mxu0 %v7090_v61  ;;  %v7134_v61 = vld [vmem:[#allocation13 + $0x674] ss:$8 sps:$4 sm:$0xff]  }
 0x48a   :  { %4703 = vmatprep.subr.bf16.mxu0 %v7095_v63  ;;  %v7137_v63 = vld [vmem:[#allocation13 + $0x684] ss:$8 sps:$4 sm:$0xff]  }
 0x48d   :  { %4704 = vmatpush1.bf16.msra.mxu0 %v7093_v24  ;;  %v7143_v24 = vld [vmem:[#allocation13 + $0x6a4] ss:$8 sps:$4 sm:$0xff]  }
 0x48e   :  { %4705 = vmatprep.subr.bf16.mxu0 %v7098_v19  ;;  %v7141_v19 = vld [vmem:[#allocation13 + $0x6a0] ss:$8 sps:$4 sm:$0xff]  }
 0x491   :  { %4706 = vmatpush1.bf16.msra.mxu0 %v7096_v51  ;;  %v7149_v51 = vld [vmem:[#allocation13 + $0x6c4] ss:$8 sps:$4 sm:$0xff]  }
 0x492   :  { %4707 = vmatprep.subr.bf16.mxu0 %v7101_v14  ;;  %v7147_v14 = vld [vmem:[#allocation13 + $0x6c0] ss:$8 sps:$4 sm:$0xff]  }
 0x495   :  { %4708 = vmatpush1.bf16.msra.mxu0 %v7099_v42  ;;  %v7155_v42 = vld [vmem:[#allocation13 + $0x6e4] ss:$8 sps:$4 sm:$0xff]  }
 0x496   :  { %4709 = vmatprep.subr.bf16.mxu0 %v7104_v45  ;;  %v7153_v45 = vld [vmem:[#allocation13 + $0x6e0] ss:$8 sps:$4 sm:$0xff]  }
 0x499   :  { %4710 = vmatpush1.bf16.msra.mxu0 %v7102_v29 }
 0x49a   :  { %4711 = vmatprep.subr.bf16.mxu0 %v7107_v0 }
 0x49d   :  { %4712 = vmatpush1.bf16.msra.mxu0 %v7105_v7  ;;  %v7188_v7 = vld [vmem:[#allocation14 + $0x124] ss:$16 sps:$4 sm:$0xff]  }
 0x49e   :  { %4713 = vmatprep.subr.bf16.mxu0 %v7110_v4  ;;  %v7186_v4 = vld [vmem:[#allocation14 + $0x120] ss:$16 sps:$4 sm:$0xff]  }
 0x4a1   :  { %4714 = vmatpush1.bf16.msra.mxu0 %v7108_v21  ;;  %v7194_v21 = vld [vmem:[#allocation14 + $0x164] ss:$16 sps:$4 sm:$0xff]  }
 0x4a2   :  { %4973 = vmatprep.subr.bf16.mxu0 %v7113_v55  ;;  %v7192_v55 = vld [vmem:[#allocation14 + $0x160] ss:$16 sps:$4 sm:$0xff]  }
 0x4a4   :  { %4716 = vmatmul.mubr.bf16.vlgmr.msra.gmra.mrb[4].mxu0 %v6104_v48  ;;  %v7203_v48 = vld [vmem:[#allocation14 + $0x1c4] ss:$16 sps:$4 sm:$0xff]  }
 0x4a5   :  { %4725 = vmatprep.mubr.bf16.mxu0 %v6107_v13  ;;  %4974 = vmatpush1.bf16.msra.mxu0 %v7111_v57  ;;  %v7198_v57 = vld [vmem:[#allocation14 + $0x1a0] ss:$16 sps:$4 sm:$0xff]  }
 0x4a6   :  { %4975 = vmatprep.subr.bf16.mxu0 %v7116_v23  ;;  %v7206_v23 = vld [vmem:[#allocation14 + $0x1e4] ss:$16 sps:$4 sm:$0xff]   ;;  %v7204_v13 = vld [vmem:[#allocation14 + $0x1e0] ss:$16 sps:$4 sm:$0xff]  }
 0x4a9   :  { %4976 = vmatpush1.bf16.msra.mxu0 %v7114_v44  ;;  %v7209_v44 = vld [vmem:[#allocation14 + $0xc] ss:$16 sps:$4 sm:$0xff]  }
 0x4aa   :  { %4977 = vmatprep.subr.bf16.mxu0 %v7119_v17  ;;  %v5034_v17 = vld [vmem:[%s8343_s8] sm:$0x3] }
 0x4ac   :  { %4726 = vmatmul.mubr.bf16.gmra.mrb[8].mxu0 %v6106_v20  ;;  %v5039_v20 = vrot.slane %v5034_v17, %v8011_v22 }
 0x4ad   :  { %4978 = vmatpush1.bf16.msra.mxu0 %v7117_v26  ;;  %5005 = vmatprep.mubr.bf16.mxu0 %v6143_v15  ;;  %v7135_v15 = vld [vmem:[#allocation13 + $0x680] ss:$8 sps:$4 sm:$0xff]   ;;  %v5054_v26 = vld [vmem:[%s8344_s9] sm:$0x3] }
 0x4ae   :  { %4979 = vmatprep.subr.bf16.mxu0 %v7122_v35 }
 0x4b1   :  { %4980 = vmatpush1.bf16.msra.mxu0 %v7120_v27  ;;  %v5043_v27 = vrot.slane %v5034_v17, %v8017_v12 }
 0x4b2   :  { %4981 = vmatprep.subr.bf16.mxu0 %v7125_v54 }
 0x4b5   :  { %4982 = vmatpush1.bf16.msra.mxu0 %v7123_v37  ;;  %v5059_v37 = vrot.slane %v5054_v26, %v8011_v22 }
 0x4b6   :  { %4983 = vmatprep.subr.bf16.mxu0 %v7128_v60 }
 0x4b9   :  { %4984 = vmatpush1.bf16.msra.mxu0 %v7126_v2 }
 0x4ba   :  { %4985 = vmatprep.subr.bf16.mxu0 %v7131_v41  ;;  %v5063_v41 = vrot.slane %v5054_v26, %v8017_v12 }
 0x4bd   :  { %4986 = vmatpush1.bf16.msra.mxu0 %v7129_v39 }
 0x4be   :  { %4987 = vmatprep.subr.bf16.mxu0 %v7134_v61 }
 0x4c1   :  { %4988 = vmatpush1.bf16.msra.mxu0 %v7132_v62 }
 0x4c2   :  { %4989 = vmatprep.subr.bf16.mxu0 %v7137_v63 }
 0x4c5   :  { %4990 = vmatpush1.bf16.msra.mxu0 %v7135_v15 }
 0x4c6   :  { %4991 = vmatprep.subr.bf16.mxu0 %v7140_v53 }
 0x4c9   :  { %4992 = vmatpush1.bf16.msra.mxu0 %v7138_v5 }
 0x4ca   :  { %4993 = vmatprep.subr.bf16.mxu0 %v7143_v24 }
 0x4cd   :  { %4994 = vmatpush1.bf16.msra.mxu0 %v7141_v19 }
 0x4ce   :  { %4995 = vmatprep.subr.bf16.mxu0 %v7146_v56 }
 0x4d1   :  { %4996 = vmatpush1.bf16.msra.mxu0 %v7144_v6 }
 0x4d2   :  { %4997 = vmatprep.subr.bf16.mxu0 %v7149_v51 }
 0x4d5   :  { %4998 = vmatpush1.bf16.msra.mxu0 %v7147_v14 }
 0x4d6   :  { %4999 = vmatprep.subr.bf16.mxu0 %v7152_v36 }
 0x4d9   :  { %5000 = vmatpush1.bf16.msra.mxu0 %v7150_v16 }
 0x4da   :  { %5001 = vmatprep.subr.bf16.mxu0 %v7155_v42 }
 0x4dd   :  { %5002 = vmatpush1.bf16.msra.mxu0 %v7153_v45 }
 0x4de   :  { %5003 = vmatprep.subr.bf16.mxu0 %v7158_v9 }
 0x4e1   :  { %5004 = vmatpush1.bf16.msra.mxu0 %v7156_v32 }
 0x4e4   :  { %5006 = vmatmul.mubr.bf16.vlgmr.msra.gmra.mrb[4].mxu0 %v6142_v59  ;;  %v7174_v59 = vld [vmem:[#allocation14 + $0xa0] ss:$16 sps:$4 sm:$0xff]  }
 0x4e5   :  { %5015 = vmatprep.mubr.bf16.mxu0 %v6145_v3  ;;  %v7176_v3 = vld [vmem:[#allocation14 + $0xa4] ss:$16 sps:$4 sm:$0xff]  }
 0x4e6   :  { %5566 = vmatprep.subr.bf16.mxu1 %v7176_v3 }
 0x4e7   :  { %5567 = vmatpush1.bf16.msra.mxu1 %v7174_v59 }
 0x4e8   :  { %5568 = vmatprep.subr.bf16.mxu1 %v7179_v58 }
 0x4eb   :  { %5569 = vmatpush1.bf16.msra.mxu1 %v7177_v28 }
 0x4ec   :  { %5016 = vmatmul.mubr.bf16.gmra.mrb[8].mxu0 %v6144_v30  ;;  %v7182_v30 = vld [vmem:[#allocation14 + $0xe4] ss:$16 sps:$4 sm:$0xff]  }
 0x4ed   :  { %5570 = vmatprep.subr.bf16.mxu1 %v7182_v30 }
 0x4ef   :  { %5571 = vmatpush1.bf16.msra.mxu1 %v7180_v31 }
 0x4f0   :  { %5572 = vmatprep.subr.bf16.mxu1 %v7185_v46 }
 0x4f3   :  { %5573 = vmatpush1.bf16.msra.mxu1 %v7183_v34 }
 0x4f4   :  { %5574 = vmatprep.subr.bf16.mxu1 %v7188_v7 }
 0x4f7   :  { %5575 = vmatpush1.bf16.msra.mxu1 %v7186_v4 }
 0x4f8   :  { %5576 = vmatprep.subr.bf16.mxu1 %v7191_v8 }
 0x4f9   :  { %v3509_v1 = vpop.f32.mrb[12].mxu1 }
 0x4fa   :  { %v3511_v50 = vpop.f32.mrb[13].mxu1 }
 0x4fb   :  { %v8279_v49 = vpop.f32.mrb[14].mxu1  ;;  %5577 = vmatpush1.bf16.msra.mxu1 %v7189_v25 }
 0x4fc   :  { %v8281_v29 = vpop.f32.mrb[15].mxu1  ;;  %5578 = vmatprep.subr.bf16.mxu1 %v7194_v21 }
 0x4ff   :  { %5579 = vmatpush1.bf16.msra.mxu1 %v7192_v55 }
 0x500   :  { %5580 = vmatprep.subr.bf16.mxu1 %v7197_v43 }
 0x501   :  { %v8283_v0 = vpop.f32.mrb[16].mxu1 }
 0x502   :  { %v8285_v47 = vpop.f32.mrb[17].mxu1 }
 0x503   :  { %v8287_v10 = vpop.f32.mrb[18].mxu1  ;;  %5581 = vmatpush1.bf16.msra.mxu1 %v7195_v18 }
 0x504   :  { %v8289_v40 = vpop.f32.mrb[19].mxu1  ;;  %5582 = vmatprep.subr.bf16.mxu1 %v7200_v11 }
 0x507   :  { %5583 = vmatpush1.bf16.msra.mxu1 %v7198_v57 }
 0x508   :  { %5584 = vmatprep.subr.bf16.mxu1 %v7203_v48 }
 0x50b   :  { %5585 = vmatpush1.bf16.msra.mxu1 %v7201_v33 }
 0x50c   :  { %5586 = vmatprep.subr.bf16.mxu1 %v7206_v23 }
 0x50f   :  { %5587 = vmatpush1.bf16.msra.mxu1 %v7204_v13 }
 0x510   :  { %5597 = vmatprep.subr.bf16.mxu1 %v7209_v44 }
 0x5b7   :  { %v5007_v35 = vpop.f32.mrb[4].mxu0 }
 0x5b8   :  { %v6464_v54 = vadd.f32 %v5007_v35, %v3509_v1  ;;  %v5009_v60 = vpop.f32.mrb[5].mxu0 }
 0x5b9   :  { %v6465_v2 = vadd.f32 %v5009_v60, %v3511_v50  ;;  %v5011_v39 = vpop.f32.mrb[6].mxu0 }
 0x5ba   :  { %v5046_v61 = vmul.f32 %v6464_v54, %v5039_v20  ;;  %v6466_v62 = vadd.f32 %v5011_v39, %v8279_v49  ;;  %v5013_v63 = vpop.f32.mrb[7].mxu0 }
 0x5bb   :  { %v5047_v15 = vmul.f32 %v6465_v2, %v5043_v27  ;;  %v6467_v53 = vadd.f32 %v5013_v63, %v8281_v29 }
 0x5bc   :  { %v5066_v5 = vadd.f32 %v5059_v37, %v5046_v61  ;;  %v5048_v24 = vmul.f32 %v6466_v62, %v5039_v20 }
 0x5bd   :  { %v5067_v19 = vadd.f32 %v5063_v41, %v5047_v15  ;;  %v5049_v56 = vmul.f32 %v6467_v53, %v5043_v27 }
 0x5be   :  { %vm5074_vm6 = vcmp.gt.f32.partialorder %v5066_v5, 0.0  ;;  %v5082_v6 = vmul.f32 0.2, %v5066_v5  ;;  %v5068_v51 = vadd.f32 %v5059_v37, %v5048_v24 }
 0x5bf   :  { %vm5075_vm12 = vcmp.gt.f32.partialorder %v5067_v19, 0.0  ;;  %v5083_v14 = vmul.f32 0.2, %v5067_v19  ;;  %v5069_v36 = vadd.f32 %v5063_v41, %v5049_v56  ;;  %v5017_v16 = vpop.f32.mrb[8].mxu0 }
 0x5c0   :  { %vm5076_vm15 = vcmp.gt.f32.partialorder %v5068_v51, 0.0  ;;  %v5084_v42 = vmul.f32 0.2, %v5068_v51  ;;  %v6468_v45 = vadd.f32 %v5017_v16, %v8283_v0  ;;  %v5019_v9 = vpop.f32.mrb[9].mxu0  ;;  %v5090_v32 = vsel %vm5074_vm6, %v5066_v5, %v5082_v6 }
 0x5c1   :  { %vm5077_vm4 = vcmp.gt.f32.partialorder %v5069_v36, 0.0  ;;  %v5085_v1 = vmul.f32 0.2, %v5069_v36  ;;  %v6469_v50 = vadd.f32 %v5019_v9, %v8285_v47  ;;  %v5021_v49 = vpop.f32.mrb[10].mxu0  ;;  %v5091_v29 = vsel %vm5075_vm12, %v5067_v19, %v5083_v14 }
 0x5c2   :  { %v5092_v59 = vsel %vm5076_vm15, %v5068_v51, %v5084_v42  ;;  %v5050_v3 = vmul.f32 %v6468_v45, %v5039_v20  ;;  %v6470_v28 = vadd.f32 %v5021_v49, %v8287_v10  ;;  %v5023_v58 = vpop.f32.mrb[11].mxu0 }
 0x5c3   :  { %v5098_v30 = vadd.f32 %v5092_v59, %v5090_v32  ;;  %v5093_v31 = vsel %vm5077_vm4, %v5069_v36, %v5085_v1  ;;  %v5051_v34 = vmul.f32 %v6469_v50, %v5043_v27  ;;  %v6471_v46 = vadd.f32 %v5023_v58, %v8289_v40 }
 0x5c4   :  { %v5105_v7 = vadd.f32 %v5093_v31, %v5091_v29  ;;  %v5070_v0 = vadd.f32 %v5059_v37, %v5050_v3  ;;  %v5052_v4 = vmul.f32 %v6470_v28, %v5039_v20 }
 0x5c5   :  { %v5099_v8 = vrot.slane %v5098_v30, 4  ;;  %v5071_v25 = vadd.f32 %v5063_v41, %v5051_v34  ;;  %v5053_v21 = vmul.f32 %v6471_v46, %v5043_v27  ;;  %v7212_v34 = vld [vmem:[#allocation14 + $0x2c] ss:$16 sps:$4 sm:$0xff]   ;;  %v7210_v46 = vld [vmem:[#allocation14 + $0x28] ss:$16 sps:$4 sm:$0xff]  }
 0x5c6   :  { %v5106_v55 = vrot.slane %v5105_v7, 4  ;;  %v5086_v47 = vmul.f32 0.2, %v5070_v0  ;;  %v5072_v43 = vadd.f32 %v5059_v37, %v5052_v4  ;;  %vm5078_vm7 = vcmp.gt.f32.partialorder %v5070_v0, 0.0  ;;  %v7218_v4 = vld [vmem:[#allocation14 + $0x6c] ss:$16 sps:$4 sm:$0xff]  }
 0x5c7   :  { %v5100_v18 = vadd.f32 %v5099_v8, %v5098_v30  ;;  %v5087_v11 = vmul.f32 0.2, %v5071_v25  ;;  %v5073_v57 = vadd.f32 %v5063_v41, %v5053_v21  ;;  %vm5079_vm1 = vcmp.gt.f32.partialorder %v5071_v25, 0.0  ;;  %v7207_v30 = vld [vmem:[#allocation14 + $0x8] ss:$16 sps:$4 sm:$0xff]  }
 0x5c8   :  { %v5107_v10 = vadd.f32 %v5106_v55, %v5105_v7  ;;  %vm5080_vm5 = vcmp.gt.f32.partialorder %v5072_v43, 0.0  ;;  %v5088_v48 = vmul.f32 0.2, %v5072_v43  ;;  %v5094_v13 = vsel %vm5078_vm7, %v5070_v0, %v5086_v47  ;;  %v7215_v7 = vld [vmem:[#allocation14 + $0x4c] ss:$16 sps:$4 sm:$0xff]  }
 0x5c9   :  { %v5101_v33 = vrot.slane %v5100_v18, 2  ;;  %vm5081_vm11 = vcmp.gt.f32.partialorder %v5073_v57, 0.0  ;;  %v5089_v40 = vmul.f32 0.2, %v5073_v57  ;;  %v5095_v26 = vsel %vm5079_vm1, %v5071_v25, %v5087_v11  ;;  %v7213_v0 = vld [vmem:[#allocation14 + $0x48] ss:$16 sps:$4 sm:$0xff]  }
 0x5ca   :  { %v5108_v23 = vrot.slane %v5107_v10, 2  ;;  %v5096_v44 = vsel %vm5080_vm5, %v5072_v43, %v5088_v48  ;;  %v7216_v8 = vld [vmem:[#allocation14 + $0x68] ss:$16 sps:$4 sm:$0xff]   ;;  %v7221_v25 = vld [vmem:[#allocation14 + $0x8c] ss:$16 sps:$4 sm:$0xff]  }
 0x5cb   :  { %v5102_v17 = vadd.f32 %v5101_v33, %v5100_v18  ;;  %v5112_v20 = vadd.f32 %v5096_v44, %v5094_v13  ;;  %v5097_v35 = vsel %vm5081_vm11, %v5073_v57, %v5089_v40  ;;  %v7219_v21 = vld [vmem:[#allocation14 + $0x88] ss:$16 sps:$4 sm:$0xff]   ;;  %v7224_v55 = vld [vmem:[#allocation14 + $0xac] ss:$16 sps:$4 sm:$0xff]  }
 0x5cc   :  { %v5119_v27 = vadd.f32 %v5097_v35, %v5095_v26  ;;  %v5109_v54 = vadd.f32 %v5108_v23, %v5107_v10  ;;  %v7222_v47 = vld [vmem:[#allocation14 + $0xa8] ss:$16 sps:$4 sm:$0xff]   ;;  %v7227_v43 = vld [vmem:[#allocation14 + $0xcc] ss:$16 sps:$4 sm:$0xff]  }
 0x5cd   :  { %v5103_v37 = vrot.slane %v5102_v17, 1  ;;  %v5113_v60 = vrot.slane %v5112_v20, 4  ;;  %v7225_v18 = vld [vmem:[#allocation14 + $0xc8] ss:$16 sps:$4 sm:$0xff]   ;;  %v7230_v11 = vld [vmem:[#allocation14 + $0xec] ss:$16 sps:$4 sm:$0xff]  }
 0x5ce   :  { %v5120_v2 = vrot.slane %v5119_v27, 4  ;;  %v5110_v41 = vrot.slane %v5109_v54, 1  ;;  %v7228_v57 = vld [vmem:[#allocation14 + $0xe8] ss:$16 sps:$4 sm:$0xff]   ;;  %v7233_v10 = vld [vmem:[#allocation14 + $0x10c] ss:$16 sps:$4 sm:$0xff]  }
 0x5cf   :  { %v5114_v39 = vadd.f32 %v5113_v60, %v5112_v20  ;;  %v5104_v63 = vadd.f32 %v5103_v37, %v5102_v17  ;;  %v7231_v48 = vld [vmem:[#allocation14 + $0x108] ss:$16 sps:$4 sm:$0xff]   ;;  %v7236_v33 = vld [vmem:[#allocation14 + $0x12c] ss:$16 sps:$4 sm:$0xff]  }
 0x5d0   :  { %v5121_v61 = vadd.f32 %v5120_v2, %v5119_v27  ;;  %v5111_v53 = vadd.f32 %v5110_v41, %v5109_v54  ;;  %v7234_v40 = vld [vmem:[#allocation14 + $0x128] ss:$16 sps:$4 sm:$0xff]   ;;  %v7239_v23 = vld [vmem:[#allocation14 + $0x14c] ss:$16 sps:$4 sm:$0xff]  }
 0x5d1   :  { %v5115_v62 = vrot.slane %v5114_v39, 2  ;;  %v5127_v56 = vmul.f32 0.0625, %v5104_v63  ;;  %v7237_v13 = vld [vmem:[#allocation14 + $0x148] ss:$16 sps:$4 sm:$0xff]   ;;  %v7242_v44 = vld [vmem:[#allocation14 + $0x16c] ss:$16 sps:$4 sm:$0xff]  }
 0x5d2   :  { %v5122_v15 = vrot.slane %v5121_v61, 2  ;;  %v5128_v51 = vmul.f32 0.0625, %v5111_v53  ;;  %v7240_v17 = vld [vmem:[#allocation14 + $0x168] ss:$16 sps:$4 sm:$0xff]   ;;  %v7245_v26 = vld [vmem:[#allocation14 + $0x18c] ss:$16 sps:$4 sm:$0xff]  }
 0x5d3   :  { %v5116_v5 = vadd.f32 %v5115_v62, %v5114_v39  ;;  %v5131_v42 = vpack.c.bf16 %v5127_v56, %v5127_v56  ;;  %v7243_v20 = vld [vmem:[#allocation14 + $0x188] ss:$16 sps:$4 sm:$0xff]   ;;  %v7248_v35 = vld [vmem:[#allocation14 + $0x1ac] ss:$16 sps:$4 sm:$0xff]   ;;  %v5211_v56 = vsub.s32 2, %v8008_v38 }
 0x5d4   :  { %v5123_v24 = vadd.f32 %v5122_v15, %v5121_v61  ;;  %v5132_v9 = vpack.c.bf16 %v5128_v51, %v5128_v51  ;;  %v7246_v27 = vld [vmem:[#allocation14 + $0x1a8] ss:$16 sps:$4 sm:$0xff]   ;;  %v7251_v54 = vld [vmem:[#allocation14 + $0x1cc] ss:$16 sps:$4 sm:$0xff]  }
 0x5d5   :  { %v5117_v19 = vrot.slane %v5116_v5, 1  ;;  %v5225_v50 = vunpack.c.l.b16 %v5131_v42  ;;  %v7249_v37 = vld [vmem:[#allocation14 + $0x1c8] ss:$16 sps:$4 sm:$0xff]   ;;  %v7254_v60 = vld [vmem:[#allocation14 + $0x1ec] ss:$16 sps:$4 sm:$0xff]  }
 0x5d6   :  { %v5124_v6 = vrot.slane %v5123_v24, 1  ;;  %v5226_v29 = vunpack.c.l.b16 %v5132_v9  ;;  %v7252_v2 = vld [vmem:[#allocation14 + $0x1e8] ss:$16 sps:$4 sm:$0xff]   ;;  %v5199_v41 = vld [vmem:[%s8346_s11] sm:$0xf]  ;;  %s7435_s11 = smov [#allocation16]  }
 0x5d7   :  { %v5118_v14 = vadd.f32 %v5117_v19, %v5116_v5  ;;  %v5204_v39 = vrot.slane %v5199_v41, %v8011_v22  ;;  %v5208_v61 = vrot.slane %v5199_v41, %v8017_v12  ;;  %s5687_s3 = sshll.u32 %s7435_s11, 4  ;;  %s5688_s3 = int_to_ptr.vmem [resolvable:$true] %s5687_s3 }
 0x5d8   :  { %v5125_v36 = vadd.f32 %v5124_v6, %v5123_v24  ;;  %v7434_v6 = vmov 1966171168   ;;  %s7389_s18 = scalar_lea.vmem %s5688_s3, 128  ;;  %p7394_p7 = scmp.lt.s32.totalorder %s5688_s3, %s5688_s3 }
 0x5d9   :  { %v5129_v16 = vmul.f32 0.0625, %v5118_v14  ;;  %v5645_v51 = vunpack.c.l.s4 %v7434_v6  ;;  %v5215_v14 = vsub.s32 3, %v8008_v38  ;;  %p7390_p6 = scmp.ne.s32.totalorder %s5688_s3, %s7389_s18  ;;  %p7395_p8 = scmp.lt.s32.totalorder %s7389_s18, %s7389_s18 }
 0x5da   :  { %v5130_v45 = vmul.f32 0.0625, %v5125_v36  ;;  %v5212_v36 = vrot.slane %v5199_v41, %v5211_v56 }
 0x5db   :  { %v5133_v32 = vpack.c.bf16 %v5129_v16, %v5129_v16  ;;  %v5646_v16 = vunpack.c.0.s8 %v5645_v51  ;;  %v5216_v42 = vrot.slane %v5199_v41, %v5215_v14  ;;  %p7396_p9 = por %p7395_p8, %p7394_p7 }
 0x5dc   :  { %v5134_v1 = vpack.c.bf16 %v5130_v45, %v5130_v45 }
 0x5dd   :  { %v5227_v49 = vunpack.c.l.b16 %v5133_v32  ;;  %v5649_v12 = vsub.s32 %v5646_v16, %v8008_v38  ;;  %p7397_p10 = pnand %p7396_p9, %p7390_p6 }
 0x5de   :  { %v5228_v59 = vunpack.c.l.b16 %v5134_v1 }
 0x5df   :  { %v5230_v3 = vsel %vm5229_vm0, %v5227_v49, %v5225_v50 }
 0x5e0   :  { %v5231_v28 = vsel %vm5229_vm0, %v5228_v59, %v5226_v29  ;;  %v8307_v31 = vpack.c.b16 %v5230_v3, %v5230_v3 }
 0x5e1   :  { %v5233_v58 = vpack.c.b16 %v5231_v28, %v5231_v28 }
 0x5e3   :  { %5588 = vmatprep.mubr.bf16.mxu1 %v5233_v58 }
 0x5e4   :  { %5589 = vmatmul.mubr.bf16.vlgmr.msra.gmra.mrb[20].mxu1 %v8307_v31 }
 0x5e5   :  { %5598 = vmatpush1.bf16.msra.mxu1 %v7207_v30  ;;  %5629 = vmatprep.mubr.bf16.mxu1 %v5233_v58 }
 0x5e6   :  { %5599 = vmatprep.subr.bf16.mxu1 %v7212_v34 }
 0x5e9   :  { %5600 = vmatpush1.bf16.msra.mxu1 %v7210_v46 }
 0x5ea   :  { %5601 = vmatprep.subr.bf16.mxu1 %v7215_v7 }
 0x5ed   :  { %5602 = vmatpush1.bf16.msra.mxu1 %v7213_v0 }
 0x5ee   :  { %5603 = vmatprep.subr.bf16.mxu1 %v7218_v4 }
 0x5f1   :  { %5604 = vmatpush1.bf16.msra.mxu1 %v7216_v8 }
 0x5f2   :  { %5605 = vmatprep.subr.bf16.mxu1 %v7221_v25 }
 0x5f5   :  { %5606 = vmatpush1.bf16.msra.mxu1 %v7219_v21 }
 0x5f6   :  { %5607 = vmatprep.subr.bf16.mxu1 %v7224_v55 }
 0x5f9   :  { %5608 = vmatpush1.bf16.msra.mxu1 %v7222_v47 }
 0x5fa   :  { %5609 = vmatprep.subr.bf16.mxu1 %v7227_v43 }
 0x5fd   :  { %5610 = vmatpush1.bf16.msra.mxu1 %v7225_v18 }
 0x5fe   :  { %5611 = vmatprep.subr.bf16.mxu1 %v7230_v11 }
 0x601   :  { %5612 = vmatpush1.bf16.msra.mxu1 %v7228_v57 }
 0x602   :  { %5613 = vmatprep.subr.bf16.mxu1 %v7233_v10 }
 0x605   :  { %5614 = vmatpush1.bf16.msra.mxu1 %v7231_v48 }
 0x606   :  { %5615 = vmatprep.subr.bf16.mxu1 %v7236_v33 }
 0x609   :  { %5616 = vmatpush1.bf16.msra.mxu1 %v7234_v40 }
 0x60a   :  { %5617 = vmatprep.subr.bf16.mxu1 %v7239_v23 }
 0x60d   :  { %5618 = vmatpush1.bf16.msra.mxu1 %v7237_v13 }
 0x60e   :  { %5619 = vmatprep.subr.bf16.mxu1 %v7242_v44 }
 0x611   :  { %5620 = vmatpush1.bf16.msra.mxu1 %v7240_v17 }
 0x612   :  { %5621 = vmatprep.subr.bf16.mxu1 %v7245_v26 }
 0x615   :  { %5622 = vmatpush1.bf16.msra.mxu1 %v7243_v20 }
 0x616   :  { %5623 = vmatprep.subr.bf16.mxu1 %v7248_v35 }
 0x619   :  { %5624 = vmatpush1.bf16.msra.mxu1 %v7246_v27 }
 0x61a   :  { %5625 = vmatprep.subr.bf16.mxu1 %v7251_v54 }
 0x61d   :  { %5626 = vmatpush1.bf16.msra.mxu1 %v7249_v37 }
 0x61e   :  { %5627 = vmatprep.subr.bf16.mxu1 %v7254_v60 }
 0x621   :  { %5628 = vmatpush1.bf16.msra.mxu1 %v7252_v2 }
 0x624   :  { %5630 = vmatmul.mubr.bf16.vlgmr.msra.gmra.mrb[24].mxu1 %v8307_v31 }
 0x6b7   :  { %v5590_v62 = vpop.f32.mrb[20].mxu1 }
 0x6b8   :  { %v5591_v63 = vadd.f32 %v5590_v62, %v5204_v39  ;;  %v5592_v15 = vpop.f32.mrb[21].mxu1 }
 0x6b9   :  { %v5593_v53 = vadd.f32 %v5592_v15, %v5208_v61  ;;  %v5594_v5 = vpop.f32.mrb[22].mxu1 }
 0x6ba   :  { %v5595_v24 = vpop.f32.mrb[23].mxu1 }
 0x6bb   :  { %v5642_v19 = vcombine.low %v5591_v63, %v5593_v53 }
 0x6bd   :  { %v5650_v29 = vrot.slane %v5642_v19, %v5649_v12 }
 0x6f7   :  { %v5631_v45 = vpop.f32.mrb[24].mxu1 }
 0x6f8   :  { %v5632_v22 = vadd.f32 %v5631_v45, %v5212_v36  ;;  %v5633_v9 = vpop.f32.mrb[25].mxu1 }
 0x6f9   :  { %v5634_v32 = vadd.f32 %v5633_v9, %v5216_v42  ;;  %v5635_v1 = vpop.f32.mrb[26].mxu1 }
 0x6fa   :  { %v5636_v50 = vpop.f32.mrb[27].mxu1 }
 0x6fb   :  { %v5643_v49 = vcombine.low %v5632_v22, %v5634_v32 }
 0x6fd   :  { %v5657_v59 = vrot.slane %v5643_v49, %v5649_v12 }
 0x6ff   :  { %v5658_v3 = vcombine.low %v5650_v29, %v5657_v59  ;;  %v5659_v28 = vcombine.high %v5650_v29, %v5657_v59 }
 0x701   :  { %v5666_v58 = vrot.slane %v5658_v3, %v5649_v12  ;;  %v5673_v30 = vrot.slane %v5659_v28, %v5649_v12 }
 0x703   :  { %5680 = vst.msk [vmem:[#allocation16] sm:$0xf] %vm5678_vm10, %v5666_v58  ;;  %5681 = vst.msk [vmem:[#allocation16 + $0x4] sm:$0xf] %vm5678_vm10, %v5673_v30 }
 0x704   :  { %7400 = shalt.err (!%p7397_p10)
}
 0x705   :  { %s7401_s25 = scalar_lea.hbm %s8347_s12, 128 }
 0x706   :  { %p7402_p11 = scmp.ne.s32.totalorder %s8347_s12, %s7401_s25  ;;  %p7405_p12 = scmp.lt.u32.totalorder %s7401_s25, %s8347_s12 }
 0x708   :  { %p7407_p13 = pnand %p7405_p12, %p7402_p11 }
 0x70a   :  { %7410 = shalt.err (!%p7407_p13)
}
 0x70b   :  { %5693 = dma.vmem_to_hbm [thread:$0]  %s5688_s3, 128, %s8347_s12, [#allocation7], %s7423_s15, %s7423_s15, %s7424_s16  }
 0x70c   :  { %7419 = dma.done.wait [#allocation7], 128  }
 0x70d   :  { %7420 = vsyncadd [#allocation7], 4294967168 }
 0x70e   :  { %5697 = vsyncpa [#allocation6], 1 }
 0x70f   :  { %5698 = vsyncpa [#allocation9], 1 }
 0x710   :  { %5699 = vsyncpa [#allocation12], 1 }
 0x711   :  { %5700 = vsyncpa [#allocation15], 1 }
 0x712   :  { %5701 = vsyncpa [#allocation7], 1 }

</bundles_post_ra>
